<compile_context>
chip_gen: v5e
topology: v5e:2x2
jax: 0.10.0
libtpu: 0.0.40
codegen_flags: <defaults>
</compile_context>

<pallas_src>
import functools

import jax
import jax.numpy as jnp
from jax.experimental import pallas as pl
from jax.experimental.pallas import tpu as pltpu

BN_EPS = 1e-5
MXU_DTYPE = jnp.bfloat16   # MXU input dtype (accumulation is always f32). Use jnp.float32 for exactness.


def _largest_divisor_leq(n, cap):
    cap = max(1, min(n, cap))
    for d in range(cap, 0, -1):
        if n % d == 0:
            return d
    return 1


# --------------------------------------------------------------------------------------
# Kernel 1: 3x3 "same" conv over B images per grid step (im2col, single large-K matmul)
#           + per-block BatchNorm partial statistics (channel sum / sum-of-squares).
# --------------------------------------------------------------------------------------
def _conv3x3_stats_kernel(xpad_ref, w_ref, y_ref, part_ref, *, B, H, W, Cin, Cout):
    """xpad_ref: (B, H+2, W+2, Cin) zero-padded NHWC tile (MXU_DTYPE)
       w_ref:    (9*Cin, Cout) weights, rows ordered (dh, dw, ci)      (MXU_DTYPE)
       y_ref:    (B*H*W, Cout) conv output rows (f32)
       part_ref: (1, 2, Cout)  [channel sum, channel sum-of-squares] for this block
    """
    xp = xpad_ref[...]
    # im2col: one (B*H*W, 9*Cin) patch matrix -> one MXU matmul with K = 9*Cin.
    cols = []
    for dh in range(3):
        for dw in range(3):
            cols.append(xp[:, dh:dh + H, dw:dw + W, :].reshape(B * H * W, Cin))
    patches = jnp.concatenate(cols, axis=-1)                                   # (B*H*W, 9*Cin)
    acc = jnp.dot(patches, w_ref[...], preferred_element_type=jnp.float32)     # (B*H*W, Cout) f32
    # TODO(synk): for realistic Cout (128-256) tile over H rows / use a VMEM scratch accumulator
    # to bound vreg pressure, and hoist the zero-pad into an in-kernel halo scratch.

    y_ref[...] = acc

    # Per-block partials for training-mode BatchNorm statistics.
    s = jnp.sum(acc, axis=0, keepdims=True)                                    # (1, Cout)
    sq = jnp.sum(acc * acc, axis=0, keepdims=True)                             # (1, Cout)
    part_ref[...] = jnp.concatenate([s, sq], axis=0)[None]                     # (1, 2, Cout)


# --------------------------------------------------------------------------------------
# Kernel 2: finish BN statistics from the partials, normalize + ReLU one lane-dense tile.
# Activation is viewed as (N, H, W*Cout) so loads/stores use full 128-lane vregs.
# --------------------------------------------------------------------------------------
def _bn_relu_kernel(part_ref, g_ref, b_ref, y_ref, o_ref, *, W, C, count, relu):
    """part_ref: (NB, 2, C) all blocks' partial [sum, sumsq]   (f32)
       g_ref, b_ref: (1, C) affine params                       (f32)
       y_ref, o_ref: (Bn, H, W*C) lane-dense activation tile (aliased in HBM, f32)
    """
    tot = jnp.sum(part_ref[...], axis=0)                         # (2, C)
    inv_n = 1.0 / count
    mean = tot[0:1, :] * inv_n                                   # (1, C)
    var = jnp.maximum(tot[1:2, :] * inv_n - mean * mean, 0.0)    # biased batch variance
    scale = g_ref[...] * jax.lax.rsqrt(var + BN_EPS)             # (1, C)
    shift = b_ref[...] - mean * scale                            # (1, C)
    # Broadcast the per-channel affine across the lane-dense (..., W*C) layout
    # (channel index is j % C along the last axis).
    scale_wc = jnp.concatenate([scale] * W, axis=1)[:, None, :]  # (1, 1, W*C)
    shift_wc = jnp.concatenate([shift] * W, axis=1)[:, None, :]  # (1, 1, W*C)
    out = y_ref[...] * scale_wc + shift_wc
    if relu:
        out = jnp.maximum(out, 0.0)
    o_ref[...] = out


def convolution_block(x_nchw, conv_w, conv_b, bn_gamma, bn_beta, *, relu=True):
    """Forward pass of ConvolutionBlock.

    x_nchw: (N, Cin, H, W) f32, conv_w: (Cout, Cin, 3, 3), bn_gamma/bn_beta: (Cout,).
    Returns (N, Cout, H, W) f32.

    conv_b is accepted for API fidelity but not applied: a per-channel constant added before
    training-mode BatchNorm cancels exactly in (y - batch_mean), so the output is unchanged.
    """
    del conv_b
    N, Cin, H, W = x_nchw.shape
    Cout = conv_w.shape[0]

    # ---- glue: NCHW -> padded NHWC (bf16 MXU inputs), weights -> (9*Cin, Cout) ----
    x = jnp.transpose(x_nchw, (0, 2, 3, 1)).astype(MXU_DTYPE)
    x_pad = jnp.pad(x, ((0, 0), (1, 1), (1, 1), (0, 0)))
    w2 = jnp.transpose(conv_w, (2, 3, 1, 0)).reshape(9 * Cin, Cout).astype(MXU_DTYPE)
    g2 = bn_gamma.reshape(1, Cout).astype(jnp.float32)
    be2 = bn_beta.reshape(1, Cout).astype(jnp.float32)

    # Images per grid step: as many as fit a conservative ~8 MiB per-step VMEM working set
    # (double-buffered input + patches + f32 accumulator + double-buffered output),
    # conservative enough for v7x's 32 MiB scoped / 64 MiB physical VMEM.
    per_img = H * W * (9 * Cin * 2 * 2 + Cout * 4 * 3) + (H + 2) * (W + 2) * Cin * 2 * 2
    B = _largest_divisor_leq(N, (8 << 20) // max(per_img, 1))
    nb = N // B

    # ---- pass 1: conv (+ BN partial stats), grid over batch blocks ----
    y_rows, partials = pl.pallas_call(
        functools.partial(_conv3x3_stats_kernel, B=B, H=H, W=W, Cin=Cin, Cout=Cout),
        out_shape=(
            jax.ShapeDtypeStruct((N * H * W, Cout), jnp.float32),
            jax.ShapeDtypeStruct((nb, 2, Cout), jnp.float32),
        ),
        grid_spec=pltpu.PrefetchScalarGridSpec(
            num_scalar_prefetch=0,
            grid=(nb,),
            in_specs=[
                pl.BlockSpec((B, H + 2, W + 2, Cin), lambda n: (n, 0, 0, 0)),
                pl.BlockSpec((9 * Cin, Cout), lambda n: (0, 0)),
            ],
            out_specs=[
                pl.BlockSpec((B * H * W, Cout), lambda n: (n, 0)),
                pl.BlockSpec((1, 2, Cout), lambda n: (n, 0, 0)),
            ],
        ),
        compiler_params=pltpu.CompilerParams(dimension_semantics=("parallel",)),
    )(x_pad, w2)

    # Lane-dense view of the conv output: (N*H*W, Cout) and (N, H, W*Cout) are the same
    # row-major buffer, so this reshape is a free bitcast in XLA.
    y = y_rows.reshape(N, H, W * Cout)

    # ---- pass 2: BN normalize (+ ReLU), tiled, grid-parallel, in place over y ----
    y_out = pl.pallas_call(
        functools.partial(_bn_relu_kernel, W=W, C=Cout, count=float(N * H * W), relu=relu),
        out_shape=jax.ShapeDtypeStruct((N, H, W * Cout), jnp.float32),
        grid_spec=pltpu.PrefetchScalarGridSpec(
            num_scalar_prefetch=0,
            grid=(nb,),
            in_specs=[
                pl.BlockSpec((nb, 2, Cout), lambda n: (0, 0, 0)),
                pl.BlockSpec((1, Cout), lambda n: (0, 0)),
                pl.BlockSpec((1, Cout), lambda n: (0, 0)),
                pl.BlockSpec((B, H, W * Cout), lambda n: (n, 0, 0)),
            ],
            out_specs=pl.BlockSpec((B, H, W * Cout), lambda n: (n, 0, 0)),
        ),
        input_output_aliases={3: 0},
        compiler_params=pltpu.CompilerParams(dimension_semantics=("parallel",)),
    )(partials, g2, be2, y)

    # back to NCHW
    return jnp.transpose(y_out.reshape(N, H, W, Cout), (0, 3, 1, 2))


def init_params(key, in_channels, out_channels):
    """Deterministic init matching the PyTorch module's __init__."""
    kw, kb = jax.random.split(key)
    # kaiming_normal_(weight, mode='fan_out', nonlinearity='relu'): std = sqrt(2 / (Cout*3*3))
    fan_out = out_channels * 3 * 3
    std = (2.0 / fan_out) ** 0.5
    conv_w = jax.random.normal(kw, (out_channels, in_channels, 3, 3), jnp.float32) * std
    # nn.Conv2d default bias init: U(-1/sqrt(fan_in), 1/sqrt(fan_in)), fan_in = Cin*3*3
    fan_in = in_channels * 3 * 3
    bound = 1.0 / (fan_in ** 0.5)
    conv_b = jax.random.uniform(kb, (out_channels,), jnp.float32, -bound, bound)
    bn_gamma = jnp.ones((out_channels,), jnp.float32)
    bn_beta = jnp.zeros((out_channels,), jnp.float32)
    return conv_w, conv_b, bn_gamma, bn_beta


def _reference(x, conv_w, conv_b, g, b, relu=True):
    """Pure-JAX f32 reference: conv3x3 + bias -> training-mode BatchNorm2d -> ReLU."""
    y = jax.lax.conv_general_dilated(
        x, conv_w, window_strides=(1, 1), padding="SAME",
        dimension_numbers=("NCHW", "OIHW", "NCHW"),
        precision=jax.lax.Precision.HIGHEST)
    y = y + conv_b[None, :, None, None]
    mean = jnp.mean(y, axis=(0, 2, 3), keepdims=True)
    var = jnp.mean((y - mean) ** 2, axis=(0, 2, 3), keepdims=True)
    out = g[None, :, None, None] * (y - mean) * jax.lax.rsqrt(var + BN_EPS) + b[None, :, None, None]
    return jnp.maximum(out, 0.0) if relu else out


if __name__ == "__main__":
    key = jax.random.PRNGKey(0)
    kx, kp = jax.random.split(key)

    N, Cin, Cout, H, W = 2, 4, 16, 16, 16
    x = jax.random.normal(kx, (N, Cin, H, W), jnp.float32)
    conv_w, conv_b, bn_gamma, bn_beta = init_params(kp, Cin, Cout)

    block = jax.jit(functools.partial(convolution_block, relu=True))
    out = jax.block_until_ready(block(x, conv_w, conv_b, bn_gamma, bn_beta))

    assert out.shape == (N, Cout, H, W)
    ref = _reference(x, conv_w, conv_b, bn_gamma, bn_beta, relu=True)
    # bf16 MXU inputs with f32 accumulation -> small rounding error vs. the f32 reference.
    assert float(jnp.max(jnp.abs(out - ref))) < 0.15
    print("KERNEL_OK")
</pallas_src>

<mosaic_0001>
module attributes {stable_mosaic.version = 11 : i64} {
  func.func @_conv3x3_stats_kernel(%arg0: i32, %arg1: memref<2x18x18x4xbf16, #tpu.memory_space<vmem>>, %arg2: memref<36x16xbf16, #tpu.memory_space<vmem>>, %arg3: memref<512x16xf32, #tpu.memory_space<vmem>>, %arg4: memref<1x2x16xf32, #tpu.memory_space<vmem>>) attributes {dimension_semantics = [#tpu.dimension_semantics<parallel>], iteration_bounds = array<i64: 1>, scalar_prefetch = 0 : i64, scratch_operands = 0 : i64, tpu.core_type = #tpu.core_type<tc>, window_params = [{transform_indices = @transform_0, window_bounds = array<i64: 2, 18, 18, 4>}, {pipeline_mode = #tpu.pipeline_mode<synchronous>, transform_indices = @transform_1, window_bounds = array<i64: 36, 16>}, {transform_indices = @transform_2, window_bounds = array<i64: 512, 16>}, {transform_indices = @transform_3, window_bounds = array<i64: 1, 2, 16>}]} {
    %c0 = arith.constant 0 : index
    %c0_0 = arith.constant 0 : index
    %c0_1 = arith.constant 0 : index
    %c0_2 = arith.constant 0 : index
    %0 = vector.load %arg1[%c0, %c0_0, %c0_1, %c0_2] : memref<2x18x18x4xbf16, #tpu.memory_space<vmem>>, vector<2x18x18x4xbf16>
    %1 = vector.extract_strided_slice %0 {offsets = [0, 0, 0, 0], sizes = [2, 16, 16, 4], strides = [1, 1, 1, 1]} : vector<2x18x18x4xbf16> to vector<2x16x16x4xbf16>
    %2 = vector.shape_cast %1 : vector<2x16x16x4xbf16> to vector<512x4xbf16>
    %3 = vector.extract_strided_slice %0 {offsets = [0, 0, 1, 0], sizes = [2, 16, 16, 4], strides = [1, 1, 1, 1]} : vector<2x18x18x4xbf16> to vector<2x16x16x4xbf16>
    %4 = vector.shape_cast %3 : vector<2x16x16x4xbf16> to vector<512x4xbf16>
    %5 = vector.extract_strided_slice %0 {offsets = [0, 0, 2, 0], sizes = [2, 16, 16, 4], strides = [1, 1, 1, 1]} : vector<2x18x18x4xbf16> to vector<2x16x16x4xbf16>
    %6 = vector.shape_cast %5 : vector<2x16x16x4xbf16> to vector<512x4xbf16>
    %7 = vector.extract_strided_slice %0 {offsets = [0, 1, 0, 0], sizes = [2, 16, 16, 4], strides = [1, 1, 1, 1]} : vector<2x18x18x4xbf16> to vector<2x16x16x4xbf16>
    %8 = vector.shape_cast %7 : vector<2x16x16x4xbf16> to vector<512x4xbf16>
    %9 = vector.extract_strided_slice %0 {offsets = [0, 1, 1, 0], sizes = [2, 16, 16, 4], strides = [1, 1, 1, 1]} : vector<2x18x18x4xbf16> to vector<2x16x16x4xbf16>
    %10 = vector.shape_cast %9 : vector<2x16x16x4xbf16> to vector<512x4xbf16>
    %11 = vector.extract_strided_slice %0 {offsets = [0, 1, 2, 0], sizes = [2, 16, 16, 4], strides = [1, 1, 1, 1]} : vector<2x18x18x4xbf16> to vector<2x16x16x4xbf16>
    %12 = vector.shape_cast %11 : vector<2x16x16x4xbf16> to vector<512x4xbf16>
    %13 = vector.extract_strided_slice %0 {offsets = [0, 2, 0, 0], sizes = [2, 16, 16, 4], strides = [1, 1, 1, 1]} : vector<2x18x18x4xbf16> to vector<2x16x16x4xbf16>
    %14 = vector.shape_cast %13 : vector<2x16x16x4xbf16> to vector<512x4xbf16>
    %15 = vector.extract_strided_slice %0 {offsets = [0, 2, 1, 0], sizes = [2, 16, 16, 4], strides = [1, 1, 1, 1]} : vector<2x18x18x4xbf16> to vector<2x16x16x4xbf16>
    %16 = vector.shape_cast %15 : vector<2x16x16x4xbf16> to vector<512x4xbf16>
    %17 = vector.extract_strided_slice %0 {offsets = [0, 2, 2, 0], sizes = [2, 16, 16, 4], strides = [1, 1, 1, 1]} : vector<2x18x18x4xbf16> to vector<2x16x16x4xbf16>
    %18 = vector.shape_cast %17 : vector<2x16x16x4xbf16> to vector<512x4xbf16>
    %19 = tpu.concatenate %2, %4, %6, %8, %10, %12, %14, %16, %18 in 1 : vector<512x4xbf16>, vector<512x4xbf16>, vector<512x4xbf16>, vector<512x4xbf16>, vector<512x4xbf16>, vector<512x4xbf16>, vector<512x4xbf16>, vector<512x4xbf16>, vector<512x4xbf16> -> vector<512x36xbf16>
    %c0_3 = arith.constant 0 : index
    %c0_4 = arith.constant 0 : index
    %20 = vector.load %arg2[%c0_3, %c0_4] : memref<36x16xbf16, #tpu.memory_space<vmem>>, vector<36x16xbf16>
    %cst = arith.constant dense<0.000000e+00> : vector<512x16xf32>
    %21 = tpu.matmul %19, %20, %cst {dimension_numbers = #tpu.dot_dimension_numbers<[1], [0], [0], [1], [0, 0, 1, 1], [], []>} : vector<512x36xbf16>, vector<36x16xbf16>, vector<512x16xf32> -> vector<512x16xf32>
    %c0_5 = arith.constant 0 : index
    %c0_6 = arith.constant 0 : index
    %22 = vector.load %arg3[%c0_5, %c0_6] : memref<512x16xf32, #tpu.memory_space<vmem>>, vector<512x16xf32>
    tpu.vector_store %arg3[%c0_5, %c0_6], %21 {strides = array<i32>} : memref<512x16xf32, #tpu.memory_space<vmem>>, vector<512x16xf32>,
    %cst_7 = arith.constant dense<0.000000e+00> : vector<16xf32>
    %23 = vector.multi_reduction <add>, %21, %cst_7 [0] : vector<512x16xf32> to vector<16xf32>
    %24 = vector.shape_cast %23 : vector<16xf32> to vector<1x16xf32>
    %25 = arith.mulf %21, %21 : vector<512x16xf32>
    %cst_8 = arith.constant dense<0.000000e+00> : vector<16xf32>
    %26 = vector.multi_reduction <add>, %25, %cst_8 [0] : vector<512x16xf32> to vector<16xf32>
    %27 = vector.shape_cast %26 : vector<16xf32> to vector<1x16xf32>
    %28 = tpu.concatenate %24, %27 in 0 : vector<1x16xf32>, vector<1x16xf32> -> vector<2x16xf32>
    %29 = vector.shape_cast %28 : vector<2x16xf32> to vector<1x2x16xf32>
    %c0_9 = arith.constant 0 : index
    %c0_10 = arith.constant 0 : index
    %c0_11 = arith.constant 0 : index
    %30 = vector.load %arg4[%c0_9, %c0_10, %c0_11] : memref<1x2x16xf32, #tpu.memory_space<vmem>>, vector<1x2x16xf32>
    tpu.vector_store %arg4[%c0_9, %c0_10, %c0_11], %29 {strides = array<i32>} : memref<1x2x16xf32, #tpu.memory_space<vmem>>, vector<1x2x16xf32>,
    return
  }
  func.func @transform_0(%arg0: i32) -> (i32, i32, i32, i32) {
    %c0_i32 = arith.constant 0 : i32
    %c0_i32_0 = arith.constant 0 : i32
    %c0_i32_1 = arith.constant 0 : i32
    %c0_i32_2 = arith.constant 0 : i32
    return %arg0, %c0_i32, %c0_i32_0, %c0_i32_1 : i32, i32, i32, i32
  }
  func.func @transform_1(%arg0: i32) -> (i32, i32) {
    %c0_i32 = arith.constant 0 : i32
    %c0_i32_0 = arith.constant 0 : i32
    %c0_i32_1 = arith.constant 0 : i32
    return %c0_i32, %c0_i32_0 : i32, i32
  }
  func.func @transform_2(%arg0: i32) -> (i32, i32) {
    %c0_i32 = arith.constant 0 : i32
    %c0_i32_0 = arith.constant 0 : i32
    return %arg0, %c0_i32 : i32, i32
  }
  func.func @transform_3(%arg0: i32) -> (i32, i32, i32) {
    %c0_i32 = arith.constant 0 : i32
    %c0_i32_0 = arith.constant 0 : i32
    %c0_i32_1 = arith.constant 0 : i32
    return %arg0, %c0_i32, %c0_i32_0 : i32, i32, i32
  }
}

module attributes {stable_mosaic.version = 11 : i64} {
  func.func @_bn_relu_kernel(%arg0: i32, %arg1: memref<1x2x16xf32, #tpu.memory_space<vmem>>, %arg2: memref<1x16xf32, #tpu.memory_space<vmem>>, %arg3: memref<1x16xf32, #tpu.memory_space<vmem>>, %arg4: memref<2x16x256xf32, #tpu.memory_space<vmem>>, %arg5: memref<2x16x256xf32, #tpu.memory_space<vmem>>) attributes {dimension_semantics = [#tpu.dimension_semantics<parallel>], iteration_bounds = array<i64: 1>, scalar_prefetch = 0 : i64, scratch_operands = 0 : i64, tpu.core_type = #tpu.core_type<tc>, window_params = [{pipeline_mode = #tpu.pipeline_mode<synchronous>, transform_indices = @transform_0, window_bounds = array<i64: 1, 2, 16>}, {pipeline_mode = #tpu.pipeline_mode<synchronous>, transform_indices = @transform_1, window_bounds = array<i64: 1, 16>}, {pipeline_mode = #tpu.pipeline_mode<synchronous>, transform_indices = @transform_2, window_bounds = array<i64: 1, 16>}, {transform_indices = @transform_3, window_bounds = array<i64: 2, 16, 256>}, {transform_indices = @transform_4, window_bounds = array<i64: 2, 16, 256>}]} {
    %c0 = arith.constant 0 : index
    %c0_0 = arith.constant 0 : index
    %c0_1 = arith.constant 0 : index
    %0 = vector.load %arg1[%c0, %c0_0, %c0_1] : memref<1x2x16xf32, #tpu.memory_space<vmem>>, vector<1x2x16xf32>
    %cst = arith.constant dense<0.000000e+00> : vector<2x16xf32>
    %1 = vector.multi_reduction <add>, %0, %cst [0] : vector<1x2x16xf32> to vector<2x16xf32>
    %2 = vector.extract_strided_slice %1 {offsets = [0, 0], sizes = [1, 16], strides = [1, 1]} : vector<2x16xf32> to vector<1x16xf32>
    %cst_2 = arith.constant 0.001953125 : f32
    %3 = vector.broadcast %cst_2 : f32 to vector<1x16xf32>
    %4 = arith.mulf %2, %3 : vector<1x16xf32>
    %5 = vector.extract_strided_slice %1 {offsets = [1, 0], sizes = [1, 16], strides = [1, 1]} : vector<2x16xf32> to vector<1x16xf32>
    %cst_3 = arith.constant 0.001953125 : f32
    %6 = vector.broadcast %cst_3 : f32 to vector<1x16xf32>
    %7 = arith.mulf %5, %6 : vector<1x16xf32>
    %8 = arith.mulf %4, %4 : vector<1x16xf32>
    %9 = arith.subf %7, %8 : vector<1x16xf32>
    %cst_4 = arith.constant 0.000000e+00 : f32
    %10 = vector.broadcast %cst_4 : f32 to vector<1x16xf32>
    %11 = arith.maximumf %9, %10 : vector<1x16xf32>
    %c0_5 = arith.constant 0 : index
    %c0_6 = arith.constant 0 : index
    %12 = vector.load %arg2[%c0_5, %c0_6] : memref<1x16xf32, #tpu.memory_space<vmem>>, vector<1x16xf32>
    %cst_7 = arith.constant 9.99999974E-6 : f32
    %13 = vector.broadcast %cst_7 : f32 to vector<1x16xf32>
    %14 = arith.addf %11, %13 : vector<1x16xf32>
    %15 = math.rsqrt %14 : vector<1x16xf32>
    %16 = arith.mulf %12, %15 : vector<1x16xf32>
    %c0_8 = arith.constant 0 : index
    %c0_9 = arith.constant 0 : index
    %17 = vector.load %arg3[%c0_8, %c0_9] : memref<1x16xf32, #tpu.memory_space<vmem>>, vector<1x16xf32>
    %18 = arith.mulf %4, %16 : vector<1x16xf32>
    %19 = arith.subf %17, %18 : vector<1x16xf32>
    %20 = tpu.concatenate %16, %16, %16, %16, %16, %16, %16, %16, %16, %16, %16, %16, %16, %16, %16, %16 in 1 : vector<1x16xf32>, vector<1x16xf32>, vector<1x16xf32>, vector<1x16xf32>, vector<1x16xf32>, vector<1x16xf32>, vector<1x16xf32>, vector<1x16xf32>, vector<1x16xf32>, vector<1x16xf32>, vector<1x16xf32>, vector<1x16xf32>, vector<1x16xf32>, vector<1x16xf32>, vector<1x16xf32>, vector<1x16xf32> -> vector<1x256xf32>
    %21 = vector.shape_cast %20 : vector<1x256xf32> to vector<1x1x256xf32>
    %22 = tpu.concatenate %19, %19, %19, %19, %19, %19, %19, %19, %19, %19, %19, %19, %19, %19, %19, %19 in 1 : vector<1x16xf32>, vector<1x16xf32>, vector<1x16xf32>, vector<1x16xf32>, vector<1x16xf32>, vector<1x16xf32>, vector<1x16xf32>, vector<1x16xf32>, vector<1x16xf32>, vector<1x16xf32>, vector<1x16xf32>, vector<1x16xf32>, vector<1x16xf32>, vector<1x16xf32>, vector<1x16xf32>, vector<1x16xf32> -> vector<1x256xf32>
    %23 = vector.shape_cast %22 : vector<1x256xf32> to vector<1x1x256xf32>
    %c0_10 = arith.constant 0 : index
    %c0_11 = arith.constant 0 : index
    %c0_12 = arith.constant 0 : index
    %24 = vector.load %arg4[%c0_10, %c0_11, %c0_12] : memref<2x16x256xf32, #tpu.memory_space<vmem>>, vector<2x16x256xf32>
    %25 = vector.broadcast %21 : vector<1x1x256xf32> to vector<2x16x256xf32>
    %26 = arith.mulf %24, %25 : vector<2x16x256xf32>
    %27 = vector.broadcast %23 : vector<1x1x256xf32> to vector<2x16x256xf32>
    %28 = arith.addf %26, %27 : vector<2x16x256xf32>
    %cst_13 = arith.constant 0.000000e+00 : f32
    %29 = vector.broadcast %cst_13 : f32 to vector<2x16x256xf32>
    %30 = arith.maximumf %28, %29 : vector<2x16x256xf32>
    %c0_14 = arith.constant 0 : index
    %c0_15 = arith.constant 0 : index
    %c0_16 = arith.constant 0 : index
    %31 = vector.load %arg5[%c0_14, %c0_15, %c0_16] : memref<2x16x256xf32, #tpu.memory_space<vmem>>, vector<2x16x256xf32>
    tpu.vector_store %arg5[%c0_14, %c0_15, %c0_16], %30 {strides = array<i32>} : memref<2x16x256xf32, #tpu.memory_space<vmem>>, vector<2x16x256xf32>,
    return
  }
  func.func @transform_0(%arg0: i32) -> (i32, i32, i32) {
    %c0_i32 = arith.constant 0 : i32
    %c0_i32_0 = arith.constant 0 : i32
    %c0_i32_1 = arith.constant 0 : i32
    %c0_i32_2 = arith.constant 0 : i32
    return %c0_i32, %c0_i32_0, %c0_i32_1 : i32, i32, i32
  }
  func.func @transform_1(%arg0: i32) -> (i32, i32) {
    %c0_i32 = arith.constant 0 : i32
    %c0_i32_0 = arith.constant 0 : i32
    %c0_i32_1 = arith.constant 0 : i32
    return %c0_i32, %c0_i32_0 : i32, i32
  }
  func.func @transform_2(%arg0: i32) -> (i32, i32) {
    %c0_i32 = arith.constant 0 : i32
    %c0_i32_0 = arith.constant 0 : i32
    %c0_i32_1 = arith.constant 0 : i32
    return %c0_i32, %c0_i32_0 : i32, i32
  }
  func.func @transform_3(%arg0: i32) -> (i32, i32, i32) {
    %c0_i32 = arith.constant 0 : i32
    %c0_i32_0 = arith.constant 0 : i32
    %c0_i32_1 = arith.constant 0 : i32
    return %arg0, %c0_i32, %c0_i32_0 : i32, i32, i32
  }
  func.func @transform_4(%arg0: i32) -> (i32, i32, i32) {
    %c0_i32 = arith.constant 0 : i32
    %c0_i32_0 = arith.constant 0 : i32
    %c0_i32_1 = arith.constant 0 : i32
    return %arg0, %c0_i32, %c0_i32_0 : i32, i32, i32
  }
}

</mosaic_0001>

<bundles_post_ra>
// kernel: convolution_block.3
= control target key start
LH: loop header
LB: loop body
LE: loop exit
PB: predicated region body
PF: predicated region fallthrough
CT: control target
= control target key end

     0   :  { %s169_s18 = smov 48   ;;  %s170_s19 = smov 16   ;;  %vm70_vm3 = vcmask 130048   ;;  %vm72_vm4 = vcmask 261120   ;;  %vm74_vm5 = vcmask 392192   ;;  %vm76_vm6 = vcmask 523264   ;;  %s270_s0 = inlined_call_operand.vmem [shape: f32[1,2,16], index: 0, kind: input, shape index: {}]   ;;  %s271_s1 = inlined_call_operand.vmem [shape: f32[1,16], index: 1, kind: input, shape index: {}]   ;;  %s272_s2 = inlined_call_operand.vmem [shape: f32[1,16], index: 2, kind: input, shape index: {}]   ;;  %s273_s3 = inlined_call_operand.vmem [shape: f32[2,16,256], index: 3, kind: input, shape index: {}, may-alias: {3,4}]   ;;  %s274_s4 = inlined_call_operand.vmem [shape: f32[2,16,256], index: 4, kind: output, shape index: {}, may-alias: {3,4}]  }
   0x1   :  { %v17_v0 = vld [vmem:[%s270_s0] sm:$0x3]  ;;  %s171_s20 = smov 64   ;;  %s172_s23 = smov 112   ;;  %vm78_vm7 = vcmask 654336   ;;  %vm80_vm8 = vcmask 785408  }
   0x2   :  { %v19_v1 = vmul.f32 0.001953125, %v17_v0  ;;  %v26_v14 = vld [vmem:[%s271_s1] sm:$0x1]  ;;  %s173_s24 = smov 32   ;;  %s174_s1 = smov 96   ;;  %vm82_vm9 = vcmask 916480  }
   0x3   :  { %v44_v19 = vld [vmem:[%s272_s2] sm:$0x1]  ;;  %s175_s25 = smov 80   ;;  %v115_v49 = vld [vmem:[%s273_s3 + $0x8] sm:$0xff]  ;;  %v116_v50 = vld [vmem:[%s273_s3 + $0x10] sm:$0xff] }
   0x4   :  { %v20_v2 = vmul.f32 %v19_v1, %v19_v1  ;;  %v114_v46 = vld [vmem:[%s273_s3] sm:$0xff]  ;;  %v117_v51 = vld [vmem:[%s273_s3 + $0x18] sm:$0xff]  ;;  %v119_v55 = vld [vmem:[%s273_s3 + $0x28] sm:$0xff] }
   0x5   :  { %v118_v54 = vld [vmem:[%s273_s3 + $0x20] sm:$0xff]  ;;  %v120_v56 = vld [vmem:[%s273_s3 + $0x30] sm:$0xff]  ;;  %v121_v59 = vld [vmem:[%s273_s3 + $0x38] sm:$0xff] }
   0x6   :  { %v22_v3 = vrot.slane %v20_v2, 7 }
   0x8   :  { %v24_v4 = vsub.f32 %v19_v1, %v22_v3 }
   0xa   :  { %v25_v5 = vmax.f32 %v24_v4, 0.0 }
   0xc   :  { %v27_v6 = vadd.f32 1e-05, %v25_v5 }
   0xe   :  { %167 = vrsqrt.f32 %v27_v6  ;;  %vm34_vm0 = vweird.f32 %v27_v6 }
  0x14   :  { %v168_v7 = vpop.eup %167 }
  0x15   :  { %v29_v8 = vmul.f32 %v168_v7, %v27_v6  ;;  %vm35_vm1 = vweird.f32 %v168_v7 }
  0x16   :  { %vm36_vm2 = vmor %vm34_vm0, %vm35_vm1 }
  0x17   :  { %v30_v9 = vmul.f32 %v168_v7, %v29_v8 }
  0x19   :  { %v31_v10 = vmul.f32 0.5, %v30_v9 }
  0x1b   :  { %v32_v11 = vsub.f32 1.5, %v31_v10 }
  0x1d   :  { %v33_v12 = vmul.f32 %v168_v7, %v32_v11 }
  0x1f   :  { %v37_v13 = vsel %vm36_vm2, %v168_v7, %v33_v12 }
  0x20   :  { %39 = vst [vmem:[#allocation1] sm:$0xff] %v37_v13 }
  0x27   :  { %v41_v15 = vld [vmem:[#allocation1 + $0x1] ss:$9 sm:$0xff] }
  0x28   :  { %v43_v16 = vmul.f32 %v41_v15, %v26_v14 }
  0x2a   :  { %v48_v17 = vperm.slane %v43_v16, 0  ;;  %v45_v18 = vmul.f32 %v43_v16, %v19_v1 }
  0x2c   :  { %55 = vrot.lane.b32.xlu1 %v48_v17, %s169_s18  ;;  %49 = vrot.lane.b32.xlu0 %v48_v17, %s170_s19  ;;  %v46_v20 = vsub.f32 %v44_v19, %v45_v18 }
  0x2d   :  { %58 = vrot.lane.b32.xlu2 %v48_v17, %s171_s20 }
  0x2e   :  { %v85_v21 = vperm.slane %v46_v20, 0 }
  0x34   :  { %67 = vrot.lane.b32.xlu1 %v48_v17, %s172_s23  ;;  %52 = vrot.lane.b32.xlu0 %v48_v17, %s173_s24 }
  0x35   :  { %64 = vrot.lane.b32.xlu2 %v48_v17, %s174_s1 }
  0x3c   :  { %61 = vrot.lane.b32.xlu0 %v48_v17, %s175_s25  ;;  %86 = vrot.lane.b32.xlu1 %v85_v21, %s170_s19 }
  0x3d   :  { %89 = vrot.lane.b32.xlu2 %v85_v21, %s173_s24 }
  0x44   :  { %95 = vrot.lane.b32.xlu0 %v85_v21, %s171_s20  ;;  %92 = vrot.lane.b32.xlu1 %v85_v21, %s169_s18 }
  0x45   :  { %98 = vrot.lane.b32.xlu2 %v85_v21, %s175_s25 }
  0x4c   :  { %101 = vrot.lane.b32.xlu0 %v85_v21, %s174_s1  ;;  %104 = vrot.lane.b32.xlu1 %v85_v21, %s172_s23 }
  0x87   :  { %v59_v22 = vpop.permute.xlu2 %58 }
  0x8f   :  { %v65_v27 = vpop.permute.xlu2 %64 }
  0x97   :  { %v90_v33 = vpop.permute.xlu2 %89 }
  0x9e   :  { %v56_v23 = vpop.permute.xlu1 %55  ;;  %v50_v24 = vpop.permute.xlu0 %49 }
  0x9f   :  { %v71_v28 = vsel %vm70_vm3, %v43_v16, %v50_v24  ;;  %v99_v43 = vpop.permute.xlu2 %98 }
  0xa6   :  { %v68_v25 = vpop.permute.xlu1 %67  ;;  %v53_v26 = vpop.permute.xlu0 %52 }
  0xa7   :  { %v73_v29 = vsel %vm72_vm4, %v71_v28, %v53_v26 }
  0xa8   :  { %v75_v32 = vsel %vm74_vm5, %v73_v29, %v56_v23 }
  0xa9   :  { %v77_v34 = vsel %vm76_vm6, %v75_v32, %v59_v22 }
  0xae   :  { %v62_v30 = vpop.permute.xlu0 %61  ;;  %v87_v31 = vpop.permute.xlu1 %86 }
  0xaf   :  { %v79_v35 = vsel %vm78_vm7, %v77_v34, %v62_v30  ;;  %v107_v36 = vsel %vm70_vm3, %v46_v20, %v87_v31 }
  0xb0   :  { %v81_v37 = vsel %vm80_vm8, %v79_v35, %v65_v27  ;;  %v108_v40 = vsel %vm72_vm4, %v107_v36, %v90_v33 }
  0xb1   :  { %v83_v42 = vsel %vm82_vm9, %v81_v37, %v68_v25 }
  0xb2   :  { %v122_v45 = vperm.slane %v83_v42, 0 }
  0xb4   :  { %v123_v57 = vmul.f32 %v122_v45, %v114_v46  ;;  %v124_v60 = vmul.f32 %v122_v45, %v115_v49  ;;  %v125_v61 = vmul.f32 %v122_v45, %v116_v50  ;;  %v126_v62 = vmul.f32 %v122_v45, %v117_v51 }
  0xb5   :  { %v127_v0 = vmul.f32 %v122_v45, %v118_v54  ;;  %v128_v1 = vmul.f32 %v122_v45, %v119_v55  ;;  %v129_v2 = vmul.f32 %v122_v45, %v120_v56  ;;  %v130_v7 = vmul.f32 %v122_v45, %v121_v59 }
  0xb6   :  { %v96_v38 = vpop.permute.xlu0 %95  ;;  %v93_v39 = vpop.permute.xlu1 %92 }
  0xb7   :  { %v109_v41 = vsel %vm74_vm5, %v108_v40, %v93_v39 }
  0xb8   :  { %v110_v44 = vsel %vm76_vm6, %v109_v41, %v96_v38 }
  0xb9   :  { %v111_v47 = vsel %vm78_vm7, %v110_v44, %v99_v43 }
  0xbe   :  { %v102_v48 = vpop.permute.xlu0 %101  ;;  %v105_v52 = vpop.permute.xlu1 %104 }
  0xbf   :  { %v112_v53 = vsel %vm80_vm8, %v111_v47, %v102_v48 }
  0xc0   :  { %v113_v58 = vsel %vm82_vm9, %v112_v53, %v105_v52 }
  0xc1   :  { %v131_v63 = vperm.slane %v113_v58, 0 }
  0xc3   :  { %v132_v3 = vadd.f32 %v131_v63, %v123_v57  ;;  %v133_v4 = vadd.f32 %v131_v63, %v124_v60  ;;  %v134_v5 = vadd.f32 %v131_v63, %v125_v61  ;;  %v135_v6 = vadd.f32 %v131_v63, %v126_v62 }
  0xc4   :  { %v136_v8 = vadd.f32 %v131_v63, %v127_v0  ;;  %v137_v9 = vadd.f32 %v131_v63, %v128_v1  ;;  %v138_v10 = vadd.f32 %v131_v63, %v129_v2  ;;  %v139_v14 = vadd.f32 %v131_v63, %v130_v7 }
  0xc5   :  { %v140_v11 = vmax.f32 %v132_v3, 0.0  ;;  %v141_v12 = vmax.f32 %v133_v4, 0.0  ;;  %v142_v13 = vmax.f32 %v134_v5, 0.0  ;;  %v143_v15 = vmax.f32 %v135_v6, 0.0 }
  0xc6   :  { %v144_v16 = vmax.f32 %v136_v8, 0.0  ;;  %v145_v17 = vmax.f32 %v137_v9, 0.0  ;;  %v146_v18 = vmax.f32 %v138_v10, 0.0  ;;  %v147_v19 = vmax.f32 %v139_v14, 0.0 }
  0xc7   :  { %148 = vst [vmem:[%s274_s4] sm:$0xff] %v140_v11 }
  0xc8   :  { %149 = vst [vmem:[%s274_s4 + $0x8] sm:$0xff] %v141_v12 }
  0xc9   :  { %150 = vst [vmem:[%s274_s4 + $0x10] sm:$0xff] %v142_v13 }
  0xca   :  { %151 = vst [vmem:[%s274_s4 + $0x18] sm:$0xff] %v143_v15 }
  0xcb   :  { %152 = vst [vmem:[%s274_s4 + $0x20] sm:$0xff] %v144_v16 }
  0xcc   :  { %153 = vst [vmem:[%s274_s4 + $0x28] sm:$0xff] %v145_v17 }
  0xcd   :  { %154 = vst [vmem:[%s274_s4 + $0x30] sm:$0xff] %v146_v18 }
  0xce   :  { %155 = vst [vmem:[%s274_s4 + $0x38] sm:$0xff] %v147_v19 }

// kernel: convolution_block.2
= control target key start
LH: loop header
LB: loop body
LE: loop exit
PB: predicated region body
PF: predicated region fallthrough
CT: control target
= control target key end

     0   :  { %vm122_vm0 = vsmask.f32 3328  ;;  %vm123_vm1 = vsmask.f32 7440  ;;  %v7132_v26 = vmov 0  ;;  %s3759_s11 = smov 4   ;;  %s7020_s0 = inlined_call_operand.vmem [shape: bf16[2,18,18,4], index: 0, kind: input, shape index: {}]   ;;  %s7021_s1 = inlined_call_operand.vmem [shape: bf16[36,16], index: 1, kind: input, shape index: {}]   ;;  %s7022_s2 = inlined_call_operand.vmem [shape: f32[512,16], index: 2, kind: output, shape index: {0}]   ;;  %s7023_s3 = inlined_call_operand.vmem [shape: f32[1,2,16], index: 3, kind: output, shape index: {1}]  }
   0x1   :  { %v26_v0 = vld [vmem:[%s7020_s0 + $0x30] sm:$0xf]  ;;  %v27_v1 = vld [vmem:[%s7020_s0 + $0x34] sm:$0xf]  ;;  %v28_v2 = vld [vmem:[%s7020_s0 + $0x38] sm:$0x1] }
   0x2   :  { %v222_v3 = vshrl.u32 %v26_v0, 16  ;;  %v225_v4 = vshll.u32 %v26_v0, 16  ;;  %v231_v5 = vshll.u32 %v27_v1, 16  ;;  %v235_v6 = vshrl.u32 %v27_v1, 16  ;;  %v20_v7 = vld [vmem:[%s7020_s0 + $0x18] sm:$0xf]  ;;  %vm3813_vm2 = vmor %vm122_vm0, %vm123_vm1 }
   0x3   :  { %v241_v8 = vshll.u32 %v28_v2, 16  ;;  %v21_v9 = vld [vmem:[%s7020_s0 + $0x1c] sm:$0xf]  ;;  %v22_v10 = vld [vmem:[%s7020_s0 + $0x20] sm:$0x1]  ;;  %v174_v11 = vshrl.u32 %v20_v7, 16 }
   0x4   :  { %v224_v12 = vrot.slane %v222_v3, 4  ;;  %v227_v13 = vrot.slane %v225_v4, 5  ;;  %v233_v14 = vrot.slane %v231_v5, 5  ;;  %v237_v15 = vrot.slane %v235_v6, 4  ;;  %v14_v16 = vld [vmem:[%s7020_s0] sm:$0xf] }
   0x5   :  { %v243_v17 = vrot.slane %v241_v8, 5  ;;  %v176_v18 = vrot.slane %v174_v11, 4  ;;  %v177_v19 = vshll.u32 %v20_v7, 16  ;;  %v183_v20 = vshll.u32 %v21_v9, 16  ;;  %v15_v25 = vld [vmem:[%s7020_s0 + $0x4] sm:$0xf] }
   0x6   :  { %v228_v21 = vor.u32 %v227_v13, %v224_v12  ;;  %v238_v22 = vor.u32 %v237_v15, %v233_v14  ;;  %v187_v23 = vshrl.u32 %v21_v9, 16  ;;  %v193_v24 = vshll.u32 %v22_v10, 16  ;;  %v16_v36 = vld [vmem:[%s7020_s0 + $0x8] sm:$0x1]  ;;  %v29_v44 = vld [vmem:[%s7020_s0 + $0x3c] sm:$0xf] }
   0x7   :  { %v7133_v26 = vsel %vm3813_vm2, 4294967295, %v7132_v26  ;;  %v179_v27 = vrot.slane %v177_v19, 5  ;;  %v185_v28 = vrot.slane %v183_v20, 5  ;;  %v126_v29 = vshrl.u32 %v14_v16, 16  ;;  %v30_v56 = vld [vmem:[%s7020_s0 + $0x40] sm:$0xf] }
   0x8   :  { %7134 = vst [vmem:[#allocation2_spill] sm:$0xff] %v7133_v26  ;;  %v129_v30 = vshll.u32 %v14_v16, 16  ;;  %v229_v31 = vrot.slane %v228_v21, 4  ;;  %v239_v32 = vrot.slane %v238_v22, 4  ;;  %v189_v33 = vrot.slane %v187_v23, 4  ;;  %s3760_s9 = smov 8  }
   0x9   :  { %v195_v34 = vrot.slane %v193_v24, 5  ;;  %v180_v35 = vor.u32 %v179_v27, %v176_v18  ;;  %v128_v37 = vrot.slane %v126_v29, 4  ;;  %v135_v39 = vshll.u32 %v15_v25, 16  ;;  %v31_v62 = vld [vmem:[%s7020_s0 + $0x44] sm:$0x1]  ;;  %s3761_s17 = smov 12  }
   0xa   :  { %v131_v38 = vrot.slane %v129_v30, 5  ;;  %v234_v40 = vsel %vm3813_vm2, %v229_v31, %v233_v14  ;;  %v244_v41 = vsel %vm3813_vm2, %v239_v32, %v243_v17  ;;  %v190_v42 = vor.u32 %v189_v33, %v185_v28  ;;  %v23_v63 = vld [vmem:[%s7020_s0 + $0x24] sm:$0xf]  ;;  %v24_v8 = vld [vmem:[%s7020_s0 + $0x28] sm:$0xf]  ;;  %s3762_s26 = smov 16  }
   0xb   :  { %v139_v43 = vshrl.u32 %v15_v25, 16  ;;  %v1456_v45 = vunpack.c.l.b16 %v234_v40  ;;  %v1457_v46 = vunpack.c.l.b16 %v244_v41  ;;  %v181_v47 = vrot.slane %v180_v35, 4  ;;  %v25_v12 = vld [vmem:[%s7020_s0 + $0x2c] sm:$0x1]  ;;  %v18_v31 = vld [vmem:[%s7020_s0 + $0x10] sm:$0xf] }
   0xc   :  { %v132_v48 = vor.u32 %v131_v38, %v128_v37  ;;  %v191_v49 = vrot.slane %v190_v42, 4  ;;  %v137_v50 = vrot.slane %v135_v39, 5  ;;  %v145_v52 = vshll.u32 %v16_v36, 16  ;;  %v17_v18 = vld [vmem:[%s7020_s0 + $0xc] sm:$0xf]  ;;  %s3763_s4 = smov 20  }
   0xd   :  { %v141_v51 = vrot.slane %v139_v43, 4  ;;  %v3827_v53 = vpack.c.b16 %v1457_v46, %v1456_v45  ;;  %v186_v54 = vsel %vm3813_vm2, %v181_v47, %v185_v28  ;;  %v246_v57 = vshrl.u32 %v29_v44, 16  ;;  %v19_v37 = vld [vmem:[%s7020_s0 + $0x14] sm:$0x1]  ;;  %v38_v42 = vld [vmem:[%s7020_s0 + $0x60] sm:$0xf] }
   0xe   :  { %v133_v55 = vrot.slane %v132_v48, 4  ;;  %v196_v58 = vsel %vm3813_vm2, %v191_v49, %v195_v34  ;;  %v1452_v59 = vunpack.c.l.b16 %v186_v54  ;;  %v147_v61 = vrot.slane %v145_v52, 5  ;;  %s3764_s5 = smov 28   ;;  %s3765_s6 = smov 32  }
   0xf   :  { %7135 = vst [vmem:[#allocation3_spill] sm:$0xff] %v3827_v53  ;;  %v142_v60 = vor.u32 %v141_v51, %v137_v50  ;;  %1552 = vrot.lane.b32.xlu2 %v3827_v53, %s3759_s11  ;;  %v1453_v0 = vunpack.c.l.b16 %v196_v58  ;;  %v248_v2 = vrot.slane %v246_v57, 4  ;;  %v249_v3 = vshll.u32 %v29_v44, 16  ;;  %s3766_s7 = smov 24  }
  0x10   :  { %v138_v1 = vsel %vm3813_vm2, %v133_v55, %v137_v50  ;;  %v255_v6 = vshll.u32 %v30_v56, 16  ;;  %v259_v7 = vshrl.u32 %v30_v56, 16  ;;  %v265_v11 = vshll.u32 %v31_v62, 16  ;;  %v39_v55 = vld [vmem:[%s7020_s0 + $0x64] sm:$0xf] }
  0x11   :  { %v143_v4 = vrot.slane %v142_v60, 4  ;;  %v1448_v5 = vunpack.c.l.b16 %v138_v1  ;;  %v3849_v9 = vpack.c.b16 %v1453_v0, %v1452_v59  ;;  %v251_v10 = vrot.slane %v249_v3, 5  ;;  %v35_v62 = vld [vmem:[%s7020_s0 + $0x54] sm:$0xf] }
  0x12   :  { %v198_v13 = vshrl.u32 %v23_v63, 16  ;;  %v257_v15 = vrot.slane %v255_v6, 5  ;;  %v261_v16 = vrot.slane %v259_v7, 4  ;;  %v201_v17 = vshll.u32 %v23_v63, 16 }
  0x13   :  { %v148_v14 = vsel %vm3813_vm2, %v143_v4, %v147_v61  ;;  %1548 = vrot.lane.b32.xlu1 %v3849_v9, %s3759_s11  ;;  %v252_v20 = vor.u32 %v251_v10, %v248_v2  ;;  %v267_v21 = vrot.slane %v265_v11, 5  ;;  %v207_v25 = vshll.u32 %v24_v8, 16  ;;  %v40_v61 = vld [vmem:[%s7020_s0 + $0x68] sm:$0x1]  ;;  %v36_v11 = vld [vmem:[%s7020_s0 + $0x58] sm:$0xf] }
  0x14   :  { %v1449_v19 = vunpack.c.l.b16 %v148_v14  ;;  %v200_v22 = vrot.slane %v198_v13, 4  ;;  %v262_v23 = vor.u32 %v261_v16, %v257_v15  ;;  %v203_v24 = vrot.slane %v201_v17, 5  ;;  %v37_v17 = vld [vmem:[%s7020_s0 + $0x5c] sm:$0x1] }
  0x15   :  { %v211_v27 = vshrl.u32 %v24_v8, 16  ;;  %v253_v29 = vrot.slane %v252_v20, 4  ;;  %v217_v30 = vshll.u32 %v25_v12, 16  ;;  %v150_v32 = vshrl.u32 %v17_v18, 16 }
  0x16   :  { %v1512_v28 = vpack.c.b16 %v1449_v19, %v1448_v5  ;;  %v263_v33 = vrot.slane %v262_v23, 4  ;;  %v204_v34 = vor.u32 %v203_v24, %v200_v22  ;;  %v209_v35 = vrot.slane %v207_v25, 5 }
  0x17   :  { %v213_v36 = vrot.slane %v211_v27, 4  ;;  %v258_v38 = vsel %vm3813_vm2, %v253_v29, %v257_v15  ;;  %v219_v39 = vrot.slane %v217_v30, 5  ;;  %v152_v40 = vrot.slane %v150_v32, 4  ;;  %v32_v27 = vld [vmem:[%s7020_s0 + $0x48] sm:$0xf] }
  0x18   :  { %1544 = vrot.lane.b32.xlu0 %v1512_v28, %s3759_s11  ;;  %v153_v41 = vshll.u32 %v17_v18, 16  ;;  %v268_v43 = vsel %vm3813_vm2, %v263_v33, %v267_v21  ;;  %v1458_v44 = vunpack.c.l.b16 %v258_v38  ;;  %v205_v45 = vrot.slane %v204_v34, 4 }
  0x19   :  { %v214_v46 = vor.u32 %v213_v36, %v209_v35  ;;  %v1459_v47 = vunpack.c.l.b16 %v268_v43  ;;  %v159_v49 = vshll.u32 %v18_v31, 16  ;;  %v163_v50 = vshrl.u32 %v18_v31, 16 }
  0x1a   :  { %v155_v48 = vrot.slane %v153_v41, 5  ;;  %v210_v51 = vsel %vm3813_vm2, %v205_v45, %v209_v35  ;;  %v169_v54 = vshll.u32 %v19_v37, 16  ;;  %v318_v56 = vshrl.u32 %v38_v42, 16 }
  0x1b   :  { %v215_v52 = vrot.slane %v214_v46, 4  ;;  %v3880_v57 = vpack.c.b16 %v1459_v47, %v1458_v44  ;;  %v1454_v58 = vunpack.c.l.b16 %v210_v51  ;;  %v161_v60 = vrot.slane %v159_v49, 5  ;;  %v34_v44 = vld [vmem:[%s7020_s0 + $0x50] sm:$0x1]  ;;  %v47_v46 = vld [vmem:[%s7020_s0 + $0x84] sm:$0xf] }
  0x1c   :  { %v156_v59 = vor.u32 %v155_v48, %v152_v40  ;;  %v165_v0 = vrot.slane %v163_v50, 4  ;;  %v171_v1 = vrot.slane %v169_v54, 5  ;;  %v320_v2 = vrot.slane %v318_v56, 4 }
  0x1d   :  { %v220_v63 = vsel %vm3813_vm2, %v215_v52, %v219_v39  ;;  %1554 = vrot.lane.b32.xlu2 %v3880_v57, %s3759_s11  ;;  %v321_v5 = vshll.u32 %v38_v42, 16  ;;  %v327_v6 = vshll.u32 %v39_v55, 16  ;;  %v331_v8 = vshrl.u32 %v39_v55, 16  ;;  %v33_v39 = vld [vmem:[%s7020_s0 + $0x4c] sm:$0xf] }
  0x1e   :  { %v1455_v3 = vunpack.c.l.b16 %v220_v63  ;;  %v157_v4 = vrot.slane %v156_v59, 4  ;;  %v166_v7 = vor.u32 %v165_v0, %v161_v60  ;;  %v337_v10 = vshll.u32 %v40_v61, 16 }
  0x1f   :  { %v294_v12 = vshrl.u32 %v35_v62, 16  ;;  %v323_v15 = vrot.slane %v321_v5, 5  ;;  %v329_v16 = vrot.slane %v327_v6, 5  ;;  %v333_v20 = vrot.slane %v331_v8, 4 }
  0x20   :  { %v3895_v13 = vpack.c.b16 %v1455_v3, %v1454_v58  ;;  %v162_v14 = vsel %vm3813_vm2, %v157_v4, %v161_v60  ;;  %v167_v18 = vrot.slane %v166_v7, 4  ;;  %v339_v21 = vrot.slane %v337_v10, 5  ;;  %v44_v7 = vld [vmem:[%s7020_s0 + $0x78] sm:$0xf] }
  0x21   :  { %v1450_v19 = vunpack.c.l.b16 %v162_v14  ;;  %v324_v22 = vor.u32 %v323_v15, %v320_v2  ;;  %v296_v23 = vrot.slane %v294_v12, 4  ;;  %v297_v24 = vshll.u32 %v35_v62, 16  ;;  %v49_v2 = vld [vmem:[%s7020_s0 + $0x8c] sm:$0x1] }
  0x22   :  { %1550 = vrot.lane.b32.xlu1 %v3895_v13, %s3759_s11  ;;  %v303_v25 = vshll.u32 %v36_v11, 16  ;;  %v172_v28 = vsel %vm3813_vm2, %v167_v18, %v171_v1  ;;  %v334_v29 = vor.u32 %v333_v20, %v329_v16  ;;  %v307_v30 = vshrl.u32 %v36_v11, 16  ;;  %v48_v1 = vld [vmem:[%s7020_s0 + $0x88] sm:$0xf] }
  0x23   :  { %v313_v31 = vshll.u32 %v37_v17, 16  ;;  %v1451_v32 = vunpack.c.l.b16 %v172_v28  ;;  %v325_v33 = vrot.slane %v324_v22, 4  ;;  %v299_v34 = vrot.slane %v297_v24, 5  ;;  %v46_v28 = vld [vmem:[%s7020_s0 + $0x80] sm:$0x1] }
  0x24   :  { %v305_v35 = vrot.slane %v303_v25, 5  ;;  %v335_v36 = vrot.slane %v334_v29, 4  ;;  %v309_v37 = vrot.slane %v307_v30, 4  ;;  %v270_v40 = vshrl.u32 %v32_v27, 16 }
  0x25   :  { %v315_v38 = vrot.slane %v313_v31, 5  ;;  %v3912_v41 = vpack.c.b16 %v1451_v32, %v1450_v19  ;;  %v330_v42 = vsel %vm3813_vm2, %v325_v33, %v329_v16  ;;  %v300_v43 = vor.u32 %v299_v34, %v296_v23  ;;  %v41_v33 = vld [vmem:[%s7020_s0 + $0x6c] sm:$0xf] }
  0x26   :  { %v273_v45 = vshll.u32 %v32_v27, 16  ;;  %v340_v47 = vsel %vm3813_vm2, %v335_v36, %v339_v21  ;;  %v1464_v48 = vunpack.c.l.b16 %v330_v42  ;;  %v310_v49 = vor.u32 %v309_v37, %v305_v35  ;;  %v45_v21 = vld [vmem:[%s7020_s0 + $0x7c] sm:$0xf] }
  0x27   :  { %v272_v50 = vrot.slane %v270_v40, 4  ;;  %1546 = vrot.lane.b32.xlu0 %v3912_v41, %s3759_s11  ;;  %v1465_v51 = vunpack.c.l.b16 %v340_v47  ;;  %v301_v52 = vrot.slane %v300_v43, 4  ;;  %v279_v55 = vshll.u32 %v33_v39, 16 }
  0x28   :  { %v275_v54 = vrot.slane %v273_v45, 5  ;;  %v311_v56 = vrot.slane %v310_v49, 4  ;;  %v283_v58 = vshrl.u32 %v33_v39, 16  ;;  %v289_v59 = vshll.u32 %v34_v44, 16 }
  0x29   :  { %v390_v60 = vshrl.u32 %v47_v46, 16  ;;  %v3926_v61 = vpack.c.b16 %v1465_v51, %v1464_v48  ;;  %v306_v62 = vsel %vm3813_vm2, %v301_v52, %v305_v35  ;;  %v281_v0 = vrot.slane %v279_v55, 5  ;;  %v43_v52 = vld [vmem:[%s7020_s0 + $0x74] sm:$0x1] }
  0x2a   :  { %v276_v63 = vor.u32 %v275_v54, %v272_v50  ;;  %v316_v3 = vsel %vm3813_vm2, %v311_v56, %v315_v38  ;;  %v1462_v4 = vunpack.c.l.b16 %v306_v62  ;;  %v285_v5 = vrot.slane %v283_v58, 4  ;;  %v56_v54 = vld [vmem:[%s7020_s0 + $0xa8] sm:$0xf] }
  0x2b   :  { %7136 = vst [vmem:[#allocation4_spill] sm:$0xff] %v3926_v61  ;;  %v291_v6 = vrot.slane %v289_v59, 5  ;;  %1560 = vrot.lane.b32.xlu2 %v3926_v61, %s3759_s11  ;;  %v1463_v8 = vunpack.c.l.b16 %v316_v3  ;;  %v392_v11 = vrot.slane %v390_v60, 4  ;;  %v393_v12 = vshll.u32 %v47_v46, 16  ;;  %v42_v46 = vld [vmem:[%s7020_s0 + $0x70] sm:$0xf] }
  0x2c   :  { %v277_v10 = vrot.slane %v276_v63, 4  ;;  %v286_v14 = vor.u32 %v285_v5, %v281_v0  ;;  %v399_v15 = vshll.u32 %v48_v1, 16  ;;  %v403_v16 = vshrl.u32 %v48_v1, 16 }
  0x2d   :  { %v409_v17 = vshll.u32 %v49_v2, 16  ;;  %v3943_v18 = vpack.c.b16 %v1463_v8, %v1462_v4  ;;  %v395_v20 = vrot.slane %v393_v12, 5  ;;  %v366_v22 = vshrl.u32 %v44_v7, 16 }
  0x2e   :  { %v282_v19 = vsel %vm3813_vm2, %v277_v10, %v281_v0  ;;  %v287_v23 = vrot.slane %v286_v14, 4  ;;  %v401_v25 = vrot.slane %v399_v15, 5  ;;  %v405_v27 = vrot.slane %v403_v16, 4  ;;  %v57_v10 = vld [vmem:[%s7020_s0 + $0xac] sm:$0xf] }
  0x2f   :  { %7137 = vst [vmem:[#allocation5_spill] sm:$0xff] %v3943_v18  ;;  %v1460_v24 = vunpack.c.l.b16 %v282_v19  ;;  %1558 = vrot.lane.b32.xlu1 %v3943_v18, %s3759_s11  ;;  %v396_v29 = vor.u32 %v395_v20, %v392_v11  ;;  %v411_v30 = vrot.slane %v409_v17, 5  ;;  %v368_v31 = vrot.slane %v366_v22, 4  ;;  %v58_v11 = vld [vmem:[%s7020_s0 + $0xb0] sm:$0x1] }
  0x30   :  { %v369_v32 = vshll.u32 %v44_v7, 16  ;;  %v292_v34 = vsel %vm3813_vm2, %v287_v23, %v291_v6  ;;  %v406_v35 = vor.u32 %v405_v27, %v401_v25  ;;  %v375_v36 = vshll.u32 %v45_v21, 16  ;;  %v53_v17 = vld [vmem:[%s7020_s0 + $0x9c] sm:$0xf] }
  0x31   :  { %v379_v37 = vshrl.u32 %v45_v21, 16  ;;  %v1461_v38 = vunpack.c.l.b16 %v292_v34  ;;  %v397_v39 = vrot.slane %v396_v29, 4  ;;  %v385_v42 = vshll.u32 %v46_v28, 16 }
  0x32   :  { %v371_v40 = vrot.slane %v369_v32, 5  ;;  %v407_v43 = vrot.slane %v406_v35, 4  ;;  %v377_v44 = vrot.slane %v375_v36, 5  ;;  %v342_v47 = vshrl.u32 %v41_v33, 16 }
  0x33   :  { %v381_v45 = vrot.slane %v379_v37, 4  ;;  %v3963_v48 = vpack.c.b16 %v1461_v38, %v1460_v24  ;;  %v402_v49 = vsel %vm3813_vm2, %v397_v39, %v401_v25  ;;  %v387_v51 = vrot.slane %v385_v42, 5  ;;  %v55_v39 = vld [vmem:[%s7020_s0 + $0xa4] sm:$0x1] }
  0x34   :  { %v372_v50 = vor.u32 %v371_v40, %v368_v31  ;;  %v412_v55 = vsel %vm3813_vm2, %v407_v43, %v411_v30  ;;  %v1470_v56 = vunpack.c.l.b16 %v402_v49  ;;  %v344_v59 = vrot.slane %v342_v47, 4  ;;  %v54_v31 = vld [vmem:[%s7020_s0 + $0xa0] sm:$0xf]  ;;  %v50_v43 = vld [vmem:[%s7020_s0 + $0x90] sm:$0xf] }
  0x35   :  { %v382_v58 = vor.u32 %v381_v45, %v377_v44  ;;  %1556 = vrot.lane.b32.xlu0 %v3963_v48, %s3759_s11  ;;  %v1471_v60 = vunpack.c.l.b16 %v412_v55  ;;  %v345_v63 = vshll.u32 %v41_v33, 16  ;;  %v351_v0 = vshll.u32 %v42_v46, 16 }
  0x36   :  { %v373_v62 = vrot.slane %v372_v50, 4  ;;  %v355_v2 = vshrl.u32 %v42_v46, 16  ;;  %v361_v3 = vshll.u32 %v43_v52, 16  ;;  %v462_v4 = vshrl.u32 %v56_v54, 16 }
  0x37   :  { %v383_v1 = vrot.slane %v382_v58, 4  ;;  %v3977_v5 = vpack.c.b16 %v1471_v60, %v1470_v56  ;;  %v347_v7 = vrot.slane %v345_v63, 5  ;;  %v353_v8 = vrot.slane %v351_v0, 5  ;;  %v51_v58 = vld [vmem:[%s7020_s0 + $0x94] sm:$0xf] }
  0x38   :  { %v378_v6 = vsel %vm3813_vm2, %v373_v62, %v377_v44  ;;  %v357_v15 = vrot.slane %v355_v2, 4  ;;  %v363_v16 = vrot.slane %v361_v3, 5  ;;  %v464_v21 = vrot.slane %v462_v4, 4  ;;  %v71_v2 = vld [vmem:[%s7020_s0 + $0xe4] sm:$0xf] }
  0x39   :  { %7138 = vst [vmem:[#allocation6_spill] sm:$0xff] %v3977_v5  ;;  %v388_v12 = vsel %vm3813_vm2, %v383_v1, %v387_v51  ;;  %v1468_v14 = vunpack.c.l.b16 %v378_v6  ;;  %1566 = vrot.lane.b32.xlu2 %v3977_v5, %s3759_s11  ;;  %v348_v20 = vor.u32 %v347_v7, %v344_v59  ;;  %v465_v22 = vshll.u32 %v56_v54, 16  ;;  %v52_v1 = vld [vmem:[%s7020_s0 + $0x98] sm:$0x1] }
  0x3a   :  { %v1469_v19 = vunpack.c.l.b16 %v388_v12  ;;  %v358_v23 = vor.u32 %v357_v15, %v353_v8  ;;  %v471_v24 = vshll.u32 %v57_v10, 16  ;;  %v475_v25 = vshrl.u32 %v57_v10, 16 }
  0x3b   :  { %v481_v27 = vshll.u32 %v58_v11, 16  ;;  %v349_v29 = vrot.slane %v348_v20, 4  ;;  %v467_v30 = vrot.slane %v465_v22, 5  ;;  %v438_v32 = vshrl.u32 %v53_v17, 16 }
  0x3c   :  { %v3994_v28 = vpack.c.b16 %v1469_v19, %v1468_v14  ;;  %v359_v33 = vrot.slane %v358_v23, 4  ;;  %v473_v34 = vrot.slane %v471_v24, 5  ;;  %v477_v35 = vrot.slane %v475_v25, 4  ;;  %v72_v23 = vld [vmem:[%s7020_s0 + $0xe8] sm:$0xf] }
  0x3d   :  { %v483_v36 = vrot.slane %v481_v27, 5  ;;  %v354_v37 = vsel %vm3813_vm2, %v349_v29, %v353_v8  ;;  %v468_v38 = vor.u32 %v467_v30, %v464_v21  ;;  %v440_v40 = vrot.slane %v438_v32, 4  ;;  %v68_v24 = vld [vmem:[%s7020_s0 + $0xd8] sm:$0xf] }
  0x3e   :  { %7139 = vst [vmem:[#allocation7_spill] sm:$0xff] %v3994_v28  ;;  %1564 = vrot.lane.b32.xlu1 %v3994_v28, %s3759_s11  ;;  %v441_v42 = vshll.u32 %v53_v17, 16  ;;  %v364_v44 = vsel %vm3813_vm2, %v359_v33, %v363_v16  ;;  %v1466_v45 = vunpack.c.l.b16 %v354_v37  ;;  %v478_v46 = vor.u32 %v477_v35, %v473_v34 }
  0x3f   :  { %v447_v47 = vshll.u32 %v54_v31, 16  ;;  %v1467_v49 = vunpack.c.l.b16 %v364_v44  ;;  %v469_v50 = vrot.slane %v468_v38, 4  ;;  %v451_v52 = vshrl.u32 %v54_v31, 16  ;;  %v73_v31 = vld [vmem:[%s7020_s0 + $0xec] sm:$0x1] }
  0x40   :  { %v443_v51 = vrot.slane %v441_v42, 5  ;;  %v479_v54 = vrot.slane %v478_v46, 4  ;;  %v457_v56 = vshll.u32 %v55_v39, 16  ;;  %v414_v59 = vshrl.u32 %v50_v43, 16 }
  0x41   :  { %v449_v55 = vrot.slane %v447_v47, 5  ;;  %v4014_v60 = vpack.c.b16 %v1467_v49, %v1466_v45  ;;  %v474_v62 = vsel %vm3813_vm2, %v469_v50, %v473_v34  ;;  %v453_v0 = vrot.slane %v451_v52, 4  ;;  %v69_v50 = vld [vmem:[%s7020_s0 + $0xdc] sm:$0xf] }
  0x42   :  { %v444_v63 = vor.u32 %v443_v51, %v440_v40  ;;  %v484_v3 = vsel %vm3813_vm2, %v479_v54, %v483_v36  ;;  %v1476_v4 = vunpack.c.l.b16 %v474_v62  ;;  %v459_v6 = vrot.slane %v457_v56, 5 }
  0x43   :  { %7140 = vst [vmem:[#allocation8_spill] sm:$0xff] %v4014_v60  ;;  %v416_v7 = vrot.slane %v414_v59, 4  ;;  %1562 = vrot.lane.b32.xlu0 %v4014_v60, %s3759_s11  ;;  %v1477_v8 = vunpack.c.l.b16 %v484_v3  ;;  %v454_v11 = vor.u32 %v453_v0, %v449_v55  ;;  %v417_v12 = vshll.u32 %v50_v43, 16 }
  0x44   :  { %v445_v10 = vrot.slane %v444_v63, 4  ;;  %v423_v14 = vshll.u32 %v51_v58, 16  ;;  %v427_v15 = vshrl.u32 %v51_v58, 16  ;;  %v433_v16 = vshll.u32 %v52_v1, 16  ;;  %v59_v58 = vld [vmem:[%s7020_s0 + $0xb4] sm:$0xf] }
  0x45   :  { %v534_v17 = vshrl.u32 %v71_v2, 16  ;;  %v4028_v19 = vpack.c.b16 %v1477_v8, %v1476_v4  ;;  %v455_v21 = vrot.slane %v454_v11, 4  ;;  %v419_v22 = vrot.slane %v417_v12, 5 }
  0x46   :  { %v450_v20 = vsel %vm3813_vm2, %v445_v10, %v449_v55  ;;  %v425_v27 = vrot.slane %v423_v14, 5  ;;  %v429_v29 = vrot.slane %v427_v15, 4  ;;  %v435_v30 = vrot.slane %v433_v16, 5  ;;  %v70_v55 = vld [vmem:[%s7020_s0 + $0xe0] sm:$0x1] }
  0x47   :  { %7141 = vst [vmem:[#allocation9_spill] sm:$0xff] %v4028_v19  ;;  %v1474_v25 = vunpack.c.l.b16 %v450_v20  ;;  %1572 = vrot.lane.b32.xlu2 %v4028_v19, %s3759_s11  ;;  %v460_v32 = vsel %vm3813_vm2, %v455_v21, %v459_v6  ;;  %v420_v33 = vor.u32 %v419_v22, %v416_v7  ;;  %v536_v34 = vrot.slane %v534_v17, 4  ;;  %v4069_v16 = vld [vmem:[%s7020_s0 + $0xb8] sm:$0xf]  ;;  %v4074_v17 = vld [vmem:[%s7020_s0 + $0xbc] sm:$0x1] }
  0x48   :  { %v537_v35 = vshll.u32 %v71_v2, 16  ;;  %v1475_v36 = vunpack.c.l.b16 %v460_v32  ;;  %v430_v37 = vor.u32 %v429_v29, %v425_v27  ;;  %v543_v38 = vshll.u32 %v72_v23, 16 }
  0x49   :  { %v547_v39 = vshrl.u32 %v72_v23, 16  ;;  %v421_v40 = vrot.slane %v420_v33, 4  ;;  %v553_v43 = vshll.u32 %v73_v31, 16  ;;  %v510_v44 = vshrl.u32 %v68_v24, 16 }
  0x4a   :  { %v539_v42 = vrot.slane %v537_v35, 5  ;;  %v4045_v45 = vpack.c.b16 %v1475_v36, %v1474_v25  ;;  %v431_v46 = vrot.slane %v430_v37, 4  ;;  %v545_v47 = vrot.slane %v543_v38, 5  ;;  %v81_v35 = vld [vmem:[%s7020_s0 + $0x10c] sm:$0xf] }
  0x4b   :  { %v549_v49 = vrot.slane %v547_v39, 4  ;;  %v426_v51 = vsel %vm3813_vm2, %v421_v40, %v425_v27  ;;  %v555_v54 = vrot.slane %v553_v43, 5  ;;  %v512_v56 = vrot.slane %v510_v44, 4  ;;  %v77_v40 = vld [vmem:[%s7020_s0 + $0xfc] sm:$0xf] }
  0x4c   :  { %7142 = vst [vmem:[#allocation10_spill] sm:$0xff] %v4045_v45  ;;  %v540_v52 = vor.u32 %v539_v42, %v536_v34  ;;  %1570 = vrot.lane.b32.xlu1 %v4045_v45, %s3759_s11  ;;  %v436_v59 = vsel %vm3813_vm2, %v431_v46, %v435_v30  ;;  %v1472_v62 = vunpack.c.l.b16 %v426_v51  ;;  %v513_v0 = vshll.u32 %v68_v24, 16  ;;  %v80_v24 = vld [vmem:[%s7020_s0 + $0x108] sm:$0xf] }
  0x4d   :  { %v550_v63 = vor.u32 %v549_v49, %v545_v47  ;;  %v1473_v1 = vunpack.c.l.b16 %v436_v59  ;;  %v519_v3 = vshll.u32 %v69_v50, 16  ;;  %v523_v4 = vshrl.u32 %v69_v50, 16 }
  0x4e   :  { %v541_v2 = vrot.slane %v540_v52, 4  ;;  %v515_v7 = vrot.slane %v513_v0, 5  ;;  %v529_v8 = vshll.u32 %v70_v55, 16  ;;  %v486_v10 = vshrl.u32 %v59_v58, 16  ;;  %v78_v0 = vld [vmem:[%s7020_s0 + $0x100] sm:$0xf] }
  0x4f   :  { %v551_v6 = vrot.slane %v550_v63, 4  ;;  %v4062_v11 = vpack.c.b16 %v1473_v1, %v1472_v62  ;;  %v521_v14 = vrot.slane %v519_v3, 5  ;;  %v525_v15 = vrot.slane %v523_v4, 4 }
  0x50   :  { %v546_v12 = vsel %vm3813_vm2, %v541_v2, %v545_v47  ;;  %v516_v22 = vor.u32 %v515_v7, %v512_v56  ;;  %v531_v23 = vrot.slane %v529_v8, 5  ;;  %v488_v29 = vrot.slane %v486_v10, 4  ;;  %v82_v47 = vld [vmem:[%s7020_s0 + $0x110] sm:$0x1] }
  0x51   :  { %7143 = vst [vmem:[#allocation11_spill] sm:$0xff] %v4062_v11  ;;  %v556_v20 = vsel %vm3813_vm2, %v551_v6, %v555_v54  ;;  %v1482_v21 = vunpack.c.l.b16 %v546_v12  ;;  %1568 = vrot.lane.b32.xlu0 %v4062_v11, %s3759_s11  ;;  %v526_v27 = vor.u32 %v525_v15, %v521_v14  ;;  %v489_v30 = vshll.u32 %v59_v58, 16  ;;  %v4109_v7 = vld [vmem:[%s7020_s0 + $0xf0] sm:$0xf] }
  0x52   :  { %v1483_v25 = vunpack.c.l.b16 %v556_v20  ;;  %v517_v31 = vrot.slane %v516_v22, 4  ;;  %v495_v32 = vshll.u32 %v4069_v16, 16  ;;  %v499_v33 = vshrl.u32 %v4069_v16, 16 }
  0x53   :  { %v505_v34 = vshll.u32 %v4074_v17, 16  ;;  %v527_v37 = vrot.slane %v526_v27, 4  ;;  %v491_v38 = vrot.slane %v489_v30, 5  ;;  %v606_v39 = vshrl.u32 %v80_v24, 16 }
  0x54   :  { %v4089_v36 = vpack.c.b16 %v1483_v25, %v1482_v21  ;;  %v522_v42 = vsel %vm3813_vm2, %v517_v31, %v521_v14  ;;  %v497_v43 = vrot.slane %v495_v32, 5  ;;  %v501_v44 = vrot.slane %v499_v33, 4  ;;  %v79_v14 = vld [vmem:[%s7020_s0 + $0x104] sm:$0x1] }
  0x55   :  { %v507_v46 = vrot.slane %v505_v34, 5  ;;  %v532_v49 = vsel %vm3813_vm2, %v527_v37, %v531_v23  ;;  %v1480_v50 = vunpack.c.l.b16 %v522_v42  ;;  %v492_v51 = vor.u32 %v491_v38, %v488_v29 }
  0x56   :  { %7144 = vst [vmem:[#allocation12_spill] sm:$0xff] %v4089_v36  ;;  %1578 = vrot.lane.b32.xlu2 %v4089_v36, %s3759_s11  ;;  %v608_v52 = vrot.slane %v606_v39, 4  ;;  %v1481_v54 = vunpack.c.l.b16 %v532_v49  ;;  %v502_v55 = vor.u32 %v501_v44, %v497_v43  ;;  %v609_v56 = vshll.u32 %v80_v24, 16  ;;  %v4125_v39 = vld [vmem:[%s7020_s0 + $0xf4] sm:$0xf] }
  0x57   :  { %v615_v58 = vshll.u32 %v81_v35, 16  ;;  %v493_v59 = vrot.slane %v492_v51, 4  ;;  %v619_v62 = vshrl.u32 %v81_v35, 16  ;;  %v625_v63 = vshll.u32 %v82_v47, 16  ;;  %v4132_v44 = vld [vmem:[%s7020_s0 + $0xf8] sm:$0x1] }
  0x58   :  { %v582_v1 = vshrl.u32 %v77_v40, 16  ;;  %v1528_v2 = vpack.c.b16 %v1481_v54, %v1480_v50  ;;  %v503_v3 = vrot.slane %v502_v55, 4  ;;  %v611_v4 = vrot.slane %v609_v56, 5  ;;  %v89_v47 = vld [vmem:[%s7020_s0 + $0x12c] sm:$0xf] }
  0x59   :  { %v617_v6 = vrot.slane %v615_v58, 5  ;;  %v498_v8 = vsel %vm3813_vm2, %v493_v59, %v497_v43  ;;  %v621_v10 = vrot.slane %v619_v62, 4  ;;  %v627_v12 = vrot.slane %v625_v63, 5 }
  0x5a   :  { %v584_v15 = vrot.slane %v582_v1, 4  ;;  %1576 = vrot.lane.b32.xlu1 %v1528_v2, %s3759_s11  ;;  %v508_v20 = vsel %vm3813_vm2, %v503_v3, %v507_v46  ;;  %v1478_v21 = vunpack.c.l.b16 %v498_v8  ;;  %v612_v22 = vor.u32 %v611_v4, %v608_v52  ;;  %v4157_v8 = vld [vmem:[%s7020_s0 + $0x134] sm:$0x1] }
  0x5b   :  { %v585_v23 = vshll.u32 %v77_v40, 16  ;;  %v1479_v24 = vunpack.c.l.b16 %v508_v20  ;;  %v622_v25 = vor.u32 %v621_v10, %v617_v6  ;;  %v591_v27 = vshll.u32 %v78_v0, 16  ;;  %v86_v20 = vld [vmem:[%s7020_s0 + $0x120] sm:$0xf] }
  0x5c   :  { %v595_v29 = vshrl.u32 %v78_v0, 16  ;;  %v613_v30 = vrot.slane %v612_v22, 4  ;;  %v601_v32 = vshll.u32 %v79_v14, 16  ;;  %v558_v33 = vshrl.u32 %v4109_v7, 16 }
  0x5d   :  { %v587_v31 = vrot.slane %v585_v23, 5  ;;  %v4120_v34 = vpack.c.b16 %v1479_v24, %v1478_v21  ;;  %v623_v35 = vrot.slane %v622_v25, 4  ;;  %v593_v37 = vrot.slane %v591_v27, 5 }
  0x5e   :  { %v597_v38 = vrot.slane %v595_v29, 4  ;;  %v618_v40 = vsel %vm3813_vm2, %v613_v30, %v617_v6  ;;  %v603_v43 = vrot.slane %v601_v32, 5  ;;  %v560_v46 = vrot.slane %v558_v33, 4  ;;  %v4152_v6 = vld [vmem:[%s7020_s0 + $0x130] sm:$0xf] }
  0x5f   :  { %7145 = vst [vmem:[#allocation13_spill] sm:$0xff] %v4120_v34  ;;  %v588_v42 = vor.u32 %v587_v31, %v584_v15  ;;  %1574 = vrot.lane.b32.xlu0 %v4120_v34, %s3759_s11  ;;  %v628_v49 = vsel %vm3813_vm2, %v623_v35, %v627_v12  ;;  %v1488_v50 = vunpack.c.l.b16 %v618_v40  ;;  %v561_v52 = vshll.u32 %v4109_v7, 16  ;;  %v4172_v31 = vld [vmem:[%s7020_s0 + $0x124] sm:$0xf] }
  0x60   :  { %v598_v51 = vor.u32 %v597_v38, %v593_v37  ;;  %v1489_v54 = vunpack.c.l.b16 %v628_v49  ;;  %v567_v56 = vshll.u32 %v4125_v39, 16  ;;  %v571_v58 = vshrl.u32 %v4125_v39, 16  ;;  %v4179_v38 = vld [vmem:[%s7020_s0 + $0x114] sm:$0xf] }
  0x61   :  { %v589_v55 = vrot.slane %v588_v42, 4  ;;  %v563_v62 = vrot.slane %v561_v52, 5  ;;  %v577_v63 = vshll.u32 %v4132_v44, 16  ;;  %v678_v0 = vshrl.u32 %v89_v47, 16 }
  0x62   :  { %v599_v59 = vrot.slane %v598_v51, 4  ;;  %v4145_v1 = vpack.c.b16 %v1489_v54, %v1488_v50  ;;  %v569_v3 = vrot.slane %v567_v56, 5  ;;  %v573_v4 = vrot.slane %v571_v58, 4 }
  0x63   :  { %v594_v2 = vsel %vm3813_vm2, %v589_v55, %v593_v37  ;;  %v564_v14 = vor.u32 %v563_v62, %v560_v46  ;;  %v579_v15 = vrot.slane %v577_v63, 5  ;;  %v680_v23 = vrot.slane %v678_v0, 4  ;;  %v4198_v0 = vld [vmem:[%s7020_s0 + $0x118] sm:$0xf] }
  0x64   :  { %7146 = vst [vmem:[#allocation14_spill] sm:$0xff] %v4145_v1  ;;  %v604_v10 = vsel %vm3813_vm2, %v599_v59, %v603_v43  ;;  %v1486_v12 = vunpack.c.l.b16 %v594_v2  ;;  %1584 = vrot.lane.b32.xlu2 %v4145_v1, %s3759_s11  ;;  %v574_v22 = vor.u32 %v573_v4, %v569_v3  ;;  %v681_v24 = vshll.u32 %v89_v47, 16  ;;  %v4186_v47 = vld [vmem:[%s7020_s0 + $0x128] sm:$0x1] }
  0x65   :  { %v1487_v21 = vunpack.c.l.b16 %v604_v10  ;;  %v565_v25 = vrot.slane %v564_v14, 4  ;;  %v687_v27 = vshll.u32 %v4152_v6, 16  ;;  %v691_v29 = vshrl.u32 %v4152_v6, 16  ;;  %v4206_v14 = vld [vmem:[%s7020_s0 + $0x11c] sm:$0x1] }
  0x66   :  { %v697_v30 = vshll.u32 %v4157_v8, 16  ;;  %v575_v33 = vrot.slane %v574_v22, 4  ;;  %v683_v35 = vrot.slane %v681_v24, 5  ;;  %v654_v37 = vshrl.u32 %v86_v20, 16 }
  0x67   :  { %v4174_v32 = vpack.c.b16 %v1487_v21, %v1486_v12  ;;  %v570_v40 = vsel %vm3813_vm2, %v565_v25, %v569_v3  ;;  %v689_v42 = vrot.slane %v687_v27, 5  ;;  %v693_v43 = vrot.slane %v691_v29, 4 }
  0x68   :  { %v699_v46 = vrot.slane %v697_v30, 5  ;;  %v580_v49 = vsel %vm3813_vm2, %v575_v33, %v579_v15  ;;  %v1484_v50 = vunpack.c.l.b16 %v570_v40  ;;  %v684_v51 = vor.u32 %v683_v35, %v680_v23  ;;  %v4213_v23 = vld [vmem:[%s7020_s0 + $0x150] sm:$0xf] }
  0x69   :  { %7147 = vst [vmem:[#allocation15_spill] sm:$0xff] %v4174_v32  ;;  %1582 = vrot.lane.b32.xlu1 %v4174_v32, %s3759_s11  ;;  %v656_v52 = vrot.slane %v654_v37, 4  ;;  %v1485_v54 = vunpack.c.l.b16 %v580_v49  ;;  %v694_v55 = vor.u32 %v693_v43, %v689_v42  ;;  %v657_v56 = vshll.u32 %v86_v20, 16  ;;  %v4310_v32 = vld [vmem:[%s7020_s0 + $0x178] sm:$0xf] }
  0x6a   :  { %v663_v58 = vshll.u32 %v4172_v31, 16  ;;  %v685_v59 = vrot.slane %v684_v51, 4  ;;  %v667_v62 = vshrl.u32 %v4172_v31, 16  ;;  %v673_v63 = vshll.u32 %v4186_v47, 16 }
  0x6b   :  { %v630_v2 = vshrl.u32 %v4179_v38, 16  ;;  %v4201_v3 = vpack.c.b16 %v1485_v54, %v1484_v50  ;;  %v695_v4 = vrot.slane %v694_v55, 4  ;;  %v659_v10 = vrot.slane %v657_v56, 5 }
  0x6c   :  { %v665_v12 = vrot.slane %v663_v58, 5  ;;  %v690_v15 = vsel %vm3813_vm2, %v685_v59, %v689_v42  ;;  %v669_v20 = vrot.slane %v667_v62, 4  ;;  %v675_v21 = vrot.slane %v673_v63, 5  ;;  %v4236_v59 = vld [vmem:[%s7020_s0 + $0x158] sm:$0x1] }
  0x6d   :  { %7148 = vst [vmem:[#allocation16_spill] sm:$0xff] %v4201_v3  ;;  %v632_v22 = vrot.slane %v630_v2, 4  ;;  %1580 = vrot.lane.b32.xlu0 %v4201_v3, %s3759_s11  ;;  %v700_v24 = vsel %vm3813_vm2, %v695_v4, %v699_v46  ;;  %v1494_v25 = vunpack.c.l.b16 %v690_v15  ;;  %v660_v27 = vor.u32 %v659_v10, %v656_v52  ;;  %v4229_v52 = vld [vmem:[%s7020_s0 + $0x154] sm:$0xf]  ;;  %v4241_v63 = vld [vmem:[%s7020_s0 + $0x144] sm:$0xf] }
  0x6e   :  { %v633_v29 = vshll.u32 %v4179_v38, 16  ;;  %v1495_v30 = vunpack.c.l.b16 %v700_v24  ;;  %v670_v33 = vor.u32 %v669_v20, %v665_v12  ;;  %v639_v35 = vshll.u32 %v4198_v0, 16 }
  0x6f   :  { %v643_v37 = vshrl.u32 %v4198_v0, 16  ;;  %v661_v40 = vrot.slane %v660_v27, 4  ;;  %v649_v43 = vshll.u32 %v4206_v14, 16  ;;  %v750_v49 = vshrl.u32 %v4213_v23, 16 }
  0x70   :  { %v635_v42 = vrot.slane %v633_v29, 5  ;;  %v4224_v50 = vpack.c.b16 %v1495_v30, %v1494_v25  ;;  %v671_v51 = vrot.slane %v670_v33, 4  ;;  %v641_v46 = vrot.slane %v639_v35, 5 }
  0x71   :  { %v645_v54 = vrot.slane %v643_v37, 4  ;;  %v666_v55 = vsel %vm3813_vm2, %v661_v40, %v665_v12  ;;  %v651_v58 = vrot.slane %v649_v43, 5  ;;  %v752_v62 = vrot.slane %v750_v49, 4  ;;  %v4259_v40 = vld [vmem:[%s7020_s0 + $0x148] sm:$0xf] }
  0x72   :  { %7149 = vst [vmem:[#allocation17_spill] sm:$0xff] %v4224_v50  ;;  %v636_v56 = vor.u32 %v635_v42, %v632_v22  ;;  %1590 = vrot.lane.b32.xlu2 %v4224_v50, %s3759_s11  ;;  %v676_v2 = vsel %vm3813_vm2, %v671_v51, %v675_v21  ;;  %v1492_v4 = vunpack.c.l.b16 %v666_v55  ;;  %v753_v12 = vshll.u32 %v4213_v23, 16  ;;  %v4264_v42 = vld [vmem:[%s7020_s0 + $0x14c] sm:$0x1]  ;;  %v4325_v50 = vld [vmem:[%s7020_s0 + $0x17c] sm:$0x1] }
  0x73   :  { %v646_v10 = vor.u32 %v645_v54, %v641_v46  ;;  %v1493_v15 = vunpack.c.l.b16 %v676_v2  ;;  %v759_v22 = vshll.u32 %v4229_v52, 16  ;;  %v763_v24 = vshrl.u32 %v4229_v52, 16 }
  0x74   :  { %v637_v20 = vrot.slane %v636_v56, 4  ;;  %v755_v27 = vrot.slane %v753_v12, 5  ;;  %v769_v29 = vshll.u32 %v4236_v59, 16  ;;  %v726_v30 = vshrl.u32 %v4241_v63, 16 }
  0x75   :  { %v647_v25 = vrot.slane %v646_v10, 4  ;;  %v4252_v33 = vpack.c.b16 %v1493_v15, %v1492_v4  ;;  %v761_v35 = vrot.slane %v759_v22, 5  ;;  %v765_v37 = vrot.slane %v763_v24, 4  ;;  %v4282_v15 = vld [vmem:[%s7020_s0 + $0x13c] sm:$0xf] }
  0x76   :  { %v642_v21 = vsel %vm3813_vm2, %v637_v20, %v641_v46  ;;  %v756_v51 = vor.u32 %v755_v27, %v752_v62  ;;  %v771_v54 = vrot.slane %v769_v29, 5  ;;  %v4271_v46 = vld [vmem:[%s7020_s0 + $0x138] sm:$0xf]  ;;  %v728_v2 = vrot.slane %v726_v30, 4 }
  0x77   :  { %7150 = vst [vmem:[#allocation18_spill] sm:$0xff] %v4252_v33  ;;  %v652_v43 = vsel %vm3813_vm2, %v647_v25, %v651_v58  ;;  %v1490_v49 = vunpack.c.l.b16 %v642_v21  ;;  %1588 = vrot.lane.b32.xlu1 %v4252_v33, %s3759_s11  ;;  %v766_v56 = vor.u32 %v765_v37, %v761_v35  ;;  %v729_v4 = vshll.u32 %v4241_v63, 16  ;;  %v4289_v25 = vld [vmem:[%s7020_s0 + $0x140] sm:$0x1] }
  0x78   :  { %v1491_v55 = vunpack.c.l.b16 %v652_v43  ;;  %v757_v10 = vrot.slane %v756_v51, 4  ;;  %v735_v12 = vshll.u32 %v4259_v40, 16  ;;  %v739_v58 = vshrl.u32 %v4259_v40, 16  ;;  %v4297_v43 = vld [vmem:[%s7020_s0 + $0x174] sm:$0xf] }
  0x79   :  { %v745_v62 = vshll.u32 %v4264_v42, 16  ;;  %v767_v22 = vrot.slane %v766_v56, 4  ;;  %v731_v24 = vrot.slane %v729_v4, 5  ;;  %v702_v27 = vshrl.u32 %v4271_v46, 16 }
  0x7a   :  { %v4284_v20 = vpack.c.b16 %v1491_v55, %v1490_v49  ;;  %v762_v29 = vsel %vm3813_vm2, %v757_v10, %v761_v35  ;;  %v737_v30 = vrot.slane %v735_v12, 5  ;;  %v741_v21 = vrot.slane %v739_v58, 4 }
  0x7b   :  { %v747_v37 = vrot.slane %v745_v62, 5  ;;  %v772_v49 = vsel %vm3813_vm2, %v767_v22, %v771_v54  ;;  %v1500_v51 = vunpack.c.l.b16 %v762_v29  ;;  %v732_v55 = vor.u32 %v731_v24, %v728_v2  ;;  %v4318_v29 = vld [vmem:[%s7020_s0 + $0x168] sm:$0xf] }
  0x7c   :  { %7151 = vst [vmem:[#allocation19_spill] sm:$0xff] %v4284_v20  ;;  %1586 = vrot.lane.b32.xlu0 %v4284_v20, %s3759_s11  ;;  %v704_v56 = vrot.slane %v702_v27, 4  ;;  %v1501_v4 = vunpack.c.l.b16 %v772_v49  ;;  %v742_v33 = vor.u32 %v741_v21, %v737_v30  ;;  %v705_v35 = vshll.u32 %v4271_v46, 16 }
  0x7d   :  { %v711_v10 = vshll.u32 %v4282_v15, 16  ;;  %v733_v12 = vrot.slane %v732_v55, 4  ;;  %v715_v58 = vshrl.u32 %v4282_v15, 16  ;;  %v721_v62 = vshll.u32 %v4289_v25, 16 }
  0x7e   :  { %v822_v54 = vshrl.u32 %v4297_v43, 16  ;;  %v4313_v2 = vpack.c.b16 %v1501_v4, %v1500_v51  ;;  %v743_v22 = vrot.slane %v742_v33, 4  ;;  %v707_v24 = vrot.slane %v705_v35, 5 }
  0x7f   :  { %v713_v27 = vrot.slane %v711_v10, 5  ;;  %v738_v21 = vsel %vm3813_vm2, %v733_v12, %v737_v30  ;;  %v717_v49 = vrot.slane %v715_v58, 4  ;;  %v723_v55 = vrot.slane %v721_v62, 5 }
  0x80   :  { %7152 = vst [vmem:[#allocation20_spill] sm:$0xff] %v4313_v2  ;;  %v824_v51 = vrot.slane %v822_v54, 4  ;;  %1596 = vrot.lane.b32.xlu2 %v4313_v2, %s3759_s11  ;;  %v748_v33 = vsel %vm3813_vm2, %v743_v22, %v747_v37  ;;  %v1498_v4 = vunpack.c.l.b16 %v738_v21  ;;  %v708_v35 = vor.u32 %v707_v24, %v704_v56  ;;  %v4341_v56 = vld [vmem:[%s7020_s0 + $0x16c] sm:$0xf] }
  0x81   :  { %v825_v10 = vshll.u32 %v4297_v43, 16  ;;  %v1499_v20 = vunpack.c.l.b16 %v748_v33  ;;  %v718_v30 = vor.u32 %v717_v49, %v713_v27  ;;  %v831_v12 = vshll.u32 %v4310_v32, 16  ;;  %v4348_v33 = vld [vmem:[%s7020_s0 + $0x170] sm:$0x1] }
  0x82   :  { %v835_v58 = vshrl.u32 %v4310_v32, 16  ;;  %v709_v62 = vrot.slane %v708_v35, 4  ;;  %v841_v54 = vshll.u32 %v4325_v50, 16  ;;  %v798_v3 = vshrl.u32 %v4318_v29, 16 }
  0x83   :  { %v827_v1 = vrot.slane %v825_v10, 5  ;;  %v4336_v2 = vpack.c.b16 %v1499_v20, %v1498_v4  ;;  %v719_v45 = vrot.slane %v718_v30, 4  ;;  %v833_v37 = vrot.slane %v831_v12, 5  ;;  %v4353_v4 = vld [vmem:[%s7020_s0 + $0x15c] sm:$0xf] }
  0x84   :  { %v837_v22 = vrot.slane %v835_v58, 4  ;;  %v714_v24 = vsel %vm3813_vm2, %v709_v62, %v713_v27  ;;  %v843_v49 = vrot.slane %v841_v54, 5  ;;  %v800_v20 = vrot.slane %v798_v3, 4 }
  0x85   :  { %7153 = vst [vmem:[#allocation21_spill] sm:$0xff] %v4336_v2  ;;  %v828_v21 = vor.u32 %v827_v1, %v824_v51  ;;  %1594 = vrot.lane.b32.xlu1 %v4336_v2, %s3759_s11  ;;  %v724_v35 = vsel %vm3813_vm2, %v719_v45, %v723_v55  ;;  %v1496_v27 = vunpack.c.l.b16 %v714_v24  ;;  %v801_v51 = vshll.u32 %v4318_v29, 16  ;;  %v4371_v24 = vld [vmem:[%s7020_s0 + $0x160] sm:$0xf] }
  0x86   :  { %v838_v1 = vor.u32 %v837_v22, %v833_v37  ;;  %v1497_v10 = vunpack.c.l.b16 %v724_v35  ;;  %v807_v12 = vshll.u32 %v4341_v56, 16  ;;  %v811_v3 = vshrl.u32 %v4341_v56, 16 }
  0x87   :  { %v829_v30 = vrot.slane %v828_v21, 4  ;;  %v803_v62 = vrot.slane %v801_v51, 5  ;;  %v817_v54 = vshll.u32 %v4348_v33, 16  ;;  %v774_v36 = vshrl.u32 %v4353_v4, 16  ;;  %v4376_v21 = vld [vmem:[%s7020_s0 + $0x164] sm:$0x1] }
  0x88   :  { %v839_v58 = vrot.slane %v838_v1, 4  ;;  %v4364_v2 = vpack.c.b16 %v1497_v10, %v1496_v27  ;;  %v809_v55 = vrot.slane %v807_v12, 5  ;;  %v813_v22 = vrot.slane %v811_v3, 4 }
  0x89   :  { %v834_v45 = vsel %vm3813_vm2, %v829_v30, %v833_v37  ;;  %v804_v1 = vor.u32 %v803_v62, %v800_v20  ;;  %v819_v51 = vrot.slane %v817_v54, 5  ;;  %v4383_v37 = vld [vmem:[%s7020_s0 + $0x18c] sm:$0xf]  ;;  %v776_v12 = vrot.slane %v774_v36, 4 }
  0x8a   :  { %7154 = vst [vmem:[#allocation22_spill] sm:$0xff] %v4364_v2  ;;  %v844_v35 = vsel %vm3813_vm2, %v839_v58, %v843_v49  ;;  %v1506_v27 = vunpack.c.l.b16 %v834_v45  ;;  %1592 = vrot.lane.b32.xlu0 %v4364_v2, %s3759_s11  ;;  %v814_v30 = vor.u32 %v813_v22, %v809_v55  ;;  %v777_v3 = vshll.u32 %v4353_v4, 16  ;;  %v4396_v45 = vld [vmem:[%s7020_s0 + $0x190] sm:$0xf] }
  0x8b   :  { %v1507_v10 = vunpack.c.l.b16 %v844_v35  ;;  %v805_v34 = vrot.slane %v804_v1, 4  ;;  %v783_v28 = vshll.u32 %v4371_v24, 16  ;;  %v787_v49 = vshrl.u32 %v4371_v24, 16 }
  0x8c   :  { %v793_v20 = vshll.u32 %v4376_v21, 16  ;;  %v815_v62 = vrot.slane %v814_v30, 4  ;;  %v779_v54 = vrot.slane %v777_v3, 5  ;;  %v870_v36 = vshrl.u32 %v4383_v37, 16 }
  0x8d   :  { %v4391_v58 = vpack.c.b16 %v1507_v10, %v1506_v27  ;;  %v810_v22 = vsel %vm3813_vm2, %v805_v34, %v809_v55  ;;  %v785_v35 = vrot.slane %v783_v28, 5  ;;  %v789_v1 = vrot.slane %v787_v49, 4  ;;  %v4404_v27 = vld [vmem:[%s7020_s0 + $0x194] sm:$0x1] }
  0x8e   :  { %v795_v2 = vrot.slane %v793_v20, 5  ;;  %v820_v10 = vsel %vm3813_vm2, %v815_v62, %v819_v51  ;;  %v1504_v30 = vunpack.c.l.b16 %v810_v22  ;;  %v780_v3 = vor.u32 %v779_v54, %v776_v12  ;;  %v4419_v12 = vld [vmem:[%s7020_s0 + $0x180] sm:$0xf]  ;;  %v4426_v22 = vld [vmem:[%s7020_s0 + $0x184] sm:$0xf] }
  0x8f   :  { %7155 = vst [vmem:[#allocation23_spill] sm:$0xff] %v4391_v58  ;;  %1602 = vrot.lane.b32.xlu2 %v4391_v58, %s3759_s11  ;;  %v872_v19 = vrot.slane %v870_v36, 4  ;;  %v1505_v11 = vunpack.c.l.b16 %v820_v10  ;;  %v790_v18 = vor.u32 %v789_v1, %v785_v35  ;;  %v873_v28 = vshll.u32 %v4383_v37, 16 }
  0x90   :  { %v879_v34 = vshll.u32 %v4396_v45, 16  ;;  %v781_v55 = vrot.slane %v780_v3, 4  ;;  %v883_v49 = vshrl.u32 %v4396_v45, 16  ;;  %v889_v20 = vshll.u32 %v4404_v27, 16  ;;  %v4440_v3 = vpop.permute.xlu2 %1552 }
  0x91   :  { %vm989_vm3 = vcmask 1042432   ;;  %v4414_v5 = vpack.c.b16 %v1505_v11, %v1504_v30  ;;  %v791_v58 = vrot.slane %v790_v18, 4  ;;  %v875_v60 = vrot.slane %v873_v28, 5  ;;  %7160 = vst [vmem:[#allocation26_spill] sm:$0xff] %v4440_v3 }
  0x92   :  { %v881_v51 = vrot.slane %v879_v34, 5  ;;  %v786_v62 = vsel %vm3813_vm2, %v781_v55, %v785_v35  ;;  %v885_v54 = vrot.slane %v883_v49, 4  ;;  %v891_v36 = vrot.slane %v889_v20, 5  ;;  %v3679_v35 = vld [vmem:[%s7020_s0] sm:$0xf] }
  0x93   :  { %7156 = vst [vmem:[#allocation24_spill] sm:$0xff] %v4414_v5  ;;  %vm990_vm4 = vcmask 1046532   ;;  %1600 = vrot.lane.b32.xlu1 %v4414_v5, %s3759_s11  ;;  %v796_v18 = vsel %vm3813_vm2, %v791_v58, %v795_v2  ;;  %v1502_v11 = vunpack.c.l.b16 %v786_v62  ;;  %v876_v1 = vor.u32 %v875_v60, %v872_v19  ;;  %v3680_v2 = vld [vmem:[%s7020_s0 + $0x4] sm:$0xf]  ;;  %v3681_v60 = vld [vmem:[%s7020_s0 + $0x8] sm:$0x1] }
  0x94   :  { %vm4433_vm5 = vmor %vm989_vm3, %vm990_vm4  ;;  %v7157_v10 = vmov 0  ;;  %v3404_v30 = vrot.slane %v3679_v35, 9  ;;  %v1503_v28 = vunpack.c.l.b16 %v796_v18  ;;  %v886_v34 = vor.u32 %v885_v54, %v881_v51 }
  0x95   :  { %v7158_v10 = vsel %vm4433_vm5, 4294967295, %v7157_v10  ;;  %v994_v58 = vrot.slane %v3680_v2, 5  ;;  %v997_v19 = vrot.slane %v3681_v60, 5  ;;  %v877_v55 = vrot.slane %v876_v1, 4  ;;  %v4460_v1 = vld [vmem:[%s7020_s0 + $0x188] sm:$0x1] }
  0x96   :  { %7159 = vst [vmem:[#allocation25_spill] sm:$0xff] %v7158_v10  ;;  %v846_v49 = vshrl.u32 %v4419_v12, 16  ;;  %v849_v20 = vshll.u32 %v4419_v12, 16  ;;  %v855_v62 = vshll.u32 %v4426_v22, 16  ;;  %v4451_v35 = vpack.c.b16 %v1503_v28, %v1502_v11  ;;  %v3657_v10 = vld [vmem:[%s7020_s0 + $0x18c] sm:$0xff] }
  0x97   :  { %v887_v54 = vrot.slane %v886_v34, 4  ;;  %v995_v18 = vsel %vm4433_vm5, %v3404_v30, %v994_v58  ;;  %v996_v3 = vrot.slane %v994_v58, 4  ;;  %v882_v2 = vsel %vm3813_vm2, %v877_v55, %v881_v51 }
  0x98   :  { %7161 = vst [vmem:[#allocation27_spill] sm:$0xff] %v4451_v35  ;;  %v1608_v5 = vunpack.c.l.b16 %v995_v18  ;;  %v848_v60 = vrot.slane %v846_v49, 4  ;;  %v851_v53 = vrot.slane %v849_v20, 5  ;;  %1598 = vrot.lane.b32.xlu0 %v4451_v35, %s3759_s11  ;;  %v1510_v28 = vunpack.c.l.b16 %v882_v2  ;;  %v3682_v49 = vld [vmem:[%s7020_s0 + $0x18] sm:$0xf] }
  0x99   :  { %v892_v11 = vsel %vm3813_vm2, %v887_v54, %v891_v36  ;;  %v998_v30 = vsel %vm4433_vm5, %v996_v3, %v997_v19  ;;  %v857_v34 = vrot.slane %v855_v62, 5  ;;  %v859_v18 = vshrl.u32 %v4426_v22, 16  ;;  %v3683_v36 = vld [vmem:[%s7020_s0 + $0x1c] sm:$0xf]  ;;  %v3684_v3 = vld [vmem:[%s7020_s0 + $0x20] sm:$0x1] }
  0x9a   :  { %v1511_v51 = vunpack.c.l.b16 %v892_v11  ;;  %v1609_v58 = vunpack.c.l.b16 %v998_v30  ;;  %v852_v55 = vor.u32 %v851_v53, %v848_v60  ;;  %v865_v61 = vshll.u32 %v4460_v1, 16  ;;  %v3685_v35 = vld [vmem:[%s7020_s0 + $0x24] sm:$0xf] }
  0x9b   :  { %v3406_v20 = vrot.slane %v3682_v49, 9  ;;  %v1008_v54 = vrot.slane %v3683_v36, 5  ;;  %v1011_v19 = vrot.slane %v3684_v3, 5  ;;  %v861_v60 = vrot.slane %v859_v18, 4  ;;  %v3687_v18 = vld [vmem:[%s7020_s0 + $0x2c] sm:$0x1] }
  0x9c   :  { %v4479_v53 = vpack.c.b16 %v1511_v51, %v1510_v28  ;;  %v1672_v62 = vpack.c.b16 %v1609_v58, %v1608_v5  ;;  %v853_v2 = vrot.slane %v852_v55, 4  ;;  %v867_v11 = vrot.slane %v865_v61, 5  ;;  %v3686_v51 = vld [vmem:[%s7020_s0 + $0x28] sm:$0xf]  ;;  %v4494_v55 = vpop.permute.xlu2 %1554 }
  0x9d   :  { %v1009_v30 = vsel %vm4433_vm5, %v3406_v20, %v1008_v54  ;;  %v1010_v49 = vrot.slane %v1008_v54, 4  ;;  %v3407_v36 = vrot.slane %v3685_v35, 9  ;;  %v862_v28 = vor.u32 %v861_v60, %v857_v34  ;;  %7163 = vst [vmem:[#allocation29_spill] sm:$0xff] %v4494_v55  ;;  %v3691_v55 = vld [vmem:[%s7020_s0 + $0x3c] sm:$0xf] }
  0x9e   :  { %7162 = vst [vmem:[#allocation28_spill] sm:$0xff] %v4479_v53  ;;  %1606 = vrot.lane.b32.xlu1 %v4479_v53, %s3759_s11  ;;  %1704 = vrot.lane.b32.xlu2 %v1672_v62, %s3760_s9  ;;  %v858_v5 = vsel %vm3813_vm2, %v853_v2, %v857_v34  ;;  %v1612_v61 = vunpack.c.l.b16 %v1009_v30  ;;  %v1015_v58 = vrot.slane %v3686_v51, 5  ;;  %v1018_v20 = vrot.slane %v3687_v18, 5  ;;  %v3688_v34 = vld [vmem:[%s7020_s0 + $0xc] sm:$0xf] }
  0x9f   :  { %v1012_v35 = vsel %vm4433_vm5, %v1010_v49, %v1011_v19  ;;  %v3405_v54 = vrot.slane %v3688_v34, 9  ;;  %v863_v3 = vrot.slane %v862_v28, 4  ;;  %v1508_v30 = vunpack.c.l.b16 %v858_v5  ;;  %v3689_v19 = vld [vmem:[%s7020_s0 + $0x10] sm:$0xf]  ;;  %v3690_v18 = vld [vmem:[%s7020_s0 + $0x14] sm:$0x1] }
  0xa0   :  { %v1613_v62 = vunpack.c.l.b16 %v1012_v35  ;;  %v1016_v2 = vsel %vm4433_vm5, %v3407_v36, %v1015_v58  ;;  %v1017_v60 = vrot.slane %v1015_v58, 4  ;;  %v1001_v49 = vrot.slane %v3689_v19, 5 }
  0xa1   :  { %v1614_v51 = vunpack.c.l.b16 %v1016_v2  ;;  %v1004_v53 = vrot.slane %v3690_v18, 5  ;;  %v868_v28 = vsel %vm3813_vm2, %v863_v3, %v867_v11  ;;  %v3409_v18 = vrot.slane %v3691_v55, 9  ;;  %v3692_v11 = vld [vmem:[%s7020_s0 + $0x40] sm:$0xf]  ;;  %v3694_v55 = vld [vmem:[%s7020_s0 + $0x48] sm:$0xf] }
  0xa2   :  { %v4514_v35 = vpack.c.b16 %v1613_v62, %v1612_v61  ;;  %v1019_v36 = vsel %vm4433_vm5, %v1017_v60, %v1018_v20  ;;  %v1509_v5 = vunpack.c.l.b16 %v868_v28  ;;  %v1002_v34 = vsel %vm4433_vm5, %v3405_v54, %v1001_v49  ;;  %v3693_v20 = vld [vmem:[%s7020_s0 + $0x44] sm:$0x1] }
  0xa3   :  { %v1615_v58 = vunpack.c.l.b16 %v1019_v36  ;;  %v1003_v2 = vrot.slane %v1001_v49, 4  ;;  %v1610_v19 = vunpack.c.l.b16 %v1002_v34  ;;  %v1029_v61 = vrot.slane %v3692_v11, 5  ;;  %v3698_v11 = vld [vmem:[%s7020_s0 + $0x34] sm:$0xf] }
  0xa4   :  { %7164 = vst [vmem:[#allocation30_spill] sm:$0xff] %v4514_v35  ;;  %v1032_v3 = vrot.slane %v3693_v20, 5  ;;  %v4529_v62 = vpack.c.b16 %v1509_v5, %v1508_v30  ;;  %v3410_v49 = vrot.slane %v3694_v55, 9  ;;  %v3695_v30 = vld [vmem:[%s7020_s0 + $0x4c] sm:$0xf]  ;;  %vm2825_vm6 = vcmask 1041408  }
  0xa5   :  { %v4531_v54 = vpack.c.b16 %v1615_v58, %v1614_v51  ;;  %v1005_v60 = vsel %vm4433_vm5, %v1003_v2, %v1004_v53  ;;  %v1030_v36 = vsel %vm4433_vm5, %v3409_v18, %v1029_v61  ;;  %v1031_v34 = vrot.slane %v1029_v61, 4  ;;  %v3696_v5 = vld [vmem:[%s7020_s0 + $0x50] sm:$0x1] }
  0xa6   :  { %7165 = vst [vmem:[#allocation31_spill] sm:$0xff] %v4529_v62  ;;  %1708 = vrot.lane.b32.xlu1 %v4514_v35, %s3760_s9  ;;  %v1611_v28 = vunpack.c.l.b16 %v1005_v60  ;;  %v1036_v51 = vrot.slane %v3695_v30, 5  ;;  %1604 = vrot.lane.b32.xlu0 %v4529_v62, %s3759_s11  ;;  %v1618_v53 = vunpack.c.l.b16 %v1030_v36  ;;  %v1039_v58 = vrot.slane %v3696_v5, 5  ;;  %v3697_v2 = vld [vmem:[%s7020_s0 + $0x30] sm:$0xf]  ;;  %v4562_v36 = vpop.permute.xlu2 %1560 }
  0xa7   :  { %7166 = vst [vmem:[#allocation32_spill] sm:$0xff] %v4531_v54  ;;  %1710 = vrot.lane.b32.xlu2 %v4531_v54, %s3760_s9  ;;  %v3408_v18 = vrot.slane %v3697_v2, 9  ;;  %v1022_v61 = vrot.slane %v3698_v11, 5  ;;  %v1033_v20 = vsel %vm4433_vm5, %v1031_v34, %v1032_v3  ;;  %v3699_v3 = vld [vmem:[%s7020_s0 + $0x38] sm:$0x1]  ;;  %vm2188_vm7 = vcmask 31744  }
  0xa8   :  { %v1037_v60 = vsel %vm4433_vm5, %v3410_v49, %v1036_v51  ;;  %v1038_v55 = vrot.slane %v1036_v51, 4  ;;  %7167 = vst [vmem:[#allocation33_spill] sm:$0xff] %v4562_v36  ;;  %v1619_v30 = vunpack.c.l.b16 %v1033_v20  ;;  %v4564_v54 = vpack.c.b16 %v1611_v28, %v1610_v19  ;;  %v3700_v20 = vld [vmem:[%s7020_s0 + $0x60] sm:$0xf]  ;;  %v3701_v28 = vld [vmem:[%s7020_s0 + $0x64] sm:$0xf] }
  0xa9   :  { %v1620_v5 = vunpack.c.l.b16 %v1037_v60  ;;  %v1024_v62 = vrot.slane %v1022_v61, 4  ;;  %v1023_v11 = vsel %vm4433_vm5, %v3408_v18, %v1022_v61  ;;  %v1025_v34 = vrot.slane %v3699_v3, 5  ;;  %v3702_v61 = vld [vmem:[%s7020_s0 + $0x68] sm:$0x1]  ;;  %v3703_v60 = vld [vmem:[%s7020_s0 + $0x6c] sm:$0xf]  ;;  %v4592_v3 = vpop.permute.xlu1 %1548 }
  0xaa   :  { %7168 = vst [vmem:[#allocation34_spill] sm:$0xff] %v4564_v54  ;;  %v1040_v2 = vsel %vm4433_vm5, %v1038_v55, %v1039_v58  ;;  %v4573_v49 = vpack.c.b16 %v1619_v30, %v1618_v53  ;;  %v3412_v19 = vrot.slane %v3700_v20, 9  ;;  %v1050_v58 = vrot.slane %v3701_v28, 5  ;;  %v3704_v30 = vld [vmem:[%s7020_s0 + $0x70] sm:$0xf] }
  0xab   :  { %v1621_v51 = vunpack.c.l.b16 %v1040_v2  ;;  %v1026_v18 = vsel %vm4433_vm5, %v1024_v62, %v1025_v34  ;;  %v1053_v53 = vrot.slane %v3702_v61, 5  ;;  %v3413_v55 = vrot.slane %v3703_v60, 9  ;;  %7170 = vst [vmem:[#allocation36_spill] sm:$0xff] %v4592_v3 }
  0xac   :  { %7169 = vst [vmem:[#allocation35_spill] sm:$0xff] %v4573_v49  ;;  %v1057_v2 = vrot.slane %v3704_v30, 5  ;;  %v1616_v62 = vunpack.c.l.b16 %v1023_v11  ;;  %v1051_v34 = vsel %vm4433_vm5, %v3412_v19, %v1050_v58  ;;  %v1052_v28 = vrot.slane %v1050_v58, 4  ;;  %v3705_v30 = vld [vmem:[%s7020_s0 + $0x74] sm:$0x1] }
  0xad   :  { %v4594_v20 = vpack.c.b16 %v1621_v51, %v1620_v5  ;;  %v1624_v61 = vunpack.c.l.b16 %v1051_v34  ;;  %v1060_v3 = vrot.slane %v3705_v30, 5  ;;  %v1617_v5 = vunpack.c.l.b16 %v1026_v18  ;;  %v3706_v19 = vld [vmem:[%s7020_s0 + $0x54] sm:$0xf]  ;;  %v3707_v34 = vld [vmem:[%s7020_s0 + $0x58] sm:$0xf] }
  0xae   :  { %1714 = vrot.lane.b32.xlu1 %v4573_v49, %s3760_s9  ;;  %v1058_v60 = vsel %vm4433_vm5, %v3413_v55, %v1057_v2  ;;  %v1059_v36 = vrot.slane %v1057_v2, 4  ;;  %1706 = vrot.lane.b32.xlu0 %v4564_v54, %s3760_s9  ;;  %v1054_v11 = vsel %vm4433_vm5, %v1052_v28, %v1053_v53  ;;  %v3411_v58 = vrot.slane %v3706_v19, 9  ;;  %v3708_v18 = vld [vmem:[%s7020_s0 + $0x5c] sm:$0x1] }
  0xaf   :  { %7171 = vst [vmem:[#allocation37_spill] sm:$0xff] %v4594_v20  ;;  %1716 = vrot.lane.b32.xlu2 %v4594_v20, %s3760_s9  ;;  %v1626_v51 = vunpack.c.l.b16 %v1058_v60  ;;  %v1625_v55 = vunpack.c.l.b16 %v1054_v11  ;;  %v1043_v30 = vrot.slane %v3707_v34, 5  ;;  %v1046_v53 = vrot.slane %v3708_v18, 5  ;;  %v3709_v60 = vld [vmem:[%s7020_s0 + $0x84] sm:$0xf]  ;;  %v4633_v18 = vpop.permute.xlu2 %1566 }
  0xb0   :  { %v1061_v2 = vsel %vm4433_vm5, %v1059_v36, %v1060_v3  ;;  %v3415_v19 = vrot.slane %v3709_v60, 9  ;;  %v3710_v36 = vld [vmem:[%s7020_s0 + $0x88] sm:$0xf]  ;;  %v3711_v34 = vld [vmem:[%s7020_s0 + $0x8c] sm:$0x1]  ;;  %7173 = vst [vmem:[#allocation39_spill] sm:$0xff] %v4633_v18 }
  0xb1   :  { %v1627_v28 = vunpack.c.l.b16 %v1061_v2  ;;  %v1071_v3 = vrot.slane %v3710_v36, 5  ;;  %v4628_v11 = vpack.c.b16 %v1625_v55, %v1624_v61  ;;  %v1045_v20 = vrot.slane %v1043_v30, 4  ;;  %v3712_v36 = vld [vmem:[%s7020_s0 + $0x90] sm:$0xf] }
  0xb2   :  { %v1074_v49 = vrot.slane %v3711_v34, 5  ;;  %v4635_v2 = vpack.c.b16 %v1617_v5, %v1616_v62  ;;  %v1044_v61 = vsel %vm4433_vm5, %v3411_v58, %v1043_v30  ;;  %v3416_v34 = vrot.slane %v3712_v36, 9  ;;  %v3713_v62 = vld [vmem:[%s7020_s0 + $0x94] sm:$0xf]  ;;  %v3714_v58 = vld [vmem:[%s7020_s0 + $0x98] sm:$0x1] }
  0xb3   :  { %7172 = vst [vmem:[#allocation38_spill] sm:$0xff] %v4628_v11  ;;  %v4637_v35 = vpack.c.b16 %v1627_v28, %v1626_v51  ;;  %v1072_v60 = vsel %vm4433_vm5, %v3415_v19, %v1071_v3  ;;  %v1073_v54 = vrot.slane %v1071_v3, 4  ;;  %v1047_v55 = vsel %vm4433_vm5, %v1045_v20, %v1046_v53  ;;  %v3715_v20 = vld [vmem:[%s7020_s0 + $0x78] sm:$0xf]  ;;  %v4659_v19 = vpop.permute.xlu0 %1544 }
  0xb4   :  { %7174 = vst [vmem:[#allocation40_spill] sm:$0xff] %v4635_v2  ;;  %v1078_v5 = vrot.slane %v3713_v62, 5  ;;  %v1630_v28 = vunpack.c.l.b16 %v1072_v60  ;;  %v1081_v30 = vrot.slane %v3714_v58, 5  ;;  %v3414_v53 = vrot.slane %v3715_v20, 9  ;;  %v3716_v60 = vld [vmem:[%s7020_s0 + $0x7c] sm:$0xf]  ;;  %v4668_v62 = vpop.permute.xlu1 %1550 }
  0xb5   :  { %7175 = vst [vmem:[#allocation41_spill] sm:$0xff] %v4637_v35  ;;  %v1075_v51 = vsel %vm4433_vm5, %v1073_v54, %v1074_v49  ;;  %v1064_v36 = vrot.slane %v3716_v60, 5  ;;  %v1622_v58 = vunpack.c.l.b16 %v1044_v61  ;;  %v1623_v20 = vunpack.c.l.b16 %v1047_v55  ;;  %v3718_v55 = vld [vmem:[%s7020_s0 + $0xa8] sm:$0xf] }
  0xb6   :  { %7176 = vst [vmem:[#allocation42_spill] sm:$0xff] %v4659_v19  ;;  %1720 = vrot.lane.b32.xlu1 %v4628_v11, %s3760_s9  ;;  %v1631_v3 = vunpack.c.l.b16 %v1075_v51  ;;  %v1079_v54 = vsel %vm4433_vm5, %v3416_v34, %v1078_v5  ;;  %v1080_v49 = vrot.slane %v1078_v5, 4  ;;  %1712 = vrot.lane.b32.xlu0 %v4635_v2, %s3760_s9  ;;  %v3717_v34 = vld [vmem:[%s7020_s0 + $0x80] sm:$0x1]  ;;  %v1102_v2 = vrot.slane %v4074_v17, 5 }
  0xb7   :  { %7177 = vst [vmem:[#allocation43_spill] sm:$0xff] %v4668_v62  ;;  %1722 = vrot.lane.b32.xlu2 %v4637_v35, %s3760_s9  ;;  %v1632_v51 = vunpack.c.l.b16 %v1079_v54  ;;  %v1067_v5 = vrot.slane %v3717_v34, 5  ;;  %v1066_v60 = vrot.slane %v1064_v36, 4  ;;  %v1065_v19 = vsel %vm4433_vm5, %v3414_v53, %v1064_v36  ;;  %v3719_v34 = vld [vmem:[%s7020_s0 + $0xac] sm:$0xf]  ;;  %v4705_v35 = vpop.permute.xlu2 %1572 }
  0xb8   :  { %v1082_v18 = vsel %vm4433_vm5, %v1080_v49, %v1081_v30  ;;  %v4679_v11 = vpack.c.b16 %v1631_v3, %v1630_v28  ;;  %v3418_v54 = vrot.slane %v3718_v55, 9  ;;  %v1092_v30 = vrot.slane %v3719_v34, 5  ;;  %v3721_v49 = vld [vmem:[%s7020_s0 + $0xb4] sm:$0xf]  ;;  %7179 = vst [vmem:[#allocation45_spill] sm:$0xff] %v4705_v35 }
  0xb9   :  { %v1633_v62 = vunpack.c.l.b16 %v1082_v18  ;;  %v1068_v61 = vsel %vm4433_vm5, %v1066_v60, %v1067_v5  ;;  %v3720_v18 = vld [vmem:[%s7020_s0 + $0xb0] sm:$0x1]  ;;  %v4694_v3 = vpack.c.b16 %v1623_v20, %v1622_v58  ;;  %v3419_v36 = vrot.slane %v3721_v49, 9  ;;  %v3723_v17 = vld [vmem:[%s7020_s0 + $0xa0] sm:$0xf] }
  0xba   :  { %v1095_v28 = vrot.slane %v3720_v18, 5  ;;  %v1099_v5 = vrot.slane %v4069_v16, 5  ;;  %v1628_v60 = vunpack.c.l.b16 %v1065_v19  ;;  %v1093_v55 = vsel %vm4433_vm5, %v3418_v54, %v1092_v30  ;;  %v3724_v54 = vld [vmem:[%s7020_s0 + $0xa4] sm:$0x1] }
  0xbb   :  { %7178 = vst [vmem:[#allocation44_spill] sm:$0xff] %v4694_v3  ;;  %v4696_v53 = vpack.c.b16 %v1633_v62, %v1632_v51  ;;  %v1094_v34 = vrot.slane %v1092_v30, 4  ;;  %v1629_v58 = vunpack.c.l.b16 %v1068_v61  ;;  %v3722_v51 = vld [vmem:[%s7020_s0 + $0x9c] sm:$0xf]  ;;  %v1636_v19 = vunpack.c.l.b16 %v1093_v55  ;;  %v3725_v35 = vld [vmem:[%s7020_s0 + $0xe4] sm:$0xf] }
  0xbc   :  { %v1100_v62 = vsel %vm4433_vm5, %v3419_v36, %v1099_v5  ;;  %v1101_v20 = vrot.slane %v1099_v5, 4  ;;  %v3417_v18 = vrot.slane %v3722_v51, 9  ;;  %v1085_v61 = vrot.slane %v3723_v17, 5  ;;  %v4728_v5 = vpop.permute.xlu0 %1546  ;;  %v4730_v51 = vpop.permute.xlu1 %1558 }
  0xbd   :  { %v1096_v16 = vsel %vm4433_vm5, %v1094_v34, %v1095_v28  ;;  %v1088_v30 = vrot.slane %v3724_v54, 5  ;;  %v1638_v36 = vunpack.c.l.b16 %v1100_v62  ;;  %7180 = vst [vmem:[#allocation46_spill] sm:$0xff] %v4730_v51  ;;  %v4732_v17 = vpack.c.b16 %v1629_v58, %v1628_v60  ;;  %v3727_v60 = vld [vmem:[%s7020_s0 + $0xec] sm:$0x1] }
  0xbe   :  { %1726 = vrot.lane.b32.xlu1 %v4679_v11, %s3760_s9  ;;  %1718 = vrot.lane.b32.xlu0 %v4694_v3, %s3760_s9  ;;  %v1637_v49 = vunpack.c.l.b16 %v1096_v16  ;;  %v1103_v28 = vsel %vm4433_vm5, %v1101_v20, %v1102_v2  ;;  %v1087_v34 = vrot.slane %v1085_v61, 4  ;;  %v1086_v54 = vsel %vm4433_vm5, %v3417_v18, %v1085_v61  ;;  %v3726_v2 = vld [vmem:[%s7020_s0 + $0xe8] sm:$0xf] }
  0xbf   :  { %1728 = vrot.lane.b32.xlu2 %v4696_v53, %s3760_s9  ;;  %v1639_v55 = vunpack.c.l.b16 %v1103_v28  ;;  %v3421_v16 = vrot.slane %v3725_v35, 9  ;;  %v1113_v62 = vrot.slane %v3726_v2, 5  ;;  %v1116_v58 = vrot.slane %v3727_v60, 5 }
  0xc0   :  { %v4742_v20 = vpack.c.b16 %v1637_v49, %v1636_v19  ;;  %v1089_v28 = vsel %vm4433_vm5, %v1087_v34, %v1088_v30  ;;  %v3422_v18 = vrot.slane %v4109_v7, 9  ;;  %v1120_v2 = vrot.slane %v4125_v39, 5  ;;  %v3728_v30 = vld [vmem:[%s7020_s0 + $0xdc] sm:$0xf]  ;;  %v3729_v39 = vld [vmem:[%s7020_s0 + $0xd8] sm:$0xf] }
  0xc1   :  { %v4750_v61 = vpack.c.b16 %v1639_v55, %v1638_v36  ;;  %v1114_v35 = vsel %vm4433_vm5, %v3421_v16, %v1113_v62  ;;  %v1115_v51 = vrot.slane %v1113_v62, 4  ;;  %v1634_v19 = vunpack.c.l.b16 %v1086_v54 }
  0xc2   :  { %7181 = vst [vmem:[#allocation47_spill] sm:$0xff] %v4742_v20  ;;  %v1635_v49 = vunpack.c.l.b16 %v1089_v28  ;;  %v1123_v3 = vrot.slane %v4132_v44, 5  ;;  %v1106_v34 = vrot.slane %v3728_v30, 5  ;;  %v1121_v36 = vsel %vm4433_vm5, %v3422_v18, %v1120_v2  ;;  %v4768_v28 = vpop.permute.xlu2 %1578 }
  0xc3   :  { %7182 = vst [vmem:[#allocation48_spill] sm:$0xff] %v4750_v61  ;;  %v1117_v7 = vsel %vm4433_vm5, %v1115_v51, %v1116_v58  ;;  %v1122_v55 = vrot.slane %v1120_v2, 4  ;;  %v3420_v54 = vrot.slane %v3729_v39, 9  ;;  %v1642_v44 = vunpack.c.l.b16 %v1114_v35  ;;  %v3730_v58 = vld [vmem:[%s7020_s0 + $0xe0] sm:$0x1] }
  0xc4   :  { %v1643_v16 = vunpack.c.l.b16 %v1117_v7  ;;  %v1108_v62 = vrot.slane %v1106_v34, 4  ;;  %7183 = vst [vmem:[#allocation49_spill] sm:$0xff] %v4768_v28  ;;  %v1644_v60 = vunpack.c.l.b16 %v1121_v36  ;;  %v1109_v18 = vrot.slane %v3730_v58, 5  ;;  %v4783_v7 = vpop.permute.xlu0 %1556  ;;  %v3731_v39 = vld [vmem:[%s7020_s0 + $0x108] sm:$0xf]  ;;  %v4800_v58 = vpop.permute.xlu1 %1564 }
  0xc5   :  { %v1124_v51 = vsel %vm4433_vm5, %v1122_v55, %v1123_v3  ;;  %v4779_v35 = vpack.c.b16 %v1635_v49, %v1634_v19  ;;  %v1107_v30 = vsel %vm4433_vm5, %v3420_v54, %v1106_v34  ;;  %7184 = vst [vmem:[#allocation50_spill] sm:$0xff] %v4783_v7  ;;  %v3732_v3 = vld [vmem:[%s7020_s0 + $0x10c] sm:$0xf]  ;;  %v3733_v19 = vld [vmem:[%s7020_s0 + $0x110] sm:$0x1]  ;;  %v3425_v54 = vrot.slane %v4179_v38, 9 }
  0xc6   :  { %1732 = vrot.lane.b32.xlu1 %v4742_v20, %s3760_s9  ;;  %1724 = vrot.lane.b32.xlu0 %v4732_v17, %s3760_s9  ;;  %v1645_v2 = vunpack.c.l.b16 %v1124_v51  ;;  %v1134_v36 = vrot.slane %v3732_v3, 5  ;;  %v1137_v49 = vrot.slane %v3733_v19, 5  ;;  %v4794_v55 = vpack.c.b16 %v1643_v16, %v1642_v44  ;;  %7185 = vst [vmem:[#allocation51_spill] sm:$0xff] %v4800_v58 }
  0xc7   :  { %1734 = vrot.lane.b32.xlu2 %v4750_v61, %s3760_s9  ;;  %v3424_v61 = vrot.slane %v3731_v39, 9  ;;  %v1110_v34 = vsel %vm4433_vm5, %v1108_v62, %v1109_v18  ;;  %v1141_v51 = vrot.slane %v4198_v0, 5  ;;  %v1144_v28 = vrot.slane %v4206_v14, 5  ;;  %v3734_v0 = vld [vmem:[%s7020_s0 + $0xfc] sm:$0xf] }
  0xc8   :  { %v4802_v39 = vpack.c.b16 %v1645_v2, %v1644_v60  ;;  %v1136_v7 = vrot.slane %v1134_v36, 4  ;;  %v1640_v19 = vunpack.c.l.b16 %v1107_v30  ;;  %v1641_v62 = vunpack.c.l.b16 %v1110_v34 }
  0xc9   :  { %v1135_v3 = vsel %vm4433_vm5, %v3424_v61, %v1134_v36  ;;  %v1142_v44 = vsel %vm4433_vm5, %v3425_v54, %v1141_v51  ;;  %v1143_v16 = vrot.slane %v1141_v51, 4  ;;  %v3423_v60 = vrot.slane %v3734_v0, 9  ;;  %v3735_v61 = vld [vmem:[%s7020_s0 + $0x100] sm:$0xf] }
  0xca   :  { %v1138_v38 = vsel %vm4433_vm5, %v1136_v7, %v1137_v49  ;;  %v1127_v18 = vrot.slane %v3735_v61, 5  ;;  %v1648_v14 = vunpack.c.l.b16 %v1135_v3  ;;  %v3736_v7 = vld [vmem:[%s7020_s0 + $0x104] sm:$0x1]  ;;  %v1650_v49 = vunpack.c.l.b16 %v1142_v44  ;;  %v4828_v51 = vpop.permute.xlu2 %1584 }
  0xcb   :  { %v1649_v2 = vunpack.c.l.b16 %v1138_v38  ;;  %v1145_v30 = vsel %vm4433_vm5, %v1143_v16, %v1144_v28  ;;  %v1130_v36 = vrot.slane %v3736_v7, 5  ;;  %7186 = vst [vmem:[#allocation52_spill] sm:$0xff] %v4828_v51  ;;  %v3737_v28 = vld [vmem:[%s7020_s0 + $0x12c] sm:$0xf]  ;;  %v1155_v16 = vrot.slane %v4152_v6, 5 }
  0xcc   :  { %v1651_v34 = vunpack.c.l.b16 %v1145_v30  ;;  %v1129_v54 = vrot.slane %v1127_v18, 4  ;;  %v3427_v3 = vrot.slane %v3737_v28, 9  ;;  %v1688_v38 = vpack.c.b16 %v1641_v62, %v1640_v19  ;;  %v4845_v28 = vpop.permute.xlu0 %1562 }
  0xcd   :  { %v1128_v0 = vsel %vm4433_vm5, %v3423_v60, %v1127_v18  ;;  %v1158_v61 = vrot.slane %v4157_v8, 5  ;;  %v3428_v7 = vrot.slane %v4271_v46, 9  ;;  %v4838_v44 = vpack.c.b16 %v1649_v2, %v1648_v14  ;;  %v4855_v18 = vpop.permute.xlu1 %1570 }
  0xce   :  { %1738 = vrot.lane.b32.xlu1 %v4794_v55, %s3760_s9  ;;  %1730 = vrot.lane.b32.xlu0 %v4779_v35, %s3760_s9  ;;  %v1131_v30 = vsel %vm4433_vm5, %v1129_v54, %v1130_v36  ;;  %v1157_v51 = vrot.slane %v1155_v16, 4  ;;  %v1162_v58 = vrot.slane %v4282_v15, 5  ;;  %v4843_v20 = vpack.c.b16 %v1651_v34, %v1650_v49  ;;  %7188 = vst [vmem:[#allocation54_spill] sm:$0xff] %v4855_v18 }
  0xcf   :  { %1740 = vrot.lane.b32.xlu2 %v4802_v39, %s3760_s9  ;;  %v1156_v6 = vsel %vm4433_vm5, %v3427_v3, %v1155_v16  ;;  %v1165_v19 = vrot.slane %v4289_v25, 5  ;;  %v1148_v8 = vrot.slane %v4172_v31, 5  ;;  %v1646_v15 = vunpack.c.l.b16 %v1128_v0  ;;  %v3738_v31 = vld [vmem:[%s7020_s0 + $0x120] sm:$0xf] }
  0xd0   :  { %7187 = vst [vmem:[#allocation53_spill] sm:$0xff] %v4843_v20  ;;  %v1159_v46 = vsel %vm4433_vm5, %v1157_v51, %v1158_v61  ;;  %v1163_v62 = vsel %vm4433_vm5, %v3428_v7, %v1162_v58  ;;  %v1164_v60 = vrot.slane %v1162_v58, 4  ;;  %v1647_v14 = vunpack.c.l.b16 %v1131_v30 }
  0xd1   :  { %v1654_v2 = vunpack.c.l.b16 %v1156_v6  ;;  %v1655_v36 = vunpack.c.l.b16 %v1159_v46  ;;  %v3426_v49 = vrot.slane %v3738_v31, 9  ;;  %v1656_v58 = vunpack.c.l.b16 %v1163_v62 }
  0xd2   :  { %v1166_v25 = vsel %vm4433_vm5, %v1164_v60, %v1165_v19  ;;  %v1150_v54 = vrot.slane %v1148_v8, 4  ;;  %v1151_v51 = vrot.slane %v4186_v47, 5  ;;  %v3430_v3 = vrot.slane %v4213_v23, 9  ;;  %v4879_v19 = vpop.permute.xlu2 %1590 }
  0xd3   :  { %v1657_v34 = vunpack.c.l.b16 %v1166_v25  ;;  %v1176_v16 = vrot.slane %v4229_v52, 5  ;;  %v1179_v0 = vrot.slane %v4236_v59, 5  ;;  %v4871_v61 = vpack.c.b16 %v1647_v14, %v1646_v15  ;;  %7190 = vst [vmem:[#allocation56_spill] sm:$0xff] %v4879_v19  ;;  %v5113_v19 = vld [vmem:[%s7020_s0 + $0x90] sm:$0xff] }
  0xd4   :  { %v3431_v7 = vrot.slane %v4353_v4, 9  ;;  %v4875_v30 = vpack.c.b16 %v1655_v36, %v1654_v2  ;;  %v1149_v6 = vsel %vm4433_vm5, %v3426_v49, %v1148_v8  ;;  %v1186_v23 = vrot.slane %v4376_v21, 5  ;;  %v4893_v15 = vpop.permute.xlu0 %1568 }
  0xd5   :  { %v1178_v47 = vrot.slane %v1176_v16, 4  ;;  %v4882_v46 = vpack.c.b16 %v1657_v34, %v1656_v58  ;;  %v1152_v52 = vsel %vm4433_vm5, %v1150_v54, %v1151_v51  ;;  %v1177_v59 = vsel %vm4433_vm5, %v3430_v3, %v1176_v16  ;;  %7192 = vst [vmem:[#allocation58_spill] sm:$0xff] %v4893_v15  ;;  %v4900_v31 = vpop.permute.xlu1 %1576  ;;  %v3651_v15 = vld [vmem:[%s7020_s0 + $0x144] sm:$0xff] }
  0xd6   :  { %1744 = vrot.lane.b32.xlu1 %v4838_v44, %s3760_s9  ;;  %1736 = vrot.lane.b32.xlu0 %v1688_v38, %s3760_s9  ;;  %v1183_v38 = vrot.slane %v4371_v24, 5  ;;  %7189 = vst [vmem:[#allocation55_spill] sm:$0xff] %v4875_v30  ;;  %v1169_v62 = vrot.slane %v4259_v40, 5  ;;  %v1652_v60 = vunpack.c.l.b16 %v1149_v6  ;;  %v1653_v14 = vunpack.c.l.b16 %v1152_v52 }
  0xd7   :  { %1746 = vrot.lane.b32.xlu2 %v4843_v20, %s3760_s9  ;;  %7191 = vst [vmem:[#allocation57_spill] sm:$0xff] %v4882_v46  ;;  %v1180_v24 = vsel %vm4433_vm5, %v1178_v47, %v1179_v0  ;;  %v1660_v2 = vunpack.c.l.b16 %v1177_v59  ;;  %v3429_v25 = vrot.slane %v4241_v63, 9  ;;  %v3433_v58 = vrot.slane %v4297_v43, 9 }
  0xd8   :  { %v1185_v4 = vrot.slane %v1183_v38, 4  ;;  %v1184_v8 = vsel %vm4433_vm5, %v3431_v7, %v1183_v38  ;;  %v1661_v36 = vunpack.c.l.b16 %v1180_v24  ;;  %7193 = vst [vmem:[#allocation59_spill] sm:$0xff] %v4900_v31  ;;  %v1197_v34 = vrot.slane %v4310_v32, 5  ;;  %v7263_v31 = vld [vmem:[#allocation9_spill] sm:$0xff] }
  0xd9   :  { %v1662_v40 = vunpack.c.l.b16 %v1184_v8  ;;  %v1171_v54 = vrot.slane %v1169_v62, 4  ;;  %v1172_v51 = vrot.slane %v4264_v42, 5  ;;  %v1200_v3 = vrot.slane %v4325_v50, 5 }
  0xda   :  { %v1187_v21 = vsel %vm4433_vm5, %v1185_v4, %v1186_v23  ;;  %v3434_v63 = vrot.slane %v4419_v12, 9  ;;  %v1199_v16 = vrot.slane %v1197_v34, 4  ;;  %v1204_v0 = vrot.slane %v4426_v22, 5  ;;  %v4927_v22 = vpop.permute.xlu2 %1596 }
  0xdb   :  { %v1663_v49 = vunpack.c.l.b16 %v1187_v21  ;;  %v4912_v7 = vpack.c.b16 %v1653_v14, %v1652_v60  ;;  %v4914_v38 = vpack.c.b16 %v1661_v36, %v1660_v2  ;;  %v1207_v6 = vrot.slane %v4460_v1, 5  ;;  %7196 = vst [vmem:[#allocation62_spill] sm:$0xff] %v4927_v22 }
  0xdc   :  { %v1198_v32 = vsel %vm4433_vm5, %v3433_v58, %v1197_v34  ;;  %v1201_v42 = vsel %vm4433_vm5, %v1199_v16, %v1200_v3  ;;  %v1206_v50 = vrot.slane %v1204_v0, 4  ;;  %v1170_v43 = vsel %vm4433_vm5, %v3429_v25, %v1169_v62  ;;  %v4940_v62 = vpop.permute.xlu0 %1574 }
  0xdd   :  { %7194 = vst [vmem:[#allocation60_spill] sm:$0xff] %v4912_v7  ;;  %v4917_v47 = vpack.c.b16 %v1663_v49, %v1662_v40  ;;  %v1173_v12 = vsel %vm4433_vm5, %v1171_v54, %v1172_v51  ;;  %v1205_v1 = vsel %vm4433_vm5, %v3434_v63, %v1204_v0  ;;  %v1190_v23 = vrot.slane %v4341_v56, 5  ;;  %v4944_v36 = vpop.permute.xlu1 %1582 }
  0xde   :  { %1750 = vrot.lane.b32.xlu1 %v4875_v30, %s3760_s9  ;;  %1742 = vrot.lane.b32.xlu0 %v4871_v61, %s3760_s9  ;;  %v1208_v52 = vsel %vm4433_vm5, %v1206_v50, %v1207_v6  ;;  %v1666_v59 = vunpack.c.l.b16 %v1198_v32  ;;  %v1667_v4 = vunpack.c.l.b16 %v1201_v42  ;;  %v1658_v24 = vunpack.c.l.b16 %v1170_v43  ;;  %7197 = vst [vmem:[#allocation63_spill] sm:$0xff] %v4940_v62  ;;  %v4976_v32 = vld [vmem:[%s7020_s0 + $0xc] sm:$0xff]  ;;  %v5130_v62 = vld [vmem:[%s7020_s0 + $0xfc] sm:$0xff] }
  0xdf   :  { %1752 = vrot.lane.b32.xlu2 %v4882_v46, %s3760_s9  ;;  %7195 = vst [vmem:[#allocation61_spill] sm:$0xff] %v4917_v47  ;;  %v1659_v8 = vunpack.c.l.b16 %v1173_v12  ;;  %v1668_v60 = vunpack.c.l.b16 %v1205_v1  ;;  %v1669_v56 = vunpack.c.l.b16 %v1208_v52  ;;  %v3432_v21 = vrot.slane %v4318_v29, 9  ;;  %v5002_v52 = vld [vmem:[%s7020_s0 + $0x30] sm:$0xff]  ;;  %v5218_v30 = vld [vmem:[%s7020_s0 + $0x138] sm:$0xff] }
  0xe0   :  { %v1192_v14 = vrot.slane %v1190_v23, 4  ;;  %v1193_v2 = vrot.slane %v4348_v33, 5  ;;  %7198 = vst [vmem:[#allocation64_spill] sm:$0xff] %v4944_v36  ;;  %v4946_v25 = vpack.c.b16 %v1667_v4, %v1666_v59  ;;  %v1211_v54 = vrot.slane %v4396_v45, 5  ;;  %v5009_v4 = vld [vmem:[%s7020_s0 + $0x3c] sm:$0xff]  ;;  %v5162_v36 = vld [vmem:[%s7020_s0 + $0x12c] sm:$0xff] }
  0xe1   :  { %v4948_v40 = vpack.c.b16 %v1659_v8, %v1658_v24  ;;  %v4950_v49 = vpack.c.b16 %v1669_v56, %v1668_v60  ;;  %v1191_v58 = vsel %vm4433_vm5, %v3432_v21, %v1190_v23  ;;  %v3435_v3 = vrot.slane %v4383_v37, 9  ;;  %7208 = vst [vmem:[#allocation74_spill] sm:$0xff] %v5009_v4  ;;  %v5022_v8 = vld [vmem:[%s7020_s0 + $0x54] sm:$0xff]  ;;  %v5027_v60 = vld [vmem:[%s7020_s0 + $0x60] sm:$0xff] }
  0xe2   :  { %7199 = vst [vmem:[#allocation65_spill] sm:$0xff] %v4946_v25  ;;  %v1194_v34 = vsel %vm4433_vm5, %v1192_v14, %v1193_v2  ;;  %v1664_v33 = vunpack.c.l.b16 %v1191_v58  ;;  %v1213_v63 = vrot.slane %v1211_v54, 4  ;;  %v1214_v16 = vrot.slane %v4404_v27, 5  ;;  %v4985_v27 = vld [vmem:[%s7020_s0 + $0x18] sm:$0xff]  ;;  %v5032_v56 = vld [vmem:[%s7020_s0 + $0x24] sm:$0xff] }
  0xe3   :  { %7200 = vst [vmem:[#allocation66_spill] sm:$0xff] %v4950_v49  ;;  %v1665_v51 = vunpack.c.l.b16 %v1194_v34  ;;  %v1212_v42 = vsel %vm4433_vm5, %v3435_v3, %v1211_v54  ;;  %v5049_v58 = vld [vmem:[%s7020_s0 + $0x78] sm:$0xff]  ;;  %v5054_v34 = vld [vmem:[%s7020_s0 + $0x84] sm:$0xff]  ;;  %vm2285_vm8 = vcmask 64512   ;;  %vm2350_vm9 = vcmask 97280  }
  0xe4   :  { %v4967_v0 = vpop.permute.xlu0 %1580  ;;  %v1215_v37 = vsel %vm4433_vm5, %v1213_v63, %v1214_v16  ;;  %v1670_v50 = vunpack.c.l.b16 %v1212_v42  ;;  %7210 = vst [vmem:[#allocation76_spill] sm:$0xff] %v5032_v56  ;;  %v5059_v54 = vld [vmem:[%s7020_s0 + $0x48] sm:$0xff]  ;;  %v5076_v63 = vld [vmem:[%s7020_s0 + $0x9c] sm:$0xff]  ;;  %vm2480_vm10 = vcmask 162816   ;;  %vm2415_vm11 = vcmask 130048  }
  0xe5   :  { %7202 = vst [vmem:[#allocation68_spill] sm:$0xff] %v4967_v0  ;;  %v4971_v6 = vpack.c.b16 %v1665_v51, %v1664_v33  ;;  %v1671_v43 = vunpack.c.l.b16 %v1215_v37  ;;  %v5081_v16 = vld [vmem:[%s7020_s0 + $0xa8] sm:$0xff]  ;;  %v3658_v0 = vld [vmem:[%s7020_s0 + $0x198] sm:$0xff]  ;;  %vm2545_vm12 = vcmask 195584   ;;  %vm2610_vm13 = vcmask 228352  }
  0xe6   :  { %1756 = vrot.lane.b32.xlu1 %v4914_v38, %s3760_s9  ;;  %1748 = vrot.lane.b32.xlu0 %v4912_v7, %s3760_s9  ;;  %7214 = vst [vmem:[#allocation80_spill] sm:$0xff] %v5054_v34  ;;  %v5086_v42 = vld [vmem:[%s7020_s0 + $0x6c] sm:$0xff]  ;;  %vm2675_vm14 = vcmask 261120   ;;  %vm2760_vm15 = vcmask 293888   ;;  %vm3392_vm0 = vcmask 1040384   ;;  %vm3394_vm1 = vcmask 123904  }
  0xe7   :  { %1758 = vrot.lane.b32.xlu2 %v4917_v47, %s3760_s9  ;;  %7204 = vst [vmem:[#allocation70_spill] sm:$0xff] %v4971_v6  ;;  %v4995_v1 = vpack.c.b16 %v1671_v43, %v1670_v50 }
  0xe8   :  { %7227 = vst [vmem:[#allocation93_spill] sm:$0xff] %v5162_v36 }
  0xe9   :  { %v4959_v29 = vpop.permute.xlu2 %1602  ;;  %v4969_v45 = vpop.permute.xlu1 %1588  ;;  %7205 = vst [vmem:[#allocation71_spill] sm:$0xff] %v4995_v1 }
  0xea   :  { %7201 = vst [vmem:[#allocation67_spill] sm:$0xff] %v4959_v29  ;;  %v5108_v29 = vld [vmem:[%s7020_s0 + $0xe4] sm:$0xff] }
  0xeb   :  { %7203 = vst [vmem:[#allocation69_spill] sm:$0xff] %v4969_v45 }
  0xec   :  { %7220 = vst [vmem:[#allocation86_spill] sm:$0xff] %v5108_v29 }
  0xed   :  { %7236 = vst [vmem:[#allocation102_spill] sm:$0xff] %v5218_v30 }
  0xee   :  { %1762 = vrot.lane.b32.xlu1 %v4946_v25, %s3760_s9  ;;  %1754 = vrot.lane.b32.xlu0 %v4948_v40, %s3760_s9  ;;  %v4997_v23 = vpop.permute.xlu0 %1586 }
  0xef   :  { %1764 = vrot.lane.b32.xlu2 %v4950_v49, %s3760_s9  ;;  %7206 = vst [vmem:[#allocation72_spill] sm:$0xff] %v4997_v23  ;;  %v5140_v23 = vld [vmem:[%s7020_s0 + $0xb4] sm:$0xff] }
  0xf0   :  { %7223 = vst [vmem:[#allocation89_spill] sm:$0xff] %v5140_v23 }
  0xf6   :  { %1774 = vrot.lane.b32.xlu1 %v4976_v32, %s3761_s17  ;;  %1760 = vrot.lane.b32.xlu0 %v4971_v6, %s3760_s9 }
  0xf7   :  { %1776 = vrot.lane.b32.xlu2 %v4985_v27, %s3761_s17  ;;  %v5004_v59 = vpop.permute.xlu1 %1594 }
  0xf8   :  { %v4993_v12 = vpop.permute.xlu2 %1704  ;;  %7207 = vst [vmem:[#allocation73_spill] sm:$0xff] %v5004_v59  ;;  %v5167_v59 = vld [vmem:[%s7020_s0 + $0xf0] sm:$0xff] }
  0xfc   :  { %v5034_v21 = vpop.permute.xlu0 %1592 }
  0xfd   :  { %7211 = vst [vmem:[#allocation77_spill] sm:$0xff] %v5034_v21  ;;  %v5192_v21 = vld [vmem:[%s7020_s0 + $0x114] sm:$0xff] }
  0xfe   :  { %1780 = vrot.lane.b32.xlu1 %v5002_v52, %s3761_s17  ;;  %1766 = vrot.lane.b32.xlu0 %v4995_v1, %s3760_s9  ;;  %v5157_v1 = vld [vmem:[%s7020_s0 + $0x120] sm:$0xff] }
  0xff   :  { %1782 = vrot.lane.b32.xlu2 %v5009_v4, %s3761_s17  ;;  %7226 = vst [vmem:[#allocation92_spill] sm:$0xff] %v5157_v1 }
 0x101   :  { %v5017_v24 = vpop.permute.xlu2 %1710 }
 0x102   :  { %7209 = vst [vmem:[#allocation75_spill] sm:$0xff] %v5017_v24 }
 0x105   :  { %v5038_v14 = vpop.permute.xlu1 %1600 }
 0x106   :  { %1786 = vrot.lane.b32.xlu1 %v5022_v8, %s3761_s17  ;;  %7212 = vst [vmem:[#allocation78_spill] sm:$0xff] %v5038_v14  ;;  %1778 = vrot.lane.b32.xlu0 %v5032_v56, %s3761_s17 }
 0x107   :  { %1788 = vrot.lane.b32.xlu2 %v5027_v60, %s3761_s17 }
 0x109   :  { %v5044_v2 = vpop.permute.xlu2 %1716 }
 0x10a   :  { %7213 = vst [vmem:[#allocation79_spill] sm:$0xff] %v5044_v2  ;;  %v5065_v33 = vpop.permute.xlu0 %1598  ;;  %v5187_v2 = vld [vmem:[%s7020_s0 + $0x150] sm:$0xff] }
 0x10b   :  { %7215 = vst [vmem:[#allocation81_spill] sm:$0xff] %v5065_v33  ;;  %v5135_v33 = vld [vmem:[%s7020_s0 + $0x108] sm:$0xff] }
 0x10e   :  { %1792 = vrot.lane.b32.xlu1 %v5049_v58, %s3761_s17  ;;  %1784 = vrot.lane.b32.xlu0 %v5059_v54, %s3761_s17 }
 0x10f   :  { %1794 = vrot.lane.b32.xlu2 %v5054_v34, %s3761_s17 }
 0x110   :  { %v5069_v51 = vpop.permute.xlu1 %1606 }
 0x111   :  { %7216 = vst [vmem:[#allocation82_spill] sm:$0xff] %v5069_v51  ;;  %v5071_v3 = vpop.permute.xlu2 %1722  ;;  %v5103_v51 = vld [vmem:[%s7020_s0 + $0xc0] sm:$0xff] }
 0x112   :  { %7219 = vst [vmem:[#allocation85_spill] sm:$0xff] %v5103_v51 }
 0x116   :  { %1798 = vrot.lane.b32.xlu1 %v5076_v63, %s3761_s17  ;;  %1790 = vrot.lane.b32.xlu0 %v5086_v42, %s3761_s17 }
 0x117   :  { %1800 = vrot.lane.b32.xlu2 %v5081_v16, %s3761_s17 }
 0x118   :  { %v5094_v37 = vpop.permute.xlu1 %1708  ;;  %v5096_v50 = vpop.permute.xlu0 %1604 }
 0x119   :  { %7217 = vst [vmem:[#allocation83_spill] sm:$0xff] %v5096_v50  ;;  %v5098_v43 = vpop.permute.xlu2 %1728 }
 0x11a   :  { %7218 = vst [vmem:[#allocation84_spill] sm:$0xff] %v5098_v43 }
 0x11e   :  { %1804 = vrot.lane.b32.xlu1 %v5103_v51, %s3761_s17  ;;  %1796 = vrot.lane.b32.xlu0 %v5113_v19, %s3761_s17 }
 0x11f   :  { %1806 = vrot.lane.b32.xlu2 %v5108_v29, %s3761_s17  ;;  %v7259_v29 = vld [vmem:[#allocation11_spill] sm:$0xff] }
 0x120   :  { %v5121_v50 = vpop.permute.xlu1 %1714  ;;  %v5123_v14 = vpop.permute.xlu0 %1706 }
 0x121   :  { %7221 = vst [vmem:[#allocation87_spill] sm:$0xff] %v5121_v50  ;;  %v5125_v45 = vpop.permute.xlu2 %1734  ;;  %v3656_v50 = vld [vmem:[%s7020_s0 + $0x180] sm:$0xff] }
 0x122   :  { %7222 = vst [vmem:[#allocation88_spill] sm:$0xff] %v5125_v45 }
 0x126   :  { %1810 = vrot.lane.b32.xlu1 %v5130_v62, %s3761_s17  ;;  %1802 = vrot.lane.b32.xlu0 %v5140_v23, %s3761_s17 }
 0x127   :  { %1812 = vrot.lane.b32.xlu2 %v5135_v33, %s3761_s17 }
 0x128   :  { %v5148_v45 = vpop.permute.xlu1 %1720  ;;  %v5150_v22 = vpop.permute.xlu0 %1712 }
 0x129   :  { %7224 = vst [vmem:[#allocation90_spill] sm:$0xff] %v5150_v22  ;;  %v5152_v18 = vpop.permute.xlu2 %1740 }
 0x12a   :  { %7225 = vst [vmem:[#allocation91_spill] sm:$0xff] %v5152_v18 }
 0x12e   :  { %1816 = vrot.lane.b32.xlu1 %v5157_v1, %s3761_s17  ;;  %1808 = vrot.lane.b32.xlu0 %v5167_v59, %s3761_s17 }
 0x12f   :  { %1818 = vrot.lane.b32.xlu2 %v5162_v36, %s3761_s17  ;;  %v5208_v36 = vld [vmem:[%s7020_s0 + $0x168] sm:$0xff] }
 0x130   :  { %v5175_v49 = vpop.permute.xlu1 %1726  ;;  %v5177_v46 = vpop.permute.xlu0 %1718  ;;  %7234 = vst [vmem:[#allocation100_spill] sm:$0xff] %v5208_v36 }
 0x131   :  { %7228 = vst [vmem:[#allocation94_spill] sm:$0xff] %v5175_v49  ;;  %v5179_v43 = vpop.permute.xlu2 %1746  ;;  %v7251_v49 = vld [vmem:[#allocation8_spill] sm:$0xff] }
 0x132   :  { %7229 = vst [vmem:[#allocation95_spill] sm:$0xff] %v5177_v46 }
 0x133   :  { %7230 = vst [vmem:[#allocation96_spill] sm:$0xff] %v5179_v43 }
 0x136   :  { %1822 = vrot.lane.b32.xlu1 %v3651_v15, %s3761_s17  ;;  %1814 = vrot.lane.b32.xlu0 %v5192_v21, %s3761_s17  ;;  %v5213_v15 = vld [vmem:[%s7020_s0 + $0x174] sm:$0xff] }
 0x137   :  { %1824 = vrot.lane.b32.xlu2 %v5187_v2, %s3761_s17  ;;  %7235 = vst [vmem:[#allocation101_spill] sm:$0xff] %v5213_v15 }
 0x138   :  { %v5199_v43 = vpop.permute.xlu1 %1732  ;;  %v5201_v46 = vpop.permute.xlu0 %1724 }
 0x139   :  { %7231 = vst [vmem:[#allocation97_spill] sm:$0xff] %v5199_v43  ;;  %v5203_v25 = vpop.permute.xlu2 %1752 }
 0x13a   :  { %7232 = vst [vmem:[#allocation98_spill] sm:$0xff] %v5201_v46 }
 0x13b   :  { %7233 = vst [vmem:[#allocation99_spill] sm:$0xff] %v5203_v25 }
 0x13e   :  { %1828 = vrot.lane.b32.xlu1 %v5208_v36, %s3761_s17  ;;  %1820 = vrot.lane.b32.xlu0 %v5218_v30, %s3761_s17  ;;  %v5241_v30 = vld [vmem:[%s7020_s0 + $0x15c] sm:$0xff] }
 0x13f   :  { %1830 = vrot.lane.b32.xlu2 %v5213_v15, %s3761_s17  ;;  %7240 = vst [vmem:[#allocation106_spill] sm:$0xff] %v5241_v30 }
 0x140   :  { %v5226_v43 = vpop.permute.xlu1 %1738  ;;  %v5228_v25 = vpop.permute.xlu0 %1730 }
 0x141   :  { %7237 = vst [vmem:[#allocation103_spill] sm:$0xff] %v5226_v43  ;;  %v5230_v18 = vpop.permute.xlu2 %1758  ;;  %v7258_v43 = vld [vmem:[#allocation5_spill] sm:$0xff] }
 0x142   :  { %7238 = vst [vmem:[#allocation104_spill] sm:$0xff] %v5228_v25 }
 0x143   :  { %7239 = vst [vmem:[#allocation105_spill] sm:$0xff] %v5230_v18 }
 0x146   :  { %1834 = vrot.lane.b32.xlu1 %v3657_v10, %s3761_s17  ;;  %1826 = vrot.lane.b32.xlu0 %v5241_v30, %s3761_s17 }
 0x147   :  { %1836 = vrot.lane.b32.xlu2 %v3658_v0, %s3761_s17 }
 0x148   :  { %v5247_v18 = vpop.permute.xlu1 %1744  ;;  %v5249_v25 = vpop.permute.xlu0 %1736 }
 0x149   :  { %7241 = vst [vmem:[#allocation107_spill] sm:$0xff] %v5247_v18  ;;  %v5251_v15 = vpop.permute.xlu2 %1764 }
 0x14a   :  { %7242 = vst [vmem:[#allocation108_spill] sm:$0xff] %v5249_v25 }
 0x14b   :  { %7243 = vst [vmem:[#allocation109_spill] sm:$0xff] %v5251_v15 }
 0x14e   :  { %1846 = vrot.lane.b32.xlu1 %v3849_v9, %s3762_s26  ;;  %1832 = vrot.lane.b32.xlu0 %v3656_v50, %s3761_s17 }
 0x14f   :  { %1848 = vrot.lane.b32.xlu2 %v3895_v13, %s3762_s26 }
 0x150   :  { %v5261_v10 = vpop.permute.xlu1 %1750  ;;  %v5263_v0 = vpop.permute.xlu0 %1742 }
 0x151   :  { %7244 = vst [vmem:[#allocation110_spill] sm:$0xff] %v5261_v10  ;;  %v5265_v18 = vpop.permute.xlu2 %1776  ;;  %v7249_v10 = vld [vmem:[#allocation4_spill] sm:$0xff] }
 0x152   :  { %7245 = vst [vmem:[#allocation111_spill] sm:$0xff] %v5263_v0  ;;  %v7250_v0 = vld [vmem:[#allocation3_spill] sm:$0xff] }
 0x156   :  { %1852 = vrot.lane.b32.xlu1 %v3880_v57, %s3762_s26  ;;  %1844 = vrot.lane.b32.xlu0 %v3912_v41, %s3762_s26 }
 0x157   :  { %1854 = vrot.lane.b32.xlu2 %v3963_v48, %s3762_s26 }
 0x158   :  { %v5273_v15 = vpop.permute.xlu1 %1756  ;;  %v5275_v50 = vpop.permute.xlu0 %1748 }
 0x159   :  { %7246 = vst [vmem:[#allocation112_spill] sm:$0xff] %v5273_v15  ;;  %v5277_v51 = vpop.permute.xlu2 %1782  ;;  %v5299_v15 = vld [vmem:[%s7020_s0 + $0xc4] sm:$0xf] }
 0x15a   :  { %7247 = vst [vmem:[#allocation113_spill] sm:$0xff] %v5275_v50  ;;  %v5294_v50 = vld [vmem:[%s7020_s0 + $0xc0] sm:$0xf] }
 0x15b   :  { %7248 = vst [vmem:[#allocation114_spill] sm:$0xff] %v5277_v51  ;;  %v1217_v7 = vshrl.u32 %v5294_v50, 16  ;;  %v1220_v36 = vshll.u32 %v5294_v50, 16 }
 0x15c   :  { %7255 = vst [vmem:[#allocation116_spill] sm:$0xff] %v5294_v50 }
 0x15d   :  { %7256 = vst [vmem:[#allocation117_spill] sm:$0xff] %v5299_v15  ;;  %v1219_v51 = vrot.slane %v1217_v7, 4  ;;  %v1222_v22 = vrot.slane %v1220_v36, 5  ;;  %v7264_v7 = vld [vmem:[#allocation7_spill] sm:$0xff]  ;;  %v7265_v36 = vld [vmem:[#allocation13_spill] sm:$0xff] }
 0x15e   :  { %1858 = vrot.lane.b32.xlu1 %v7249_v10, %s3762_s26  ;;  %1850 = vrot.lane.b32.xlu0 %v7250_v0, %s3762_s26 }
 0x15f   :  { %1860 = vrot.lane.b32.xlu2 %v7251_v49, %s3762_s26  ;;  %v1223_v30 = vor.u32 %v1222_v22, %v1219_v51 }
 0x160   :  { %v5285_v6 = vpop.permute.xlu1 %1762  ;;  %v5287_v41 = vpop.permute.xlu0 %1754 }
 0x161   :  { %7252 = vst [vmem:[#allocation4_spill] sm:$0xff] %v5285_v6  ;;  %v5289_v1 = vpop.permute.xlu2 %1788  ;;  %v1226_v6 = vshll.u32 %v5299_v15, 16 }
 0x162   :  { %7253 = vst [vmem:[#allocation3_spill] sm:$0xff] %v5287_v41  ;;  %v1230_v41 = vshrl.u32 %v5299_v15, 16  ;;  %v5320_v15 = vld [vmem:[%s7020_s0 + $0xc8] sm:$0x1] }
 0x163   :  { %7254 = vst [vmem:[#allocation115_spill] sm:$0xff] %v5289_v1  ;;  %v7257_v1 = vld [vmem:[#allocation6_spill] sm:$0xff]  ;;  %v1228_v46 = vrot.slane %v1226_v6, 5  ;;  %v1236_v25 = vshll.u32 %v5320_v15, 16 }
 0x164   :  { %v1232_v23 = vrot.slane %v1230_v41, 4  ;;  %7262 = vst [vmem:[#allocation11_spill] sm:$0xff] %v5320_v15  ;;  %v1224_v41 = vrot.slane %v1223_v30, 4  ;;  %v7269_v15 = vld [vmem:[#allocation12_spill] sm:$0xff] }
 0x165   :  { %v7271_v30 = vld [vmem:[#allocation16_spill] sm:$0xff] }
 0x166   :  { %1864 = vrot.lane.b32.xlu1 %v7257_v1, %s3762_s26  ;;  %1856 = vrot.lane.b32.xlu0 %v7258_v43, %s3762_s26  ;;  %v1233_v47 = vor.u32 %v1232_v23, %v1228_v46  ;;  %v1229_v23 = vsel %vm3813_vm2, %v1224_v41, %v1228_v46 }
 0x167   :  { %1866 = vrot.lane.b32.xlu2 %v7259_v29, %s3762_s26 }
 0x168   :  { %v5311_v49 = vpop.permute.xlu1 %1774  ;;  %v5313_v50 = vpop.permute.xlu0 %1760 }
 0x169   :  { %7260 = vst [vmem:[#allocation6_spill] sm:$0xff] %v5313_v50  ;;  %v5315_v20 = vpop.permute.xlu2 %1794  ;;  %v1234_v50 = vrot.slane %v1233_v47, 4  ;;  %v1838_v47 = vunpack.c.l.b16 %v1229_v23 }
 0x16a   :  { %7261 = vst [vmem:[#allocation5_spill] sm:$0xff] %v5315_v20  ;;  %v1238_v20 = vrot.slane %v1236_v25, 5 }
 0x16c   :  { %v1239_v51 = vsel %vm3813_vm2, %v1234_v50, %v1238_v20  ;;  %v7275_v20 = vld [vmem:[#allocation14_spill] sm:$0xff] }
 0x16d   :  { %v1839_v25 = vunpack.c.l.b16 %v1239_v51  ;;  %v7279_v51 = vld [vmem:[#allocation17_spill] sm:$0xff] }
 0x16e   :  { %1870 = vrot.lane.b32.xlu1 %v7263_v31, %s3762_s26  ;;  %1862 = vrot.lane.b32.xlu0 %v7264_v7, %s3762_s26 }
 0x16f   :  { %1872 = vrot.lane.b32.xlu2 %v7265_v36, %s3762_s26  ;;  %v7270_v36 = vld [vmem:[#allocation10_spill] sm:$0xff]  ;;  %v5351_v46 = vpack.c.b16 %v1839_v25, %v1838_v47  ;;  %v7280_v47 = vld [vmem:[#allocation15_spill] sm:$0xff] }
 0x170   :  { %v5329_v6 = vpop.permute.xlu1 %1780  ;;  %v5331_v24 = vpop.permute.xlu0 %1766  ;;  %v7281_v25 = vld [vmem:[#allocation22_spill] sm:$0xff] }
 0x171   :  { %7266 = vst [vmem:[#allocation9_spill] sm:$0xff] %v5329_v6  ;;  %v5333_v22 = vpop.permute.xlu2 %1800 }
 0x172   :  { %7267 = vst [vmem:[#allocation7_spill] sm:$0xff] %v5331_v24 }
 0x173   :  { %7268 = vst [vmem:[#allocation118_spill] sm:$0xff] %v5333_v22 }
 0x174   :  { %7274 = vst [vmem:[#allocation16_spill] sm:$0xff] %v5351_v46 }
 0x176   :  { %1876 = vrot.lane.b32.xlu1 %v7269_v15, %s3762_s26  ;;  %1868 = vrot.lane.b32.xlu0 %v7270_v36, %s3762_s26  ;;  %v7276_v15 = vld [vmem:[#allocation19_spill] sm:$0xff] }
 0x177   :  { %1878 = vrot.lane.b32.xlu2 %v7271_v30, %s3762_s26 }
 0x178   :  { %v5345_v24 = vpop.permute.xlu1 %1786  ;;  %v5347_v22 = vpop.permute.xlu0 %1778 }
 0x179   :  { %7272 = vst [vmem:[#allocation12_spill] sm:$0xff] %v5345_v24  ;;  %v5349_v6 = vpop.permute.xlu2 %1806 }
 0x17a   :  { %7273 = vst [vmem:[#allocation10_spill] sm:$0xff] %v5349_v6  ;;  %v7284_v6 = vld [vmem:[#allocation20_spill] sm:$0xff] }
 0x17e   :  { %1882 = vrot.lane.b32.xlu1 %v7275_v20, %s3762_s26  ;;  %1874 = vrot.lane.b32.xlu0 %v5351_v46, %s3762_s26 }
 0x17f   :  { %1884 = vrot.lane.b32.xlu2 %v7276_v15, %s3762_s26 }
 0x180   :  { %v5359_v50 = vpop.permute.xlu1 %1792  ;;  %v5361_v41 = vpop.permute.xlu0 %1784 }
 0x181   :  { %7277 = vst [vmem:[#allocation14_spill] sm:$0xff] %v5361_v41  ;;  %v5363_v23 = vpop.permute.xlu2 %1812 }
 0x182   :  { %7278 = vst [vmem:[#allocation119_spill] sm:$0xff] %v5363_v23  ;;  %v7285_v23 = vld [vmem:[#allocation18_spill] sm:$0xff] }
 0x186   :  { %1888 = vrot.lane.b32.xlu1 %v7279_v51, %s3762_s26  ;;  %1880 = vrot.lane.b32.xlu0 %v7280_v47, %s3762_s26  ;;  %v7286_v51 = vld [vmem:[#allocation34_spill] sm:$0xff] }
 0x187   :  { %1890 = vrot.lane.b32.xlu2 %v7281_v25, %s3762_s26 }
 0x188   :  { %v5371_v24 = vpop.permute.xlu1 %1798  ;;  %v5373_v26 = vpop.permute.xlu0 %1790 }
 0x189   :  { %7282 = vst [vmem:[#allocation15_spill] sm:$0xff] %v5371_v24  ;;  %v5375_v46 = vpop.permute.xlu2 %1818  ;;  %v7291_v24 = vld [vmem:[#allocation30_spill] sm:$0xff] }
 0x18a   :  { %7283 = vst [vmem:[#allocation120_spill] sm:$0xff] %v5375_v46  ;;  %v7290_v46 = vld [vmem:[#allocation21_spill] sm:$0xff] }
 0x18e   :  { %1894 = vrot.lane.b32.xlu1 %v7284_v6, %s3762_s26  ;;  %1886 = vrot.lane.b32.xlu0 %v7285_v23, %s3762_s26 }
 0x18f   :  { %1914 = vrot.lane.b32.xlu2 %v7286_v51, %s3763_s4 }
 0x190   :  { %v5383_v41 = vpop.permute.xlu1 %1804  ;;  %v5385_v15 = vpop.permute.xlu0 %1796 }
 0x191   :  { %7287 = vst [vmem:[#allocation20_spill] sm:$0xff] %v5383_v41  ;;  %v5387_v25 = vpop.permute.xlu2 %1824 }
 0x192   :  { %7288 = vst [vmem:[#allocation34_spill] sm:$0xff] %v5385_v15 }
 0x193   :  { %7289 = vst [vmem:[#allocation121_spill] sm:$0xff] %v5387_v25 }
 0x196   :  { %2054 = vrot.lane.b32.xlu1 %v3849_v9, %s3764_s5  ;;  %1892 = vrot.lane.b32.xlu0 %v7290_v46, %s3762_s26 }
 0x197   :  { %2124 = vrot.lane.b32.xlu2 %v7291_v24, %s3765_s6 }
 0x198   :  { %v5395_v23 = vpop.permute.xlu1 %1810  ;;  %v5397_v51 = vpop.permute.xlu0 %1802 }
 0x199   :  { %7292 = vst [vmem:[#allocation30_spill] sm:$0xff] %v5395_v23  ;;  %v5399_v41 = vpop.permute.xlu2 %1830 }
 0x19a   :  { %7293 = vst [vmem:[#allocation122_spill] sm:$0xff] %v5397_v51  ;;  %v7298_v51 = vld [vmem:[#allocation32_spill] sm:$0xff] }
 0x19b   :  { %7294 = vst [vmem:[#allocation123_spill] sm:$0xff] %v5399_v41  ;;  %v7299_v41 = vld [vmem:[#allocation27_spill] sm:$0xff] }
 0x19e   :  { %1916 = vrot.lane.b32.xlu1 %v7291_v24, %s3763_s4  ;;  %1984 = vrot.lane.b32.xlu0 %v4985_v27, %s3766_s7  ;;  %v7300_v24 = vld [vmem:[#allocation24_spill] sm:$0xff] }
 0x19f   :  { %1986 = vrot.lane.b32.xlu2 %v5032_v56, %s3766_s7 }
 0x1a0   :  { %v5407_v9 = vpop.permute.xlu1 %1816  ;;  %v5409_v46 = vpop.permute.xlu0 %1808 }
 0x1a1   :  { %7295 = vst [vmem:[#allocation124_spill] sm:$0xff] %v5407_v9  ;;  %v5411_v25 = vpop.permute.xlu2 %1836 }
 0x1a2   :  { %7296 = vst [vmem:[#allocation125_spill] sm:$0xff] %v5409_v46 }
 0x1a3   :  { %7297 = vst [vmem:[#allocation126_spill] sm:$0xff] %v5411_v25  ;;  %v7303_v25 = vld [vmem:[#allocation41_spill] sm:$0xff] }
 0x1a6   :  { %2126 = vrot.lane.b32.xlu1 %v7298_v51, %s3765_s6  ;;  %1896 = vrot.lane.b32.xlu0 %v7299_v41, %s3762_s26 }
 0x1a7   :  { %1898 = vrot.lane.b32.xlu2 %v7300_v24, %s3762_s26 }
 0x1a8   :  { %v5419_v23 = vpop.permute.xlu1 %1822  ;;  %v5421_v15 = vpop.permute.xlu0 %1814 }
 0x1a9   :  { %7301 = vst [vmem:[#allocation32_spill] sm:$0xff] %v5419_v23  ;;  %v5423_v56 = vpop.permute.xlu2 %1848 }
 0x1aa   :  { %7302 = vst [vmem:[#allocation27_spill] sm:$0xff] %v5421_v15  ;;  %v7307_v15 = vld [vmem:[#allocation23_spill] sm:$0xff] }
 0x1ae   :  { %1918 = vrot.lane.b32.xlu1 %v7298_v51, %s3763_s4  ;;  %2056 = vrot.lane.b32.xlu0 %v3895_v13, %s3764_s5 }
 0x1af   :  { %1930 = vrot.lane.b32.xlu2 %v7303_v25, %s3763_s4 }
 0x1b0   :  { %v5431_v9 = vpop.permute.xlu1 %1828  ;;  %v5433_v46 = vpop.permute.xlu0 %1820 }
 0x1b1   :  { %7304 = vst [vmem:[#allocation41_spill] sm:$0xff] %v5431_v9  ;;  %v5435_v24 = vpop.permute.xlu2 %1854  ;;  %v7310_v9 = vld [vmem:[#allocation40_spill] sm:$0xff] }
 0x1b2   :  { %7305 = vst [vmem:[#allocation127_spill] sm:$0xff] %v5433_v46 }
 0x1b3   :  { %7306 = vst [vmem:[#allocation128_spill] sm:$0xff] %v5435_v24 }
 0x1b6   :  { %2000 = vrot.lane.b32.xlu1 %v5049_v58, %s3766_s7  ;;  %1900 = vrot.lane.b32.xlu0 %v7307_v15, %s3762_s26 }
 0x1b7   :  { %2058 = vrot.lane.b32.xlu2 %v7250_v0, %s3764_s5 }
 0x1b8   :  { %v5443_v51 = vpop.permute.xlu1 %1834  ;;  %v5445_v13 = vpop.permute.xlu0 %1826 }
 0x1b9   :  { %7308 = vst [vmem:[#allocation129_spill] sm:$0xff] %v5443_v51  ;;  %v5447_v23 = vpop.permute.xlu2 %1860 }
 0x1ba   :  { %7309 = vst [vmem:[#allocation130_spill] sm:$0xff] %v5445_v13 }
 0x1be   :  { %2128 = vrot.lane.b32.xlu1 %v7310_v9, %s3765_s6  ;;  %1988 = vrot.lane.b32.xlu0 %v5002_v52, %s3766_s7 }
 0x1bf   :  { %2140 = vrot.lane.b32.xlu2 %v4732_v17, %s3765_s6 }
 0x1c0   :  { %v5455_v46 = vpop.permute.xlu1 %1846  ;;  %v5457_v15 = vpop.permute.xlu0 %1832 }
 0x1c1   :  { %7311 = vst [vmem:[#allocation40_spill] sm:$0xff] %v5457_v15  ;;  %v5459_v0 = vpop.permute.xlu2 %1866 }
 0x1c2   :  { %7312 = vst [vmem:[#allocation131_spill] sm:$0xff] %v5459_v0 }
 0x1c6   :  { %1932 = vrot.lane.b32.xlu1 %v4732_v17, %s3763_s4  ;;  %2070 = vrot.lane.b32.xlu0 %v7264_v7, %s3764_s5 }
 0x1c7   :  { %1990 = vrot.lane.b32.xlu2 %v5009_v4, %s3766_s7 }
 0x1c8   :  { %v5467_v51 = vpop.permute.xlu1 %1852  ;;  %v5469_v13 = vpop.permute.xlu0 %1844 }
 0x1c9   :  { %v5471_v24 = vpop.permute.xlu2 %1872 }
 0x1ca   :  { %7313 = vst [vmem:[#allocation132_spill] sm:$0xff] %v5471_v24  ;;  %v7317_v24 = vld [vmem:[#allocation35_spill] sm:$0xff] }
 0x1ce   :  { %2060 = vrot.lane.b32.xlu1 %v3880_v57, %s3764_s5  ;;  %1920 = vrot.lane.b32.xlu0 %v7310_v9, %s3763_s4 }
 0x1cf   :  { %2072 = vrot.lane.b32.xlu2 %v7257_v1, %s3764_s5 }
 0x1d0   :  { %v5479_v17 = vpop.permute.xlu1 %1858  ;;  %v5481_v7 = vpop.permute.xlu0 %1850 }
 0x1d1   :  { %7314 = vst [vmem:[#allocation133_spill] sm:$0xff] %v5479_v17  ;;  %v5483_v15 = vpop.permute.xlu2 %1878 }
 0x1d6   :  { %2142 = vrot.lane.b32.xlu1 %v4679_v11, %s3765_s6  ;;  %2002 = vrot.lane.b32.xlu0 %v5054_v34, %s3766_s7 }
 0x1d7   :  { %1946 = vrot.lane.b32.xlu2 %v4794_v55, %s3763_s4 }
 0x1d8   :  { %v5491_v57 = vpop.permute.xlu1 %1864  ;;  %v5493_v9 = vpop.permute.xlu0 %1856 }
 0x1d9   :  { %7315 = vst [vmem:[#allocation134_spill] sm:$0xff] %v5493_v9  ;;  %v5495_v1 = vpop.permute.xlu2 %1884  ;;  %v2744_v9 = vld [vmem:[%s7021_s1 + $0x10] sm:$0x3] }
 0x1da   :  { %7316 = vst [vmem:[#allocation135_spill] sm:$0xff] %v5495_v1  ;;  %v2754_v1 = vunpack.c.l.b16 %v2744_v9  ;;  %v3661_v9 = vld [vmem:[%s7021_s1 + $0x8] sm:$0xff] }
 0x1de   :  { %2086 = vrot.lane.b32.xlu1 %v7271_v30, %s3764_s5  ;;  %2130 = vrot.lane.b32.xlu0 %v7317_v24, %s3765_s6  ;;  %v2757_v30 = vpack.c.b16 %v2754_v1, %v2754_v1 }
 0x1df   :  { %2156 = vrot.lane.b32.xlu2 %v4802_v39, %s3765_s6 }
 0x1e0   :  { %v5503_v17 = vpop.permute.xlu1 %1870  ;;  %v5505_v0 = vpop.permute.xlu0 %1862  ;;  %v2827_v34 = vsel %vm2825_vm6, %v2757_v30, 0  ;;  %v7322_v30 = vld [vmem:[#allocation37_spill] sm:$0xff] }
 0x1e1   :  { %7318 = vst [vmem:[#allocation35_spill] sm:$0xff] %v5503_v17  ;;  %v5507_v55 = vpop.permute.xlu2 %1890  ;;  %2834 = vmatpush.bf16.msra.mxu0 %v2827_v34  ;;  %3662 = vmatpush.bf16.msra.mxu1 %v2827_v34 }
 0x1e2   :  { %7319 = vst [vmem:[#allocation136_spill] sm:$0xff] %v5507_v55  ;;  %3663 = vmatpush.bf16.msra.mxu2 %v2827_v34  ;;  %3664 = vmatpush.bf16.msra.mxu3 %v2827_v34 }
 0x1e5   :  { %2835 = vmatpush.bf16.msra.mxu0 %v3661_v9  ;;  %3665 = vmatpush.bf16.msra.mxu1 %v3661_v9 }
 0x1e6   :  { %1934 = vrot.lane.b32.xlu1 %v4679_v11, %s3763_s4  ;;  %2016 = vrot.lane.b32.xlu0 %v5167_v59, %s3766_s7 }
 0x1e7   :  { %1992 = vrot.lane.b32.xlu2 %v5059_v54, %s3766_s7  ;;  %v3660_v54 = vld [vmem:[%s7021_s1] sm:$0xff]  ;;  %3666 = vmatpush.bf16.msra.mxu2 %v3661_v9 }
 0x1e8   :  { %v5518_v17 = vpop.permute.xlu1 %1876  ;;  %v5520_v4 = vpop.permute.xlu0 %1868  ;;  %3667 = vmatpush.bf16.msra.mxu3 %v3661_v9 }
 0x1e9   :  { %v1915_v55 = vpop.permute.xlu2 %1914  ;;  %2836 = vmatpush.bf16.msra.mxu0 %v3660_v54  ;;  %3668 = vmatpush.bf16.msra.mxu1 %v3660_v54 }
 0x1eb   :  { %3669 = vmatpush.bf16.msra.mxu2 %v3660_v54 }
 0x1ec   :  { %3670 = vmatpush.bf16.msra.mxu3 %v3660_v54 }
 0x1ee   :  { %2062 = vrot.lane.b32.xlu1 %v3963_v48, %s3764_s5  ;;  %1922 = vrot.lane.b32.xlu0 %v7317_v24, %s3763_s4 }
 0x1ef   :  { %2074 = vrot.lane.b32.xlu2 %v7259_v29, %s3764_s5 }
 0x1f0   :  { %v5531_v11 = vpop.permute.xlu1 %1882  ;;  %v5536_v1 = vpop.permute.xlu0 %1874 }
 0x1f1   :  { %7320 = vst [vmem:[#allocation137_spill] sm:$0xff] %v5536_v1  ;;  %v2125_v34 = vpop.permute.xlu2 %2124 }
 0x1f6   :  { %2144 = vrot.lane.b32.xlu1 %v4696_v53, %s3765_s6  ;;  %2004 = vrot.lane.b32.xlu0 %v5113_v19, %s3766_s7 }
 0x1f7   :  { %1948 = vrot.lane.b32.xlu2 %v4802_v39, %s3763_s4 }
 0x1f8   :  { %v5544_v48 = vpop.permute.xlu1 %1888  ;;  %v5546_v29 = vpop.permute.xlu0 %1880 }
 0x1f9   :  { %7321 = vst [vmem:[#allocation138_spill] sm:$0xff] %v5544_v48  ;;  %v1987_v24 = vpop.permute.xlu2 %1986 }
 0x1fe   :  { %2088 = vrot.lane.b32.xlu1 %v7280_v47, %s3764_s5  ;;  %2132 = vrot.lane.b32.xlu0 %v7322_v30, %s3765_s6  ;;  %v3624_v47 = vld [vmem:[%s7020_s0] sm:$0xff] }
 0x1ff   :  { %2158 = vrot.lane.b32.xlu2 %v4871_v61, %s3765_s6 }
 0x200   :  { %v5554_v9 = vpop.permute.xlu1 %1894  ;;  %v5556_v19 = vpop.permute.xlu0 %1886 }
 0x201   :  { %v5558_v54 = vpop.permute.xlu2 %1898 }
 0x202   :  { %7323 = vst [vmem:[#allocation37_spill] sm:$0xff] %v5558_v54  ;;  %v7324_v54 = vld [vmem:[#allocation42_spill] sm:$0xff] }
 0x206   :  { %1936 = vrot.lane.b32.xlu1 %v4696_v53, %s3763_s4  ;;  %2018 = vrot.lane.b32.xlu0 %v5130_v62, %s3766_s7  ;;  %v2191_v53 = vsel %vm2188_vm7, %v3624_v47, %v7324_v54 }
 0x207   :  { %1994 = vrot.lane.b32.xlu2 %v5022_v8, %s3766_s7  ;;  %v2287_v62 = vsel %vm2285_vm8, %v2191_v53, %v4993_v12 }
 0x208   :  { %v2055_v39 = vpop.permute.xlu1 %2054  ;;  %v5569_v48 = vpop.permute.xlu0 %1892  ;;  %v2352_v8 = vsel %vm2350_vm9, %v2287_v62, %v5311_v49 }
 0x209   :  { %v5571_v1 = vpop.permute.xlu2 %1930  ;;  %v2417_v54 = vsel %vm2415_vm11, %v2352_v8, %v5469_v13 }
 0x20a   :  { %v2482_v47 = vsel %vm2480_vm10, %v2417_v54, %v1915_v55 }
 0x20e   :  { %2064 = vrot.lane.b32.xlu1 %v7258_v43, %s3764_s5  ;;  %1924 = vrot.lane.b32.xlu0 %v7322_v30, %s3763_s4 }
 0x20f   :  { %2076 = vrot.lane.b32.xlu2 %v7270_v36, %s3764_s5 }
 0x210   :  { %v1917_v12 = vpop.permute.xlu1 %1916  ;;  %v1985_v53 = vpop.permute.xlu0 %1984 }
 0x211   :  { %v2059_v43 = vpop.permute.xlu2 %2058  ;;  %v2547_v49 = vsel %vm2545_vm12, %v2482_v47, %v1985_v53 }
 0x212   :  { %v2612_v62 = vsel %vm2610_vm13, %v2547_v49, %v2055_v39  ;;  %v2194_v39 = vsel %vm2188_vm7, %v4976_v32, %v4728_v5 }
 0x213   :  { %v2677_v30 = vsel %vm2675_vm14, %v2612_v62, %v2125_v34  ;;  %v2289_v34 = vsel %vm2285_vm8, %v2194_v39, %v5123_v14 }
 0x214   :  { %3592 = vmatmul.msk.bf16.vlgmr.msra.gmra.mxu0 %vm2760_vm15, %v2677_v30  ;;  %v2354_v8 = vsel %vm2350_vm9, %v2289_v34, %v5265_v18 }
 0x216   :  { %2146 = vrot.lane.b32.xlu1 %v4779_v35, %s3765_s6  ;;  %2006 = vrot.lane.b32.xlu0 %v5076_v63, %s3766_s7  ;;  %v2419_v63 = vsel %vm2415_vm11, %v2354_v8, %v5455_v46 }
 0x217   :  { %1950 = vrot.lane.b32.xlu2 %v4871_v61, %s3763_s4  ;;  %v2484_v54 = vsel %vm2480_vm10, %v2419_v63, %v1917_v12  ;;  %v7325_v61 = vld [vmem:[#allocation44_spill] sm:$0xff] }
 0x218   :  { %v2127_v36 = vpop.permute.xlu1 %2126  ;;  %v5598_v13 = vpop.permute.xlu0 %1896  ;;  %v2549_v32 = vsel %vm2545_vm12, %v2484_v54, %v1987_v24  ;;  %v7326_v12 = vld [vmem:[#allocation36_spill] sm:$0xff] }
 0x219   :  { %v2141_v55 = vpop.permute.xlu2 %2140  ;;  %v2197_v53 = vsel %vm2188_vm7, %v4985_v27, %v7326_v12  ;;  %v7331_v12 = vld [vmem:[#allocation76_spill] sm:$0xff] }
 0x21a   :  { %v2291_v49 = vsel %vm2285_vm8, %v2197_v53, %v5094_v37 }
 0x21e   :  { %2020 = vrot.lane.b32.xlu1 %v5135_v33, %s3766_s7  ;;  %2134 = vrot.lane.b32.xlu0 %v7325_v61, %s3765_s6 }
 0x21f   :  { %2032 = vrot.lane.b32.xlu2 %v5187_v2, %s3766_s7 }
 0x220   :  { %v1919_v5 = vpop.permute.xlu1 %1918  ;;  %v2057_v14 = vpop.permute.xlu0 %2056 }
 0x221   :  { %v5617_v47 = vpop.permute.xlu2 %1990  ;;  %v2614_v18 = vsel %vm2610_vm13, %v2549_v32, %v2057_v14 }
 0x222   :  { %v2679_v46 = vsel %vm2675_vm14, %v2614_v18, %v2127_v36  ;;  %v2218_v18 = vsel %vm2188_vm7, %v5086_v42, %v4845_v28  ;;  %v7330_v28 = vld [vmem:[#allocation43_spill] sm:$0xff] }
 0x224   :  { %3593 = vmatmul.msk.bf16.gmra.mxu0 %vm2760_vm15, %v2679_v46 }
 0x226   :  { %2102 = vrot.lane.b32.xlu1 %v7284_v6, %s3764_s5  ;;  %1962 = vrot.lane.b32.xlu0 %v4948_v40, %s3763_s4  ;;  %v2356_v6 = vsel %vm2350_vm9, %v2291_v49, %v5347_v22  ;;  %v7327_v22 = vld [vmem:[#allocation33_spill] sm:$0xff] }
 0x227   :  { %2160 = vrot.lane.b32.xlu2 %v4838_v44, %s3765_s6  ;;  %v2421_v62 = vsel %vm2415_vm11, %v2356_v6, %v5423_v56  ;;  %v7332_v6 = vld [vmem:[#allocation75_spill] sm:$0xff] }
 0x228   :  { %v2001_v2 = vpop.permute.xlu1 %2000  ;;  %v5628_v33 = vpop.permute.xlu0 %1900  ;;  %v2486_v27 = vsel %vm2480_vm10, %v2421_v62, %v1919_v5  ;;  %v7333_v62 = vld [vmem:[#allocation9_spill] sm:$0xff] }
 0x229   :  { %v2073_v24 = vpop.permute.xlu2 %2072 }
 0x22e   :  { %1926 = vrot.lane.b32.xlu1 %v7325_v61, %s3763_s4  ;;  %2090 = vrot.lane.b32.xlu0 %v7275_v20, %s3764_s5  ;;  %v2215_v20 = vsel %vm2188_vm7, %v5027_v60, %v7327_v22 }
 0x22f   :  { %1938 = vrot.lane.b32.xlu2 %v4779_v35, %s3763_s4  ;;  %v2303_v35 = vsel %vm2285_vm8, %v2215_v20, %v5148_v45 }
 0x230   :  { %v2129_v30 = vpop.permute.xlu1 %2128  ;;  %v1989_v36 = vpop.permute.xlu0 %1988  ;;  %v2368_v56 = vsel %vm2350_vm9, %v2303_v35, %v5373_v26 }
 0x231   :  { %v5646_v37 = vpop.permute.xlu2 %1946  ;;  %v2551_v39 = vsel %vm2545_vm12, %v2486_v27, %v1989_v36 }
 0x232   :  { %v2616_v34 = vsel %vm2610_vm13, %v2551_v39, %v2059_v43  ;;  %v2433_v43 = vsel %vm2415_vm11, %v2368_v56, %v5447_v23  ;;  %v7328_v23 = vld [vmem:[#allocation38_spill] sm:$0xff]  ;;  %v7334_v39 = vld [vmem:[#allocation19_spill] sm:$0xff]  ;;  %v7336_v56 = vld [vmem:[#allocation108_spill] sm:$0xff] }
 0x233   :  { %v2681_v8 = vsel %vm2675_vm14, %v2616_v34, %v2129_v30  ;;  %v2498_v45 = vsel %vm2480_vm10, %v2433_v43, %v5571_v1  ;;  %v7337_v43 = vld [vmem:[#allocation61_spill] sm:$0xff] }
 0x234   :  { %3594 = vmatmul.msk.bf16.gmra.mxu0 %vm2760_vm15, %v2681_v8  ;;  %v2563_v54 = vsel %vm2545_vm12, %v2498_v45, %v2001_v2  ;;  %v7338_v45 = vld [vmem:[#allocation10_spill] sm:$0xff] }
 0x236   :  { %2008 = vrot.lane.b32.xlu1 %v5081_v16, %s3766_s7  ;;  %2172 = vrot.lane.b32.xlu0 %v4914_v38, %s3765_s6 }
 0x237   :  { %2066 = vrot.lane.b32.xlu2 %v7249_v10, %s3764_s5  ;;  %v7329_v10 = vld [vmem:[#allocation47_spill] sm:$0xff] }
 0x238   :  { %v1933_v63 = vpop.permute.xlu1 %1932  ;;  %v2071_v61 = vpop.permute.xlu0 %2070 }
 0x239   :  { %v2157_v26 = vpop.permute.xlu2 %2156  ;;  %v2628_v5 = vsel %vm2610_vm13, %v2563_v54, %v2071_v61  ;;  %v7339_v54 = vld [vmem:[#allocation106_spill] sm:$0xff] }
 0x23a   :  { %v2693_v16 = vsel %vm2675_vm14, %v2628_v5, %v2141_v55  ;;  %v2305_v55 = vsel %vm2285_vm8, %v2218_v18, %v5071_v3  ;;  %v2200_v3 = vsel %vm2188_vm7, %v7331_v12, %v7330_v28  ;;  %v7342_v28 = vld [vmem:[#allocation51_spill] sm:$0xff] }
 0x23b   :  { %3600 = vmatmul.msk.bf16.vlgmr.msra.gmra.mxu1 %vm2760_vm15, %v2693_v16  ;;  %v2221_v12 = vsel %vm2188_vm7, %v5049_v58, %v7342_v28  ;;  %v7346_v58 = vld [vmem:[#allocation26_spill] sm:$0xff] }
 0x23e   :  { %2136 = vrot.lane.b32.xlu1 %v7328_v23, %s3765_s6  ;;  %1996 = vrot.lane.b32.xlu0 %v5027_v60, %s3766_s7  ;;  %v2370_v60 = vsel %vm2350_vm9, %v2305_v55, %v5359_v50  ;;  %v2293_v50 = vsel %vm2285_vm8, %v2200_v3, %v7332_v6 }
 0x23f   :  { %2148 = vrot.lane.b32.xlu2 %v7329_v10, %s3765_s6  ;;  %v2435_v46 = vsel %vm2415_vm11, %v2370_v60, %v5505_v0 }
 0x240   :  { %v2061_v1 = vpop.permute.xlu1 %2060  ;;  %v1921_v32 = vpop.permute.xlu0 %1920  ;;  %v2500_v53 = vsel %vm2480_vm10, %v2435_v46, %v1933_v63 }
 0x241   :  { %v5679_v14 = vpop.permute.xlu2 %1992 }
 0x246   :  { %1964 = vrot.lane.b32.xlu1 %v4914_v38, %s3763_s4  ;;  %2078 = vrot.lane.b32.xlu0 %v7263_v31, %s3764_s5 }
 0x247   :  { %2022 = vrot.lane.b32.xlu2 %v5192_v21, %s3766_s7  ;;  %v2358_v21 = vsel %vm2350_vm9, %v2293_v50, %v7333_v62 }
 0x248   :  { %v2143_v2 = vpop.permute.xlu1 %2142  ;;  %v2003_v38 = vpop.permute.xlu0 %2002  ;;  %v2423_v0 = vsel %vm2415_vm11, %v2358_v21, %v5481_v7  ;;  %v3642_v7 = vld [vmem:[%s7020_s0 + $0xd8] sm:$0xff] }
 0x249   :  { %v2075_v49 = vpop.permute.xlu2 %2074  ;;  %v2565_v31 = vsel %vm2545_vm12, %v2500_v53, %v2003_v38  ;;  %v2488_v36 = vsel %vm2480_vm10, %v2423_v0, %v1921_v32  ;;  %v7344_v53 = vld [vmem:[#allocation13_spill] sm:$0xff]  ;;  %v7347_v0 = vld [vmem:[#allocation90_spill] sm:$0xff] }
 0x24a   :  { %v2630_v30 = vsel %vm2610_vm13, %v2565_v31, %v2073_v24  ;;  %v2553_v24 = vsel %vm2545_vm12, %v2488_v36, %v5617_v47  ;;  %v2203_v31 = vsel %vm2188_vm7, %v5002_v52, %v7346_v58  ;;  %v7348_v36 = vld [vmem:[#allocation114_spill] sm:$0xff]  ;;  %v7365_v58 = vld [vmem:[#allocation116_spill] sm:$0xff] }
 0x24b   :  { %v2695_v27 = vsel %vm2675_vm14, %v2630_v30, %v2143_v2  ;;  %v2618_v22 = vsel %vm2610_vm13, %v2553_v24, %v2061_v1 }
 0x24c   :  { %3601 = vmatmul.msk.bf16.gmra.mxu1 %vm2760_vm15, %v2695_v27  ;;  %v2295_v27 = vsel %vm2285_vm8, %v2203_v31, %v7347_v0  ;;  %v3436_v31 = vrot.slane %v7365_v58, 9 }
 0x24e   :  { %2092 = vrot.lane.b32.xlu1 %v7334_v39, %s3764_s5  ;;  %1952 = vrot.lane.b32.xlu0 %v4838_v44, %s3763_s4  ;;  %v7335_v44 = vld [vmem:[#allocation59_spill] sm:$0xff] }
 0x24f   :  { %2104 = vrot.lane.b32.xlu2 %v7299_v41, %s3764_s5  ;;  %v2239_v41 = vsel %vm2188_vm7, %v3642_v7, %v7335_v44  ;;  %v7350_v44 = vld [vmem:[#allocation49_spill] sm:$0xff] }
 0x250   :  { %v2087_v34 = vpop.permute.xlu1 %2086  ;;  %v2131_v20 = vpop.permute.xlu0 %2130  ;;  %v2319_v47 = vsel %vm2285_vm8, %v2239_v41, %v7336_v56  ;;  %v7351_v41 = vld [vmem:[#allocation86_spill] sm:$0xff] }
 0x251   :  { %v5723_v8 = vpop.permute.xlu2 %1948  ;;  %v2683_v35 = vsel %vm2675_vm14, %v2618_v22, %v2131_v20  ;;  %v2384_v63 = vsel %vm2350_vm9, %v2319_v47, %v7338_v45  ;;  %v2242_v56 = vsel %vm2188_vm7, %v7351_v41, %v7350_v44  ;;  %v7352_v47 = vld [vmem:[#allocation103_spill] sm:$0xff]  ;;  %v7353_v45 = vld [vmem:[#allocation100_spill] sm:$0xff] }
 0x252   :  { %3595 = vmatmul.msk.bf16.gmra.mxu0 %vm2760_vm15, %v2683_v35  ;;  %v2449_v61 = vsel %vm2415_vm11, %v2384_v63, %v5518_v17  ;;  %v7341_v17 = vld [vmem:[#allocation89_spill] sm:$0xff] }
 0x253   :  { %v2514_v16 = vsel %vm2480_vm10, %v2449_v61, %v5646_v37  ;;  %v7356_v61 = vld [vmem:[#allocation18_spill] sm:$0xff] }
 0x256   :  { %2174 = vrot.lane.b32.xlu1 %v7337_v43, %s3765_s6  ;;  %2034 = vrot.lane.b32.xlu0 %v7339_v54, %s3766_s7  ;;  %v7355_v54 = vld [vmem:[#allocation48_spill] sm:$0xff] }
 0x257   :  { %1928 = vrot.lane.b32.xlu2 %v7328_v23, %s3763_s4  ;;  %v7340_v23 = vld [vmem:[#allocation53_spill] sm:$0xff] }
 0x258   :  { %v1935_v5 = vpop.permute.xlu1 %1934  ;;  %v2017_v1 = vpop.permute.xlu0 %2016 }
 0x259   :  { %v2159_v32 = vpop.permute.xlu2 %2158  ;;  %v2579_v18 = vsel %vm2545_vm12, %v2514_v16, %v2017_v1 }
 0x25a   :  { %v2644_v55 = vsel %vm2610_vm13, %v2579_v18, %v2087_v34  ;;  %v7349_v34 = vld [vmem:[#allocation8_spill] sm:$0xff] }
 0x25b   :  { %v2709_v60 = vsel %vm2675_vm14, %v2644_v55, %v2157_v26  ;;  %v7343_v26 = vld [vmem:[#allocation98_spill] sm:$0xff] }
 0x25c   :  { %3608 = vmatmul.msk.bf16.vlgmr.msra.gmra.mxu2 %vm2760_vm15, %v2709_v60  ;;  %v2307_v3 = vsel %vm2285_vm8, %v2221_v12, %v7343_v26  ;;  %v7360_v26 = vld [vmem:[#allocation117_spill] sm:$0xff] }
 0x25e   :  { %1998 = vrot.lane.b32.xlu1 %v5086_v42, %s3766_s7  ;;  %2162 = vrot.lane.b32.xlu0 %v7340_v23, %s3765_s6  ;;  %v7345_v42 = vld [vmem:[#allocation5_spill] sm:$0xff] }
 0x25f   :  { %2010 = vrot.lane.b32.xlu2 %v7341_v17, %s3766_s7  ;;  %v2372_v38 = vsel %vm2350_vm9, %v2307_v3, %v7345_v42  ;;  %v1272_v3 = vrot.slane %v7360_v26, 5  ;;  %v7362_v42 = vld [vmem:[#allocation80_spill] sm:$0xff] }
 0x260   :  { %v2063_v37 = vpop.permute.xlu1 %2062  ;;  %v1923_v46 = vpop.permute.xlu0 %1922  ;;  %v2437_v6 = vsel %vm2415_vm11, %v2372_v38, %v5491_v57  ;;  %v7363_v38 = vld [vmem:[#allocation94_spill] sm:$0xff] }
 0x261   :  { %v5753_v2 = vpop.permute.xlu2 %1994  ;;  %v2502_v62 = vsel %vm2480_vm10, %v2437_v6, %v1935_v5 }
 0x266   :  { %2080 = vrot.lane.b32.xlu1 %v7344_v53, %s3764_s5  ;;  %1940 = vrot.lane.b32.xlu0 %v7329_v10, %s3763_s4  ;;  %v7361_v53 = vld [vmem:[#allocation39_spill] sm:$0xff] }
 0x267   :  { %2138 = vrot.lane.b32.xlu2 %v7303_v25, %s3765_s6  ;;  %v2360_v25 = vsel %vm2350_vm9, %v2295_v27, %v7348_v36  ;;  %v7368_v27 = vld [vmem:[#allocation11_spill] sm:$0xff]  ;;  %v7369_v36 = vld [vmem:[#allocation34_spill] sm:$0xff] }
 0x268   :  { %v2145_v50 = vpop.permute.xlu1 %2144  ;;  %v2005_v21 = vpop.permute.xlu0 %2004  ;;  %v2425_v39 = vsel %vm2415_vm11, %v2360_v25, %v5467_v51 }
 0x269   :  { %v5774_v30 = vpop.permute.xlu2 %2076  ;;  %v2567_v10 = vsel %vm2545_vm12, %v2502_v62, %v2005_v21  ;;  %v2490_v24 = vsel %vm2480_vm10, %v2425_v39, %v1923_v46  ;;  %v7359_v46 = vld [vmem:[#allocation70_spill] sm:$0xff]  ;;  %v7366_v62 = vld [vmem:[#allocation29_spill] sm:$0xff]  ;;  %v7371_v39 = vld [vmem:[#allocation16_spill] sm:$0xff] }
 0x26a   :  { %v2632_v57 = vsel %vm2610_vm13, %v2567_v10, %v2075_v49  ;;  %v2555_v49 = vsel %vm2545_vm12, %v2490_v24, %v5679_v14  ;;  %v7354_v14 = vld [vmem:[#allocation125_spill] sm:$0xff]  ;;  %v7367_v21 = vld [vmem:[#allocation74_spill] sm:$0xff]  ;;  %v1275_v10 = vrot.slane %v7368_v27, 5  ;;  %v7372_v24 = vld [vmem:[#allocation87_spill] sm:$0xff] }
 0x26b   :  { %v2697_v52 = vsel %vm2675_vm14, %v2632_v57, %v2145_v50  ;;  %v2620_v51 = vsel %vm2610_vm13, %v2555_v49, %v2063_v37  ;;  %v7357_v37 = vld [vmem:[#allocation60_spill] sm:$0xff]  ;;  %v7364_v50 = vld [vmem:[#allocation85_spill] sm:$0xff]  ;;  %v2206_v0 = vsel %vm2188_vm7, %v7367_v21, %v7366_v62  ;;  %v7373_v49 = vld [vmem:[#allocation131_spill] sm:$0xff] }
 0x26c   :  { %3602 = vmatmul.msk.bf16.gmra.mxu1 %vm2760_vm15, %v2697_v52  ;;  %v7370_v57 = vld [vmem:[#allocation24_spill] sm:$0xff]  ;;  %v1274_v52 = vrot.slane %v1272_v3, 4  ;;  %v7378_v27 = vld [vmem:[#allocation17_spill] sm:$0xff] }
 0x26e   :  { %1954 = vrot.lane.b32.xlu1 %v7340_v23, %s3763_s4  ;;  %2068 = vrot.lane.b32.xlu0 %v7349_v34, %s3764_s5  ;;  %v2297_v34 = vsel %vm2285_vm8, %v2206_v0, %v7372_v24  ;;  %v7377_v0 = vld [vmem:[#allocation101_spill] sm:$0xff] }
 0x26f   :  { %1966 = vrot.lane.b32.xlu2 %v7337_v43, %s3763_s4  ;;  %v2321_v43 = vsel %vm2285_vm8, %v2242_v56, %v7352_v47 }
 0x270   :  { %v2089_v7 = vpop.permute.xlu1 %2088  ;;  %v2133_v22 = vpop.permute.xlu0 %2132  ;;  %v2386_v63 = vsel %vm2350_vm9, %v2321_v43, %v7354_v14  ;;  %v5867_v43 = vld [vmem:[%s7020_s0 + $0xd0] sm:$0xf] }
 0x271   :  { %v5796_v20 = vpop.permute.xlu2 %1950  ;;  %v2685_v35 = vsel %vm2675_vm14, %v2620_v51, %v2133_v22  ;;  %v2451_v5 = vsel %vm2415_vm11, %v2386_v63, %v5483_v15  ;;  %v7358_v15 = vld [vmem:[#allocation92_spill] sm:$0xff]  ;;  %v5857_v22 = vld [vmem:[%s7020_s0 + $0xcc] sm:$0xf]  ;;  %v1298_v26 = vshrl.u32 %v5867_v43, 16 }
 0x272   :  { %3596 = vmatmul.msk.bf16.gmra.mxu0 %vm2760_vm15, %v2685_v35  ;;  %v2516_v1 = vsel %vm2480_vm10, %v2451_v5, %v5723_v8  ;;  %v7374_v35 = vld [vmem:[#allocation14_spill] sm:$0xff]  ;;  %v1273_v5 = vsel %vm4433_vm5, %v3436_v31, %v1272_v3 }
 0x273   :  { %v2362_v44 = vsel %vm2350_vm9, %v2297_v34, %v7374_v35  ;;  %v7379_v35 = vld [vmem:[#allocation68_spill] sm:$0xff] }
 0x276   :  { %2036 = vrot.lane.b32.xlu1 %v7353_v45, %s3766_s7  ;;  %2150 = vrot.lane.b32.xlu0 %v7355_v54, %s3765_s6  ;;  %v7375_v45 = vld [vmem:[#allocation128_spill] sm:$0xff] }
 0x277   :  { %2094 = vrot.lane.b32.xlu2 %v7356_v61, %s3764_s5  ;;  %v2427_v14 = vsel %vm2415_vm11, %v2362_v44, %v7375_v45  ;;  %v2245_v44 = vsel %vm2188_vm7, %v5167_v59, %v7379_v35  ;;  %v7383_v59 = vld [vmem:[#allocation55_spill] sm:$0xff] }
 0x278   :  { %v1937_v16 = vpop.permute.xlu1 %1936  ;;  %v2019_v18 = vpop.permute.xlu0 %2018  ;;  %v7390_v35 = vld [vmem:[#allocation23_spill] sm:$0xff] }
 0x279   :  { %v5817_v55 = vpop.permute.xlu2 %2032  ;;  %v2581_v60 = vsel %vm2545_vm12, %v2516_v1, %v2019_v18  ;;  %v1276_v18 = vsel %vm4433_vm5, %v1274_v52, %v1275_v10 }
 0x27a   :  { %v2646_v23 = vsel %vm2610_vm13, %v2581_v60, %v2089_v7  ;;  %v1285_v60 = vshrl.u32 %v5857_v22, 16  ;;  %v1909_v3 = vunpack.c.l.b16 %v1276_v18  ;;  %v7382_v18 = vld [vmem:[#allocation30_spill] sm:$0xff] }
 0x27b   :  { %v2711_v17 = vsel %vm2675_vm14, %v2646_v23, %v2159_v32  ;;  %v2224_v32 = vsel %vm2188_vm7, %v7362_v42, %v7361_v53 }
 0x27c   :  { %3609 = vmatmul.msk.bf16.gmra.mxu2 %vm2760_vm15, %v2711_v17  ;;  %v2309_v6 = vsel %vm2285_vm8, %v2224_v32, %v7363_v38  ;;  %v1288_v17 = vshll.u32 %v5857_v22, 16  ;;  %v1287_v42 = vrot.slane %v1285_v60, 4 }
 0x27d   :  { %v2374_v25 = vsel %vm2350_vm9, %v2309_v6, %v7369_v36  ;;  %v1300_v6 = vrot.slane %v1298_v26, 4  ;;  %v7385_v26 = vld [vmem:[#allocation65_spill] sm:$0xff] }
 0x27e   :  { %2164 = vrot.lane.b32.xlu1 %v7357_v37, %s3765_s6  ;;  %2024 = vrot.lane.b32.xlu0 %v7358_v15, %s3766_s7  ;;  %v2439_v7 = vsel %vm2415_vm11, %v2374_v25, %v7373_v49  ;;  %v1294_v15 = vshll.u32 %v5867_v43, 16  ;;  %v1290_v32 = vrot.slane %v1288_v17, 5 }
 0x27f   :  { %2176 = vrot.lane.b32.xlu2 %v7359_v46, %s3765_s6  ;;  %v2504_v41 = vsel %vm2480_vm10, %v2439_v7, %v1937_v16 }
 0x280   :  { %v2065_v8 = vpop.permute.xlu1 %2064  ;;  %v1925_v28 = vpop.permute.xlu0 %1924  ;;  %v1296_v38 = vrot.slane %v1294_v15, 5  ;;  %v7384_v15 = vld [vmem:[#allocation93_spill] sm:$0xff] }
 0x281   :  { %v5829_v12 = vpop.permute.xlu2 %2160  ;;  %v2492_v1 = vsel %vm2480_vm10, %v2427_v14, %v1925_v28  ;;  %v1908_v28 = vunpack.c.l.b16 %v1273_v5 }
 0x282   :  { %v1301_v62 = vor.u32 %v1300_v6, %v1296_v38 }
 0x283   :  { %v5907_v31 = vpack.c.b16 %v1909_v3, %v1908_v28  ;;  %v7386_v3 = vld [vmem:[#allocation77_spill] sm:$0xff] }
 0x284   :  { %v1302_v25 = vrot.slane %v1301_v62, 4 }
 0x286   :  { %2012 = vrot.lane.b32.xlu1 %v7364_v50, %s3766_s7  ;;  %2106 = vrot.lane.b32.xlu0 %v7370_v57, %s3764_s5 }
 0x287   :  { %2082 = vrot.lane.b32.xlu2 %v7371_v39, %s3764_s5 }
 0x288   :  { %v2147_v51 = vpop.permute.xlu1 %2146  ;;  %v2007_v56 = vpop.permute.xlu0 %2006 }
 0x289   :  { %v5862_v47 = vpop.permute.xlu2 %1938  ;;  %v2569_v63 = vsel %vm2545_vm12, %v2504_v41, %v2007_v56 }
 0x28a   :  { %v2634_v16 = vsel %vm2610_vm13, %v2569_v63, %v5774_v30  ;;  %v2557_v30 = vsel %vm2545_vm12, %v2492_v1, %v5753_v2  ;;  %v5899_v2 = vld [vmem:[%s7020_s0 + $0xd4] sm:$0x1]  ;;  %v7381_v63 = vld [vmem:[#allocation91_spill] sm:$0xff] }
 0x28b   :  { %v2699_v23 = vsel %vm2675_vm14, %v2634_v16, %v2147_v51  ;;  %v2622_v50 = vsel %vm2610_vm13, %v2557_v30, %v2065_v8  ;;  %v1291_v8 = vor.u32 %v1290_v32, %v1287_v42  ;;  %v1304_v21 = vshll.u32 %v5899_v2, 16  ;;  %v7387_v42 = vld [vmem:[#allocation102_spill] sm:$0xff] }
 0x28c   :  { %3603 = vmatmul.msk.bf16.gmra.mxu1 %vm2760_vm15, %v2699_v23  ;;  %v2323_v5 = vsel %vm2285_vm8, %v2245_v44, %v7381_v63  ;;  %v2263_v32 = vsel %vm2188_vm7, %v7387_v42, %v7386_v3  ;;  %v3438_v44 = vrot.slane %v5857_v22, 9 }
 0x28d   :  { %v1292_v36 = vrot.slane %v1291_v8, 4  ;;  %v1306_v57 = vrot.slane %v1304_v21, 5  ;;  %v2388_v60 = vsel %vm2350_vm9, %v2323_v5, %v7382_v18  ;;  %v7389_v8 = vld [vmem:[#allocation32_spill] sm:$0xff]  ;;  %v7391_v18 = vld [vmem:[#allocation50_spill] sm:$0xff] }
 0x28e   :  { %1956 = vrot.lane.b32.xlu1 %v7357_v37, %s3763_s4  ;;  %1942 = vrot.lane.b32.xlu0 %v7355_v54, %s3763_s4  ;;  %v2453_v17 = vsel %vm2415_vm11, %v2388_v60, %v5546_v29 }
 0x28f   :  { %1968 = vrot.lane.b32.xlu2 %v7359_v46, %s3763_s4  ;;  %v1297_v45 = vsel %vm3813_vm2, %v1292_v36, %v1296_v38  ;;  %v1307_v14 = vsel %vm3813_vm2, %v1302_v25, %v1306_v57  ;;  %v2518_v38 = vsel %vm2480_vm10, %v2453_v17, %v5796_v20  ;;  %v7392_v17 = vld [vmem:[#allocation79_spill] sm:$0xff] }
 0x290   :  { %v2021_v53 = vpop.permute.xlu1 %2020  ;;  %v2135_v58 = vpop.permute.xlu0 %2134  ;;  %v2048_v30 = vunpack.c.l.b16 %v1297_v45  ;;  %v2049_v28 = vunpack.c.l.b16 %v1307_v14 }
 0x291   :  { %v5894_v37 = vpop.permute.xlu2 %2066  ;;  %v2838_v54 = vpop.f32.mrf.mxu0  ;;  %v2687_v46 = vsel %vm2675_vm14, %v2622_v50, %v2135_v58  ;;  %v7388_v50 = vld [vmem:[#allocation99_spill] sm:$0xff]  ;;  %v2583_v29 = vsel %vm2545_vm12, %v2518_v38, %v2021_v53  ;;  %v7394_v38 = vld [vmem:[#allocation134_spill] sm:$0xff] }
 0x292   :  { %2998 = vst.msk [vmem:[%s7022_s2] sm:$0xff] %vm2415_vm11, %v2838_v54  ;;  %3597 = vmatmul.msk.bf16.gmra.mxu0 %vm2760_vm15, %v2687_v46  ;;  %v3195_v39 = vmul.f32 %v2838_v54, %v2838_v54  ;;  %v3062_v49 = vsel %vm2415_vm11, %v2838_v54, 0.0  ;;  %v2335_v58 = vsel %vm2285_vm8, %v2263_v32, %v7388_v50  ;;  %v2052_v25 = vpack.c.b16 %v2049_v28, %v2048_v30  ;;  %v7393_v28 = vld [vmem:[#allocation12_spill] sm:$0xff] }
 0x293   :  { %v2400_v62 = vsel %vm2350_vm9, %v2335_v58, %v7389_v8 }
 0x294   :  { %v3259_v1 = vsel %vm2415_vm11, %v3195_v39, 0.0  ;;  %v2465_v57 = vsel %vm2415_vm11, %v2400_v62, %v5569_v48 }
 0x296   :  { %2038 = vrot.lane.b32.xlu1 %v7377_v0, %s3766_s7  ;;  %2152 = vrot.lane.b32.xlu0 %v5907_v31, %s3765_s6 }
 0x297   :  { %2096 = vrot.lane.b32.xlu2 %v7378_v27, %s3764_s5  ;;  %v3641_v27 = vld [vmem:[%s7020_s0 + $0xcc] sm:$0xff] }
 0x298   :  { %v2103_v10 = vpop.permute.xlu1 %2102  ;;  %v1963_v52 = vpop.permute.xlu0 %1962 }
 0x299   :  { %v5916_v24 = vpop.permute.xlu2 %2148  ;;  %v2840_v34 = vpop.f32.mrf.mxu0 }
 0x29a   :  { %2999 = vst.msk [vmem:[%s7022_s2 + $0x8] sm:$0xff] %vm2415_vm11, %v2840_v34  ;;  %v3063_v7 = vsel %vm2415_vm11, %v2840_v34, 0.0  ;;  %v3196_v51 = vmul.f32 %v2840_v34, %v2840_v34  ;;  %v1340_v34 = vrot.slane %v5867_v43, 5  ;;  %v1343_v43 = vrot.slane %v5899_v2, 5 }
 0x29b   :  { %v3064_v41 = vadd.f32 %v3063_v7, %v3062_v49  ;;  %v2530_v49 = vsel %vm2480_vm10, %v2465_v57, %v1963_v52 }
 0x29c   :  { %v3260_v16 = vsel %vm2415_vm11, %v3196_v51, 0.0  ;;  %v2595_v48 = vsel %vm2545_vm12, %v2530_v49, %v5817_v55  ;;  %v1341_v2 = vsel %vm4433_vm5, %v3438_v44, %v1340_v34 }
 0x29d   :  { %v3261_v23 = vadd.f32 %v3260_v16, %v3259_v1  ;;  %v2660_v52 = vsel %vm2610_vm13, %v2595_v48, %v2103_v10  ;;  %v3739_v16 = vld [vmem:[%s7020_s0 + $0x48] sm:$0xff]  ;;  %v2118_v42 = vunpack.c.l.b16 %v1341_v2  ;;  %v7399_v2 = vld [vmem:[#allocation57_spill] sm:$0xff] }
 0x29e   :  { %2166 = vrot.lane.b32.xlu1 %v7383_v59, %s3765_s6  ;;  %2026 = vrot.lane.b32.xlu0 %v7384_v15, %s3766_s7  ;;  %v2209_v60 = vsel %vm2188_vm7, %v3739_v16, %v7391_v18 }
 0x29f   :  { %2178 = vrot.lane.b32.xlu2 %v7385_v26, %s3765_s6  ;;  %v2299_v15 = vsel %vm2285_vm8, %v2209_v60, %v7392_v17  ;;  %v7401_v17 = vld [vmem:[#allocation73_spill] sm:$0xff] }
 0x2a0   :  { %v1927_v6 = vpop.permute.xlu1 %1926  ;;  %v2091_v54 = vpop.permute.xlu0 %2090  ;;  %v2364_v3 = vsel %vm2350_vm9, %v2299_v15, %v7393_v28  ;;  %v7402_v28 = vld [vmem:[#allocation3_spill] sm:$0xff] }
 0x2a1   :  { %v5953_v46 = vpop.permute.xlu2 %2022  ;;  %v2648_v21 = vsel %vm2610_vm13, %v2583_v29, %v2091_v54  ;;  %v2843_v0 = vpop.f32.mrf.mxu0  ;;  %v2429_v50 = vsel %vm2415_vm11, %v2364_v3, %v7394_v38 }
 0x2a2   :  { %3000 = vst.msk [vmem:[%s7022_s2 + $0x10] sm:$0xff] %vm2415_vm11, %v2843_v0  ;;  %v3065_v20 = vsel %vm2415_vm11, %v2843_v0, 0.0  ;;  %v3197_v53 = vmul.f32 %v2843_v0, %v2843_v0  ;;  %v2713_v36 = vsel %vm2675_vm14, %v2648_v21, %v5829_v12  ;;  %v2494_v29 = vsel %vm2480_vm10, %v2429_v50, %v1927_v6  ;;  %v3740_v6 = vld [vmem:[%s7020_s0 + $0x90] sm:$0xff]  ;;  %v7404_v50 = vld [vmem:[#allocation121_spill] sm:$0xff] }
 0x2a3   :  { %v3066_v39 = vadd.f32 %v3065_v20, %v3064_v41  ;;  %3610 = vmatmul.msk.bf16.gmra.mxu2 %vm2760_vm15, %v2713_v36  ;;  %v1342_v41 = vrot.slane %v1340_v34, 4  ;;  %v7397_v34 = vld [vmem:[#allocation15_spill] sm:$0xff] }
 0x2a4   :  { %v3262_v7 = vsel %vm2415_vm11, %v3197_v53, 0.0 }
 0x2a5   :  { %v3263_v51 = vadd.f32 %v3262_v7, %v3261_v23  ;;  %v1344_v10 = vsel %vm4433_vm5, %v1342_v41, %v1343_v43  ;;  %v6040_v7 = vld [vmem:[%s7020_s0 + $0x180] sm:$0xff] }
 0x2a6   :  { %2014 = vrot.lane.b32.xlu1 %v3641_v27, %s3766_s7  ;;  %2108 = vrot.lane.b32.xlu0 %v7390_v35, %s3764_s5  ;;  %v2119_v32 = vunpack.c.l.b16 %v1344_v10  ;;  %v7395_v27 = vld [vmem:[#allocation58_spill] sm:$0xff] }
 0x2a7   :  { %2084 = vrot.lane.b32.xlu2 %v2052_v25, %s3764_s5  ;;  %v2227_v20 = vsel %vm2188_vm7, %v3740_v6, %v7395_v27  ;;  %v7396_v25 = vld [vmem:[#allocation84_spill] sm:$0xff]  ;;  %v7398_v35 = vld [vmem:[#allocation22_spill] sm:$0xff] }
 0x2a8   :  { %v2009_v12 = vpop.permute.xlu1 %2008  ;;  %v2173_v45 = vpop.permute.xlu0 %2172  ;;  %v2122_v21 = vpack.c.b16 %v2119_v32, %v2118_v42  ;;  %v2311_v57 = vsel %vm2285_vm8, %v2227_v20, %v7396_v25  ;;  %v7400_v10 = vld [vmem:[#allocation66_spill] sm:$0xff]  ;;  %v7403_v32 = vld [vmem:[#allocation64_spill] sm:$0xff]  ;;  %v117_v20 = vld [vmem:[%s7020_s0 + $0x19c] sm:$0xf] }
 0x2a9   :  { %v5983_v14 = vpop.permute.xlu2 %2104  ;;  %v2845_v63 = vpop.f32.mrf.mxu0  ;;  %v2725_v5 = vsel %vm2675_vm14, %v2660_v52, %v2173_v45  ;;  %v3744_v42 = vld [vmem:[%s7020_s0 + $0xfc] sm:$0xff] }
 0x2aa   :  { %3001 = vst.msk [vmem:[%s7022_s2 + $0x18] sm:$0xff] %vm2415_vm11, %v2845_v63  ;;  %v3067_v55 = vsel %vm2415_vm11, %v2845_v63, 0.0  ;;  %v3198_v1 = vmul.f32 %v2845_v63, %v2845_v63  ;;  %3616 = vmatmul.msk.bf16.vlgmr.msra.gmra.mxu3 %vm2760_vm15, %v2725_v5  ;;  %v2248_v38 = vsel %vm2188_vm7, %v3744_v42, %v7403_v32  ;;  %v7409_v42 = vld [vmem:[#allocation71_spill] sm:$0xff] }
 0x2ab   :  { %v3068_v22 = vadd.f32 %v3067_v55, %v3066_v39 }
 0x2ac   :  { %v3264_v23 = vsel %vm2415_vm11, %v3198_v1, 0.0 }
 0x2ad   :  { %v3265_v30 = vadd.f32 %v3264_v23, %v3263_v51  ;;  %v3743_v23 = vld [vmem:[%s7020_s0 + $0x144] sm:$0xff] }
 0x2ae   :  { %1958 = vrot.lane.b32.xlu1 %v7383_v59, %s3763_s4  ;;  %1944 = vrot.lane.b32.xlu0 %v5907_v31, %s3763_s4  ;;  %v2266_v15 = vsel %vm2188_vm7, %v3743_v23, %v7401_v17  ;;  %v1279_v17 = vrot.slane %v117_v20, 5 }
 0x2af   :  { %1970 = vrot.lane.b32.xlu2 %v7385_v26, %s3763_s4  ;;  %v2337_v3 = vsel %vm2285_vm8, %v2266_v15, %v7402_v28 }
 0x2b0   :  { %v2137_v58 = vpop.permute.xlu1 %2136  ;;  %v1997_v54 = vpop.permute.xlu0 %1996 }
 0x2b1   :  { %v6015_v8 = vpop.permute.xlu2 %1928  ;;  %v2559_v59 = vsel %vm2545_vm12, %v2494_v29, %v1997_v54  ;;  %v2848_v62 = vpop.f32.mrf.mxu0  ;;  %v7405_v29 = vld [vmem:[#allocation31_spill] sm:$0xff] }
 0x2b2   :  { %3002 = vst.msk [vmem:[%s7022_s2 + $0x20] sm:$0xff] %vm2415_vm11, %v2848_v62  ;;  %v3069_v31 = vsel %vm2415_vm11, %v2848_v62, 0.0  ;;  %v3199_v26 = vmul.f32 %v2848_v62, %v2848_v62  ;;  %v2624_v0 = vsel %vm2610_vm13, %v2559_v59, %v5894_v37  ;;  %v2376_v37 = vsel %vm2350_vm9, %v2311_v57, %v7397_v34  ;;  %v7406_v54 = vld [vmem:[#allocation111_spill] sm:$0xff] }
 0x2b3   :  { %v3070_v53 = vadd.f32 %v3069_v31, %v3068_v22  ;;  %v2689_v36 = vsel %vm2675_vm14, %v2624_v0, %v2137_v58  ;;  %v2441_v51 = vsel %vm2415_vm11, %v2376_v37, %v5520_v4  ;;  %v2402_v58 = vsel %vm2350_vm9, %v2337_v3, %v7404_v50  ;;  %v6117_v31 = vld [vmem:[%s7020_s0 + $0x198] sm:$0xf] }
 0x2b4   :  { %v3266_v39 = vsel %vm2415_vm11, %v3199_v26, 0.0  ;;  %3598 = vmatmul.msk.bf16.gmra.mxu0 %vm2760_vm15, %v2689_v36  ;;  %v2506_v48 = vsel %vm2480_vm10, %v2441_v51, %v5862_v47  ;;  %v2325_v59 = vsel %vm2285_vm8, %v2248_v38, %v7406_v54  ;;  %v2467_v62 = vsel %vm2415_vm11, %v2402_v58, %v5554_v9  ;;  %v7407_v26 = vld [vmem:[#allocation119_spill] sm:$0xff] }
 0x2b5   :  { %v3267_v49 = vadd.f32 %v3266_v39, %v3265_v30  ;;  %v2571_v41 = vsel %vm2545_vm12, %v2506_v48, %v2009_v12  ;;  %v2390_v0 = vsel %vm2350_vm9, %v2325_v59, %v7407_v26  ;;  %v1241_v39 = vshrl.u32 %v6117_v31, 16  ;;  %v6145_v51 = vld [vmem:[%s7020_s0 + $0x18c] sm:$0xff]  ;;  %v7408_v48 = vld [vmem:[#allocation21_spill] sm:$0xff] }
 0x2b6   :  { %2040 = vrot.lane.b32.xlu1 %v6040_v7, %s3766_s7  ;;  %2154 = vrot.lane.b32.xlu0 %v2122_v21, %s3765_s6  ;;  %v1250_v37 = vshll.u32 %v117_v20, 16  ;;  %v3437_v32 = vrot.slane %v6117_v31, 9  ;;  %v1281_v38 = vrot.slane %v1279_v17, 4 }
 0x2b7   :  { %2098 = vrot.lane.b32.xlu2 %v7398_v35, %s3764_s5 }
 0x2b8   :  { %v1965_v44 = vpop.permute.xlu1 %1964  ;;  %v6052_v43 = vpop.f32.mrf.mxu1 }
 0x2b9   :  { %v2079_v52 = vpop.permute.xlu0 %2078  ;;  %3014 = vst.msk [vmem:[%s7022_s2 + $0x80] sm:$0xff] %vm2415_vm11, %v6052_v43  ;;  %v2850_v45 = vpop.f32.mrf.mxu0  ;;  %v2532_v6 = vsel %vm2480_vm10, %v2467_v62, %v1965_v44 }
 0x2ba   :  { %v2636_v4 = vsel %vm2610_vm13, %v2571_v41, %v2079_v52  ;;  %3003 = vst.msk [vmem:[%s7022_s2 + $0x28] sm:$0xff] %vm2415_vm11, %v2850_v45  ;;  %v3071_v47 = vsel %vm2415_vm11, %v2850_v45, 0.0  ;;  %v3200_v12 = vmul.f32 %v2850_v45, %v2850_v45  ;;  %v6067_v5 = vpop.permute.xlu2 %2010  ;;  %v1243_v52 = vrot.slane %v1241_v39, 4  ;;  %v7411_v39 = vld [vmem:[#allocation95_spill] sm:$0xff] }
 0x2bb   :  { %v2701_v63 = vsel %vm2675_vm14, %v2636_v4, %v5916_v24  ;;  %v3072_v55 = vadd.f32 %v3071_v47, %v3070_v53  ;;  %v3742_v24 = vld [vmem:[%s7020_s0 + $0x138] sm:$0xff]  ;;  %v2455_v53 = vsel %vm2415_vm11, %v2390_v0, %v5531_v11  ;;  %v1244_v11 = vshll.u32 %v6117_v31, 16 }
 0x2bc   :  { %3604 = vmatmul.msk.bf16.gmra.mxu1 %vm2760_vm15, %v2701_v63  ;;  %v3268_v1 = vsel %vm2415_vm11, %v3200_v12, 0.0  ;;  %v1252_v45 = vrot.slane %v1250_v37, 5  ;;  %v1280_v0 = vsel %vm4433_vm5, %v3437_v32, %v1279_v17 }
 0x2bd   :  { %v6071_v22 = vadd.f32 %v3268_v1, %v3267_v49  ;;  %v1254_v49 = vshrl.u32 %v117_v20, 16  ;;  %v1246_v4 = vrot.slane %v1244_v11, 5  ;;  %v7410_v20 = vld [vmem:[#allocation46_spill] sm:$0xff]  ;;  %v7412_v11 = vld [vmem:[#allocation115_spill] sm:$0xff] }
 0x2be   :  { %2168 = vrot.lane.b32.xlu1 %v7399_v2, %s3765_s6  ;;  %2028 = vrot.lane.b32.xlu0 %v3742_v24, %s3766_s7 }
 0x2bf   :  { %2180 = vrot.lane.b32.xlu2 %v7400_v10, %s3765_s6  ;;  %v1256_v63 = vrot.slane %v1254_v49, 4  ;;  %v1247_v28 = vor.u32 %v1246_v4, %v1243_v52  ;;  %v1910_v49 = vunpack.c.l.b16 %v1280_v0  ;;  %v7414_v52 = vld [vmem:[#allocation28_spill] sm:$0xff]  ;;  %v3747_v4 = vld [vmem:[%s7020_s0 + $0x198] sm:$0xff] }
 0x2c0   :  { %v2093_v16 = vpop.permute.xlu1 %2092  ;;  %v6081_v18 = vpop.f32.mrf.mxu1 }
 0x2c1   :  { %v1953_v60 = vpop.permute.xlu0 %1952  ;;  %3015 = vst.msk [vmem:[%s7022_s2 + $0x88] sm:$0xff] %vm2415_vm11, %v6081_v18  ;;  %v1257_v3 = vor.u32 %v1256_v63, %v1252_v45  ;;  %v1248_v54 = vrot.slane %v1247_v28, 4  ;;  %v7417_v28 = vld [vmem:[#allocation118_spill] sm:$0xff] }
 0x2c2   :  { %v6093_v30 = vpop.permute.xlu2 %2138  ;;  %v2520_v25 = vsel %vm2480_vm10, %v2455_v53, %v1953_v60 }
 0x2c6   :  { %1960 = vrot.lane.b32.xlu1 %v7399_v2, %s3763_s4  ;;  %2110 = vrot.lane.b32.xlu0 %v7405_v29, %s3764_s5  ;;  %v118_v2 = vld [vmem:[%s7020_s0 + $0x1a0] sm:$0x1] }
 0x2c7   :  { %1972 = vrot.lane.b32.xlu2 %v7400_v10, %s3763_s4  ;;  %v1282_v50 = vrot.slane %v118_v2, 5 }
 0x2c8   :  { %v2175_v21 = vpop.permute.xlu1 %2174 }
 0x2c9   :  { %v2035_v27 = vpop.permute.xlu0 %2034  ;;  %v6128_v36 = vpop.f32.mrf.mxu1 }
 0x2ca   :  { %v2597_v9 = vsel %vm2545_vm12, %v2532_v6, %v2035_v27  ;;  %3016 = vst.msk [vmem:[%s7022_s2 + $0x90] sm:$0xff] %vm2415_vm11, %v6128_v36  ;;  %v6153_v35 = vpop.permute.xlu2 %1966  ;;  %v1283_v6 = vsel %vm4433_vm5, %v1281_v38, %v1282_v50  ;;  %v3746_v27 = vld [vmem:[%s7020_s0 + $0x54] sm:$0xff] }
 0x2cb   :  { %v2662_v57 = vsel %vm2610_vm13, %v2597_v9, %v5983_v14  ;;  %v2585_v14 = vsel %vm2545_vm12, %v2520_v25, %v5953_v46  ;;  %v2212_v53 = vsel %vm2188_vm7, %v3746_v27, %v7410_v20  ;;  %v1253_v25 = vsel %vm3813_vm2, %v1248_v54, %v1252_v45  ;;  %v6265_v54 = vld [vmem:[%s7020_s0 + $0x1a8] sm:$0xf]  ;;  %v121_v20 = vld [vmem:[%s7020_s0 + $0x1ac] sm:$0x1] }
 0x2cc   :  { %v2727_v34 = vsel %vm2675_vm14, %v2662_v57, %v2175_v21  ;;  %v2650_v47 = vsel %vm2610_vm13, %v2585_v14, %v2093_v16  ;;  %v1911_v14 = vunpack.c.l.b16 %v1283_v6  ;;  %v1840_v45 = vunpack.c.l.b16 %v1253_v25 }
 0x2cd   :  { %3617 = vmatmul.msk.bf16.gmra.mxu3 %vm2760_vm15, %v2727_v34  ;;  %v2301_v34 = vsel %vm2285_vm8, %v2212_v53, %v7411_v39 }
 0x2ce   :  { %2042 = vrot.lane.b32.xlu1 %v6145_v51, %s3766_s7  ;;  %1902 = vrot.lane.b32.xlu0 %v7405_v29, %s3762_s26  ;;  %v2366_v37 = vsel %vm2350_vm9, %v2301_v34, %v7412_v11  ;;  %v1328_v34 = vshll.u32 %v121_v20, 16 }
 0x2cf   :  { %2100 = vrot.lane.b32.xlu2 %v7408_v48, %s3764_s5  ;;  %v2853_v44 = vpop.f32.mrf.mxu0  ;;  %v7413_v48 = vld [vmem:[#allocation133_spill] sm:$0xff] }
 0x2d0   :  { %v6157_v41 = vpop.permute.xlu1 %1998  ;;  %3004 = vst.msk [vmem:[%s7022_s2 + $0x30] sm:$0xff] %vm2415_vm11, %v2853_v44  ;;  %v3073_v46 = vsel %vm2415_vm11, %v2853_v44, 0.0  ;;  %v3201_v12 = vmul.f32 %v2853_v44, %v2853_v44  ;;  %v2431_v44 = vsel %vm2415_vm11, %v2366_v37, %v7413_v48 }
 0x2d1   :  { %v2163_v1 = vpop.permute.xlu0 %2162  ;;  %v3074_v24 = vadd.f32 %v3073_v46, %v3072_v55  ;;  %v6169_v60 = vpop.f32.mrf.mxu1  ;;  %v1260_v55 = vshll.u32 %v118_v2, 16  ;;  %v7415_v46 = vld [vmem:[#allocation54_spill] sm:$0xff] }
 0x2d2   :  { %v2715_v10 = vsel %vm2675_vm14, %v2650_v47, %v2163_v1  ;;  %v3270_v16 = vsel %vm2415_vm11, %v3201_v12, 0.0  ;;  %3017 = vst.msk [vmem:[%s7022_s2 + $0x98] sm:$0xff] %vm2415_vm11, %v6169_v60  ;;  %v6192_v62 = vpop.permute.xlu2 %2094  ;;  %v3748_v47 = vld [vmem:[%s7020_s0 + $0x9c] sm:$0xff]  ;;  %v2496_v1 = vsel %vm2480_vm10, %v2431_v44, %v6015_v8 }
 0x2d3   :  { %3611 = vmatmul.msk.bf16.gmra.mxu2 %vm2760_vm15, %v2715_v10  ;;  %v3271_v15 = vadd.f32 %v3270_v16, %v6071_v22  ;;  %v1258_v22 = vrot.slane %v1257_v3, 4  ;;  %v1262_v59 = vrot.slane %v1260_v55, 5  ;;  %v2230_v12 = vsel %vm2188_vm7, %v3748_v47, %v7415_v46  ;;  %v7416_v10 = vld [vmem:[#allocation104_spill] sm:$0xff] }
 0x2d4   :  { %v2313_v16 = vsel %vm2285_vm8, %v2230_v12, %v7416_v10  ;;  %v2561_v17 = vsel %vm2545_vm12, %v2496_v1, %v6157_v41  ;;  %v6249_v55 = vpack.c.b16 %v1911_v14, %v1910_v49  ;;  %v3659_v14 = vld [vmem:[%s7020_s0 + $0x1a4] sm:$0xff]  ;;  %v7419_v47 = vld [vmem:[#allocation52_spill] sm:$0xff] }
 0x2d5   :  { %v1263_v57 = vsel %vm3813_vm2, %v1258_v22, %v1262_v59  ;;  %v2378_v8 = vsel %vm2350_vm9, %v2313_v16, %v7417_v28  ;;  %v7420_v16 = vld [vmem:[#allocation107_spill] sm:$0xff] }
 0x2d6   :  { %2170 = vrot.lane.b32.xlu1 %v4948_v40, %s3765_s6  ;;  %2030 = vrot.lane.b32.xlu0 %v3743_v23, %s3766_s7  ;;  %v1841_v63 = vunpack.c.l.b16 %v1263_v57 }
 0x2d7   :  { %2182 = vrot.lane.b32.xlu2 %v7409_v42, %s3765_s6  ;;  %v2855_v58 = vpop.f32.mrf.mxu0 }
 0x2d8   :  { %v6185_v29 = vpop.permute.xlu1 %2080  ;;  %3005 = vst.msk [vmem:[%s7022_s2 + $0x38] sm:$0xff] %vm2415_vm11, %v2855_v58  ;;  %v3075_v40 = vsel %vm2415_vm11, %v2855_v58, 0.0  ;;  %v3202_v23 = vmul.f32 %v2855_v58, %v2855_v58  ;;  %v1843_v50 = vpack.c.b16 %v1841_v63, %v1840_v45  ;;  %v6260_v58 = vld [vmem:[%s7020_s0 + $0x1a4] sm:$0xf]  ;;  %v3749_v63 = vld [vmem:[%s7020_s0 + $0x108] sm:$0xff] }
 0x2d9   :  { %v1941_v21 = vpop.permute.xlu0 %1940  ;;  %v6194_v31 = vadd.f32 %v3075_v40, %v3074_v24  ;;  %v1309_v22 = vshrl.u32 %v6260_v58, 16  ;;  %v1312_v59 = vshll.u32 %v6260_v58, 16  ;;  %v1318_v40 = vshll.u32 %v6265_v54, 16 }
 0x2da   :  { %v3272_v26 = vsel %vm2415_vm11, %v3202_v23, 0.0  ;;  %v6253_v38 = vpop.permute.xlu2 %2176  ;;  %v2251_v46 = vsel %vm2188_vm7, %v3749_v63, %v7419_v47 }
 0x2db   :  { %v6206_v9 = vadd.f32 %v3272_v26, %v3271_v15  ;;  %v1311_v26 = vrot.slane %v1309_v22, 4  ;;  %v1314_v0 = vrot.slane %v1312_v59, 5  ;;  %v1320_v6 = vrot.slane %v1318_v40, 5 }
 0x2dc   :  { %v1350_v22 = vrot.slane %v121_v20, 5 }
 0x2dd   :  { %v1315_v57 = vor.u32 %v1314_v0, %v1311_v26  ;;  %v7423_v0 = vld [vmem:[#allocation62_spill] sm:$0xff] }
 0x2de   :  { %1974 = vrot.lane.b32.xlu1 %v7409_v42, %s3763_s4  ;;  %2112 = vrot.lane.b32.xlu0 %v7414_v52, %s3764_s5  ;;  %v7418_v42 = vld [vmem:[#allocation35_spill] sm:$0xff] }
 0x2df   :  { %2044 = vrot.lane.b32.xlu2 %v3747_v4, %s3766_s7  ;;  %v6233_v2 = vpop.f32.mrf.mxu2  ;;  %v2443_v32 = vsel %vm2415_vm11, %v2378_v8, %v7418_v42  ;;  %v1316_v48 = vrot.slane %v1315_v57, 4  ;;  %v7422_v8 = vld [vmem:[#allocation135_spill] sm:$0xff] }
 0x2e0   :  { %v6235_v24 = vpop.permute.xlu1 %1954  ;;  %3030 = vst.msk [vmem:[%s7022_s2 + $0x100] sm:$0xff] %vm2415_vm11, %v6233_v2  ;;  %v2508_v23 = vsel %vm2480_vm10, %v2443_v32, %v1941_v21 }
 0x2e1   :  { %v2069_v15 = vpop.permute.xlu0 %2068  ;;  %v2573_v53 = vsel %vm2545_vm12, %v2508_v23, %v6067_v5  ;;  %v1321_v4 = vsel %vm3813_vm2, %v1316_v48, %v1320_v6 }
 0x2e2   :  { %v2626_v3 = vsel %vm2610_vm13, %v2561_v17, %v2069_v15  ;;  %v2638_v11 = vsel %vm2610_vm13, %v2573_v53, %v6185_v29  ;;  %v1347_v29 = vrot.slane %v6265_v54, 5  ;;  %v6316_v12 = vpop.permute.xlu2 %2082  ;;  %v2050_v1 = vunpack.c.l.b16 %v1321_v4  ;;  %v7421_v15 = vld [vmem:[#allocation27_spill] sm:$0xff] }
 0x2e3   :  { %v2691_v41 = vsel %vm2675_vm14, %v2626_v3, %v6093_v30  ;;  %v1322_v30 = vshrl.u32 %v6265_v54, 16  ;;  %v2327_v17 = vsel %vm2285_vm8, %v2251_v46, %v7420_v16 }
 0x2e4   :  { %3599 = vmatmul.msk.bf16.gmra.mxu0 %vm2760_vm15, %v2691_v41  ;;  %v2392_v56 = vsel %vm2350_vm9, %v2327_v17, %v7421_v15  ;;  %v3439_v41 = vrot.slane %v6260_v58, 9  ;;  %v1349_v54 = vrot.slane %v1347_v29, 4  ;;  %v7427_v17 = vld [vmem:[#allocation97_spill] sm:$0xff] }
 0x2e5   :  { %v1324_v27 = vrot.slane %v1322_v30, 4  ;;  %v2457_v3 = vsel %vm2415_vm11, %v2392_v56, %v7422_v8 }
 0x2e6   :  { %2184 = vrot.lane.b32.xlu1 %v6249_v55, %s3765_s6  ;;  %1904 = vrot.lane.b32.xlu0 %v7414_v52, %s3762_s26  ;;  %v1330_v52 = vrot.slane %v1328_v34, 5  ;;  %v2522_v59 = vsel %vm2480_vm10, %v2457_v3, %v6235_v24  ;;  %v3750_v24 = vld [vmem:[%s7020_s0 + $0x150] sm:$0xff]  ;;  %v1348_v57 = vsel %vm4433_vm5, %v3439_v41, %v1347_v29 }
 0x2e7   :  { %1906 = vrot.lane.b32.xlu2 %v1843_v50, %s3762_s26  ;;  %v6283_v21 = vpop.f32.mrf.mxu2  ;;  %v1325_v39 = vor.u32 %v1324_v27, %v1320_v6  ;;  %v2269_v6 = vsel %vm2188_vm7, %v3750_v24, %v7423_v0  ;;  %v7424_v34 = vld [vmem:[#allocation112_spill] sm:$0xff] }
 0x2e8   :  { %v6285_v25 = vpop.permute.xlu1 %2036  ;;  %3031 = vst.msk [vmem:[%s7022_s2 + $0x108] sm:$0xff] %vm2415_vm11, %v6283_v21  ;;  %v3752_v0 = vld [vmem:[%s7020_s0 + $0x114] sm:$0xff] }
 0x2e9   :  { %v2151_v37 = vpop.permute.xlu0 %2150  ;;  %v6295_v5 = vpop.f32.mrf.mxu1  ;;  %v1326_v44 = vrot.slane %v1325_v39, 4  ;;  %v1351_v39 = vsel %vm4433_vm5, %v1349_v54, %v1350_v22 }
 0x2ea   :  { %v2703_v49 = vsel %vm2675_vm14, %v2638_v11, %v2151_v37  ;;  %3018 = vst.msk [vmem:[%s7022_s2 + $0xa0] sm:$0xff] %vm2415_vm11, %v6295_v5  ;;  %v2339_v11 = vsel %vm2285_vm8, %v2269_v6, %v7424_v34  ;;  %v7425_v37 = vld [vmem:[#allocation130_spill] sm:$0xff]  ;;  %v2121_v48 = vunpack.c.l.b16 %v1351_v39  ;;  %v7430_v6 = vld [vmem:[#allocation72_spill] sm:$0xff] }
 0x2eb   :  { %3605 = vmatmul.msk.bf16.gmra.mxu1 %vm2760_vm15, %v2703_v49  ;;  %v1331_v45 = vsel %vm3813_vm2, %v1326_v44, %v1330_v52  ;;  %v2404_v49 = vsel %vm2350_vm9, %v2339_v11, %v7425_v37 }
 0x2ec   :  { %v2051_v10 = vunpack.c.l.b16 %v1331_v45 }
 0x2ee   :  { %2046 = vrot.lane.b32.xlu1 %v3659_v14, %s3766_s7  ;;  %2114 = vrot.lane.b32.xlu0 %v1843_v50, %s3764_s5  ;;  %v2053_v28 = vpack.c.b16 %v2051_v10, %v2050_v1  ;;  %v2120_v14 = vunpack.c.l.b16 %v1348_v57  ;;  %v7426_v10 = vld [vmem:[#allocation45_spill] sm:$0xff] }
 0x2ef   :  { %v2858_v42 = vpop.f32.mrf.mxu0 }
 0x2f0   :  { %v2165_v32 = vpop.permute.xlu1 %2164  ;;  %3006 = vst.msk [vmem:[%s7022_s2 + $0x40] sm:$0xff] %vm2415_vm11, %v2858_v42  ;;  %v3077_v50 = vsel %vm2415_vm11, %v2858_v42, 0.0  ;;  %v3203_v40 = vmul.f32 %v2858_v42, %v2858_v42  ;;  %2116 = vrot.lane.b32.xlu2 %v2053_v28, %s3764_s5  ;;  %v2123_v46 = vpack.c.b16 %v2121_v48, %v2120_v14  ;;  %v7429_v42 = vld [vmem:[#allocation132_spill] sm:$0xff] }
 0x2f1   :  { %v2025_v30 = vpop.permute.xlu0 %2024  ;;  %v3078_v23 = vadd.f32 %v3077_v50, %v6194_v31  ;;  %v6337_v26 = vpop.f32.mrf.mxu1 }
 0x2f2   :  { %v2587_v58 = vsel %vm2545_vm12, %v2522_v59, %v2025_v30  ;;  %v3274_v27 = vsel %vm2415_vm11, %v3203_v40, 0.0  ;;  %3019 = vst.msk [vmem:[%s7022_s2 + $0xa8] sm:$0xff] %vm2415_vm11, %v6337_v26 }
 0x2f3   :  { %v2652_v31 = vsel %vm2610_vm13, %v2587_v58, %v6192_v62  ;;  %v3275_v20 = vadd.f32 %v3274_v27, %v6206_v9  ;;  %v2469_v62 = vsel %vm2415_vm11, %v2404_v49, %v5598_v13  ;;  %v6365_v9 = vpop.permute.xlu2 %1968  ;;  %v7431_v27 = vld [vmem:[#allocation96_spill] sm:$0xff] }
 0x2f4   :  { %v2717_v53 = vsel %vm2675_vm14, %v2652_v31, %v2165_v32  ;;  %v2534_v61 = vsel %vm2480_vm10, %v2469_v62, %v6153_v35 }
 0x2f5   :  { %3612 = vmatmul.msk.bf16.gmra.mxu2 %vm2760_vm15, %v2717_v53  ;;  %v2599_v29 = vsel %vm2545_vm12, %v2534_v61, %v6285_v25  ;;  %v3751_v25 = vld [vmem:[%s7020_s0 + $0xa8] sm:$0xff] }
 0x2f6   :  { %1976 = vrot.lane.b32.xlu0 %v6249_v55, %s3763_s4  ;;  %v2233_v16 = vsel %vm2188_vm7, %v3751_v25, %v7426_v10  ;;  %v7436_v25 = vld [vmem:[#allocation37_spill] sm:$0xff] }
 0x2f7   :  { %v2860_v44 = vpop.f32.mrf.mxu0  ;;  %v2315_v15 = vsel %vm2285_vm8, %v2233_v16, %v7427_v17 }
 0x2f8   :  { %v2013_v52 = vpop.permute.xlu1 %2012  ;;  %3007 = vst.msk [vmem:[%s7022_s2 + $0x48] sm:$0xff] %vm2415_vm11, %v2860_v44  ;;  %v3079_v13 = vsel %vm2415_vm11, %v2860_v44, 0.0  ;;  %v3204_v4 = vmul.f32 %v2860_v44, %v2860_v44 }
 0x2f9   :  { %v2107_v45 = vpop.permute.xlu0 %2106  ;;  %v3080_v55 = vadd.f32 %v3079_v13, %v3078_v23 }
 0x2fa   :  { %v2664_v63 = vsel %vm2610_vm13, %v2599_v29, %v2107_v45  ;;  %v3276_v47 = vsel %vm2415_vm11, %v3204_v4, 0.0  ;;  %v7433_v29 = vld [vmem:[#allocation81_spill] sm:$0xff] }
 0x2fb   :  { %v2729_v35 = vsel %vm2675_vm14, %v2664_v63, %v6253_v38  ;;  %v3277_v1 = vadd.f32 %v3276_v47, %v3275_v20  ;;  %v7428_v38 = vld [vmem:[#allocation122_spill] sm:$0xff]  ;;  %v2097_v41 = vpop.permute.xlu2 %2096  ;;  %v7432_v20 = vld [vmem:[#allocation124_spill] sm:$0xff]  ;;  %v7435_v47 = vld [vmem:[#allocation41_spill] sm:$0xff] }
 0x2fc   :  { %3618 = vmatmul.msk.bf16.gmra.mxu3 %vm2760_vm15, %v2729_v35  ;;  %v2380_v8 = vsel %vm2350_vm9, %v2315_v15, %v7428_v38 }
 0x2fd   :  { %v2445_v32 = vsel %vm2415_vm11, %v2380_v8, %v7429_v42 }
 0x2fe   :  { %2186 = vrot.lane.b32.xlu0 %v2123_v46, %s3765_s6 }
 0x2ff   :  { %v6391_v56 = vpop.f32.mrf.mxu2 }
 0x300   :  { %v1957_v28 = vpop.permute.xlu1 %1956  ;;  %3032 = vst.msk [vmem:[%s7022_s2 + $0x110] sm:$0xff] %vm2415_vm11, %v6391_v56 }
 0x301   :  { %v1943_v3 = vpop.permute.xlu0 %1942 }
 0x302   :  { %v2510_v54 = vsel %vm2480_vm10, %v2445_v32, %v1943_v3 }
 0x303   :  { %v2575_v22 = vsel %vm2545_vm12, %v2510_v54, %v2013_v52  ;;  %v2179_v24 = vpop.permute.xlu2 %2178  ;;  %v3753_v52 = vld [vmem:[%s7020_s0 + $0x15c] sm:$0xff]  ;;  %v3754_v54 = vld [vmem:[%s7020_s0 + $0xb4] sm:$0xff] }
 0x304   :  { %v2640_v30 = vsel %vm2610_vm13, %v2575_v22, %v6316_v12  ;;  %v2254_v12 = vsel %vm2188_vm7, %v3752_v0, %v7430_v6  ;;  %v2272_v13 = vsel %vm2188_vm7, %v3753_v52, %v7433_v29  ;;  %v7437_v22 = vld [vmem:[#allocation63_spill] sm:$0xff]  ;;  %v7439_v6 = vld [vmem:[#allocation20_spill] sm:$0xff] }
 0x305   :  { %v2329_v31 = vsel %vm2285_vm8, %v2254_v12, %v7431_v27  ;;  %v7443_v29 = vld [vmem:[#allocation120_spill] sm:$0xff] }
 0x306   :  { %v2394_v53 = vsel %vm2350_vm9, %v2329_v31, %v7432_v20 }
 0x307   :  { %v6404_v59 = vpop.f32.mrf.mxu2  ;;  %v2459_v57 = vsel %vm2415_vm11, %v2394_v53, %v5556_v19 }
 0x308   :  { %v2039_v50 = vpop.permute.xlu1 %2038  ;;  %3033 = vst.msk [vmem:[%s7022_s2 + $0x118] sm:$0xff] %vm2415_vm11, %v6404_v59  ;;  %v2524_v11 = vsel %vm2480_vm10, %v2459_v57, %v1957_v28 }
 0x309   :  { %v2153_v40 = vpop.permute.xlu0 %2152  ;;  %v6414_v58 = vpop.f32.mrf.mxu1 }
 0x30a   :  { %v2705_v23 = vsel %vm2675_vm14, %v2640_v30, %v2153_v40  ;;  %3020 = vst.msk [vmem:[%s7022_s2 + $0xb0] sm:$0xff] %vm2415_vm11, %v6414_v58  ;;  %v7438_v40 = vld [vmem:[#allocation88_spill] sm:$0xff] }
 0x30b   :  { %3606 = vmatmul.msk.bf16.gmra.mxu1 %vm2760_vm15, %v2705_v23  ;;  %v2085_v46 = vpop.permute.xlu2 %2084 }
 0x30f   :  { %v2863_v39 = vpop.f32.mrf.mxu0 }
 0x310   :  { %v2167_v34 = vpop.permute.xlu1 %2166  ;;  %3008 = vst.msk [vmem:[%s7022_s2 + $0x50] sm:$0xff] %vm2415_vm11, %v2863_v39  ;;  %v3081_v37 = vsel %vm2415_vm11, %v2863_v39, 0.0  ;;  %v3205_v49 = vmul.f32 %v2863_v39, %v2863_v39 }
 0x311   :  { %v2027_v62 = vpop.permute.xlu0 %2026  ;;  %v3082_v14 = vadd.f32 %v3081_v37, %v3080_v55  ;;  %v6440_v61 = vpop.f32.mrf.mxu1  ;;  %v7434_v55 = vld [vmem:[#allocation105_spill] sm:$0xff] }
 0x312   :  { %v2589_v48 = vsel %vm2545_vm12, %v2524_v11, %v2027_v62  ;;  %v3278_v19 = vsel %vm2415_vm11, %v3205_v49, 0.0  ;;  %3021 = vst.msk [vmem:[%s7022_s2 + $0xb8] sm:$0xff] %vm2415_vm11, %v6440_v61  ;;  %v2341_v63 = vsel %vm2285_vm8, %v2272_v13, %v7434_v55  ;;  %v3755_v62 = vld [vmem:[%s7020_s0 + $0x120] sm:$0xff] }
 0x313   :  { %v2654_v44 = vsel %vm2610_vm13, %v2589_v48, %v2097_v41  ;;  %v3279_v4 = vadd.f32 %v3278_v19, %v3277_v1  ;;  %v2406_v35 = vsel %vm2350_vm9, %v2341_v63, %v7435_v47  ;;  %v1971_v23 = vpop.permute.xlu2 %1970  ;;  %v7442_v19 = vld [vmem:[#allocation113_spill] sm:$0xff] }
 0x314   :  { %v2719_v45 = vsel %vm2675_vm14, %v2654_v44, %v2167_v34  ;;  %v2471_v10 = vsel %vm2415_vm11, %v2406_v35, %v7436_v25 }
 0x315   :  { %3613 = vmatmul.msk.bf16.gmra.mxu2 %vm2760_vm15, %v2719_v45  ;;  %v2536_v16 = vsel %vm2480_vm10, %v2471_v10, %v6365_v9  ;;  %v7444_v45 = vld [vmem:[#allocation138_spill] sm:$0xff] }
 0x316   :  { %v2601_v1 = vsel %vm2545_vm12, %v2536_v16, %v2039_v50  ;;  %v2236_v50 = vsel %vm2188_vm7, %v3754_v54, %v7437_v22  ;;  %v7447_v22 = vld [vmem:[#allocation123_spill] sm:$0xff] }
 0x317   :  { %v2865_v17 = vpop.f32.mrf.mxu0  ;;  %v2317_v30 = vsel %vm2285_vm8, %v2236_v50, %v7438_v40 }
 0x318   :  { %v2015_v15 = vpop.permute.xlu1 %2014  ;;  %3009 = vst.msk [vmem:[%s7022_s2 + $0x58] sm:$0xff] %vm2415_vm11, %v2865_v17  ;;  %v3083_v28 = vsel %vm2415_vm11, %v2865_v17, 0.0  ;;  %v3206_v38 = vmul.f32 %v2865_v17, %v2865_v17  ;;  %v2382_v12 = vsel %vm2350_vm9, %v2317_v30, %v7439_v6 }
 0x319   :  { %v2109_v8 = vpop.permute.xlu0 %2108  ;;  %v3084_v3 = vadd.f32 %v3083_v28, %v3082_v14  ;;  %v7441_v14 = vld [vmem:[#allocation69_spill] sm:$0xff] }
 0x31a   :  { %v2666_v42 = vsel %vm2610_vm13, %v2601_v1, %v2109_v8  ;;  %v3280_v32 = vsel %vm2415_vm11, %v3206_v38, 0.0  ;;  %v2257_v48 = vsel %vm2188_vm7, %v3755_v62, %v7441_v14  ;;  %v7445_v1 = vld [vmem:[#allocation78_spill] sm:$0xff]  ;;  %v3757_v14 = vld [vmem:[%s7020_s0 + $0x12c] sm:$0xff] }
 0x31b   :  { %v2731_v9 = vsel %vm2675_vm14, %v2666_v42, %v2179_v24  ;;  %v3281_v41 = vadd.f32 %v3280_v32, %v3279_v4  ;;  %v7440_v24 = vld [vmem:[#allocation137_spill] sm:$0xff]  ;;  %v2099_v37 = vpop.permute.xlu2 %2098  ;;  %v2331_v44 = vsel %vm2285_vm8, %v2257_v48, %v7442_v19  ;;  %v7446_v32 = vld [vmem:[#allocation6_spill] sm:$0xff]  ;;  %v7448_v48 = vld [vmem:[#allocation56_spill] sm:$0xff] }
 0x31c   :  { %3619 = vmatmul.msk.bf16.gmra.mxu3 %vm2760_vm15, %v2731_v9  ;;  %v2447_v31 = vsel %vm2415_vm11, %v2382_v12, %v7440_v24  ;;  %v2396_v13 = vsel %vm2350_vm9, %v2331_v44, %v7443_v29  ;;  %v2260_v19 = vsel %vm2188_vm7, %v3757_v14, %v7448_v48  ;;  %v7449_v44 = vld [vmem:[#allocation110_spill] sm:$0xff] }
 0x31d   :  { %v2461_v55 = vsel %vm2415_vm11, %v2396_v13, %v7444_v45  ;;  %v2333_v29 = vsel %vm2285_vm8, %v2260_v19, %v7449_v44  ;;  %v7450_v13 = vld [vmem:[#allocation127_spill] sm:$0xff] }
 0x31e   :  { %v2398_v45 = vsel %vm2350_vm9, %v2333_v29, %v7450_v13 }
 0x320   :  { %v1959_v0 = vpop.permute.xlu1 %1958 }
 0x321   :  { %v1945_v27 = vpop.permute.xlu0 %1944  ;;  %v2526_v47 = vsel %vm2480_vm10, %v2461_v55, %v1959_v0  ;;  %v7451_v55 = vld [vmem:[#allocation136_spill] sm:$0xff] }
 0x322   :  { %v2512_v20 = vsel %vm2480_vm10, %v2447_v31, %v1945_v27 }
 0x323   :  { %v2577_v53 = vsel %vm2545_vm12, %v2512_v20, %v2015_v15  ;;  %v3756_v15 = vld [vmem:[%s7020_s0 + $0x168] sm:$0xff]  ;;  %v2181_v38 = vpop.permute.xlu2 %2180 }
 0x324   :  { %v2642_v11 = vsel %vm2610_vm13, %v2577_v53, %v2085_v46  ;;  %v2275_v28 = vsel %vm2188_vm7, %v3756_v15, %v7445_v1  ;;  %v7453_v1 = vld [vmem:[#allocation4_spill] sm:$0xff] }
 0x325   :  { %v2343_v9 = vsel %vm2285_vm8, %v2275_v28, %v7446_v32 }
 0x326   :  { %v6487_v57 = vpop.f32.mrf.mxu2  ;;  %v2408_v50 = vsel %vm2350_vm9, %v2343_v9, %v7447_v22 }
 0x327   :  { %3034 = vst.msk [vmem:[%s7022_s2 + $0x120] sm:$0xff] %vm2415_vm11, %v6487_v57  ;;  %v2473_v0 = vsel %vm2415_vm11, %v2408_v50, %v5628_v33 }
 0x328   :  { %v2041_v39 = vpop.permute.xlu1 %2040 }
 0x329   :  { %v2155_v34 = vpop.permute.xlu0 %2154 }
 0x32a   :  { %v2707_v49 = vsel %vm2675_vm14, %v2642_v11, %v2155_v34 }
 0x32b   :  { %3607 = vmatmul.msk.bf16.gmra.mxu1 %vm2760_vm15, %v2707_v49  ;;  %v1973_v34 = vpop.permute.xlu2 %1972 }
 0x32d   :  { %v6504_v52 = vpop.f32.mrf.mxu3 }
 0x32e   :  { %3046 = vst.msk [vmem:[%s7022_s2 + $0x180] sm:$0xff] %vm2415_vm11, %v6504_v52  ;;  %v6513_v4 = vpop.f32.mrf.mxu2 }
 0x32f   :  { %3035 = vst.msk [vmem:[%s7022_s2 + $0x128] sm:$0xff] %vm2415_vm11, %v6513_v4 }
 0x330   :  { %v2169_v63 = vpop.permute.xlu1 %2168 }
 0x331   :  { %v2029_v35 = vpop.permute.xlu0 %2028  ;;  %v2868_v25 = vpop.f32.mrf.mxu0 }
 0x332   :  { %v2591_v46 = vsel %vm2545_vm12, %v2526_v47, %v2029_v35  ;;  %3010 = vst.msk [vmem:[%s7022_s2 + $0x60] sm:$0xff] %vm2415_vm11, %v2868_v25  ;;  %v3085_v10 = vsel %vm2415_vm11, %v2868_v25, 0.0  ;;  %v3207_v16 = vmul.f32 %v2868_v25, %v2868_v25 }
 0x333   :  { %v2656_v17 = vsel %vm2610_vm13, %v2591_v46, %v2099_v37  ;;  %v3086_v8 = vadd.f32 %v3085_v10, %v3084_v3  ;;  %v2538_v3 = vsel %vm2480_vm10, %v2473_v0, %v1971_v23  ;;  %v2101_v47 = vpop.permute.xlu2 %2100  ;;  %v3758_v10 = vld [vmem:[%s7020_s0 + $0x174] sm:$0xff] }
 0x334   :  { %v2721_v42 = vsel %vm2675_vm14, %v2656_v17, %v2169_v63  ;;  %v3282_v54 = vsel %vm2415_vm11, %v3207_v16, 0.0  ;;  %v2603_v12 = vsel %vm2545_vm12, %v2538_v3, %v2041_v39  ;;  %v2463_v63 = vsel %vm2415_vm11, %v2398_v45, %v7451_v55  ;;  %v7452_v16 = vld [vmem:[#allocation67_spill] sm:$0xff] }
 0x335   :  { %3614 = vmatmul.msk.bf16.gmra.mxu2 %vm2760_vm15, %v2721_v42  ;;  %v6542_v40 = vpop.f32.mrf.mxu3  ;;  %v3283_v30 = vadd.f32 %v3282_v54, %v3281_v41  ;;  %v2278_v17 = vsel %vm2188_vm7, %v3758_v10, %v7452_v16  ;;  %v7459_v10 = vld [vmem:[#allocation7_spill] sm:$0xff] }
 0x336   :  { %3047 = vst.msk [vmem:[%s7022_s2 + $0x188] sm:$0xff] %vm2415_vm11, %v6542_v40  ;;  %v2345_v28 = vsel %vm2285_vm8, %v2278_v17, %v7453_v1  ;;  %v7460_v1 = vld [vmem:[#allocation126_spill] sm:$0xff] }
 0x338   :  { %v1961_v6 = vpop.permute.xlu1 %1960 }
 0x339   :  { %v6553_v27 = vpop.f32.mrf.mxu1  ;;  %v2111_v24 = vpop.permute.xlu0 %2110  ;;  %v2528_v35 = vsel %vm2480_vm10, %v2463_v63, %v1961_v6 }
 0x33a   :  { %3022 = vst.msk [vmem:[%s7022_s2 + $0xc0] sm:$0xff] %vm2415_vm11, %v6553_v27  ;;  %v2668_v33 = vsel %vm2610_vm13, %v2603_v12, %v2111_v24  ;;  %v2870_v41 = vpop.f32.mrf.mxu0 }
 0x33b   :  { %v2733_v31 = vsel %vm2675_vm14, %v2668_v33, %v2181_v38  ;;  %3011 = vst.msk [vmem:[%s7022_s2 + $0x68] sm:$0xff] %vm2415_vm11, %v2870_v41  ;;  %v3087_v23 = vsel %vm2415_vm11, %v2870_v41, 0.0  ;;  %v3208_v20 = vmul.f32 %v2870_v41, %v2870_v41  ;;  %v2183_v0 = vpop.permute.xlu2 %2182  ;;  %v7455_v33 = vld [vmem:[#allocation83_spill] sm:$0xff] }
 0x33c   :  { %3620 = vmatmul.msk.bf16.gmra.mxu3 %vm2760_vm15, %v2733_v31  ;;  %v6568_v53 = vadd.f32 %v3087_v23, %v3086_v8  ;;  %v7454_v8 = vld [vmem:[#allocation40_spill] sm:$0xff]  ;;  %v2281_v41 = vsel %vm2188_vm7, %v6040_v7, %v7455_v33  ;;  %v7456_v23 = vld [vmem:[#allocation109_spill] sm:$0xff] }
 0x33d   :  { %v3284_v39 = vsel %vm2415_vm11, %v3208_v20, 0.0  ;;  %v2410_v42 = vsel %vm2350_vm9, %v2345_v28, %v7454_v8  ;;  %v2347_v20 = vsel %vm2285_vm8, %v2281_v41, %v7456_v23 }
 0x33e   :  { %v6571_v11 = vadd.f32 %v3284_v39, %v3283_v30 }
 0x340   :  { %v2043_v37 = vpop.permute.xlu1 %2042 }
 0x341   :  { %v6573_v49 = vpop.f32.mrf.mxu1  ;;  %v1903_v62 = vpop.permute.xlu0 %1902 }
 0x342   :  { %3023 = vst.msk [vmem:[%s7022_s2 + $0xc8] sm:$0xff] %vm2415_vm11, %v6573_v49  ;;  %v2475_v9 = vsel %vm2415_vm11, %v2410_v42, %v1903_v62  ;;  %v3211_v42 = vmul.f32 %v6052_v43, %v6052_v43 }
 0x343   :  { %v2540_v54 = vsel %vm2480_vm10, %v2475_v9, %v1973_v34  ;;  %v7457_v34 = vld [vmem:[#allocation129_spill] sm:$0xff]  ;;  %v2045_v14 = vpop.permute.xlu2 %2044 }
 0x344   :  { %v2605_v50 = vsel %vm2545_vm12, %v2540_v54, %v2043_v37  ;;  %v2412_v37 = vsel %vm2350_vm9, %v2347_v20, %v7457_v34  ;;  %v3290_v23 = vsel %vm2415_vm11, %v3211_v42, 0.0  ;;  %v3095_v20 = vsel %vm2415_vm11, %v6081_v18, 0.0 }
 0x345   :  { %v3218_v42 = vmul.f32 %v6440_v61, %v6440_v61 }
 0x348   :  { %v2171_v25 = vpop.permute.xlu1 %2170 }
 0x349   :  { %v2031_v46 = vpop.permute.xlu0 %2030 }
 0x34a   :  { %v2593_v15 = vsel %vm2545_vm12, %v2528_v35, %v2031_v46  ;;  %v7458_v46 = vld [vmem:[#allocation82_spill] sm:$0xff] }
 0x34b   :  { %v2658_v38 = vsel %vm2610_vm13, %v2593_v15, %v2101_v47  ;;  %v1907_v47 = vpop.permute.xlu2 %1906 }
 0x34c   :  { %v2723_v32 = vsel %vm2675_vm14, %v2658_v38, %v2171_v25  ;;  %v2284_v25 = vsel %vm2188_vm7, %v6145_v51, %v7458_v46 }
 0x34d   :  { %3615 = vmatmul.msk.bf16.gmra.mxu2 %vm2760_vm15, %v2723_v32  ;;  %v2349_v16 = vsel %vm2285_vm8, %v2284_v25, %v7459_v10  ;;  %v3101_v25 = vsel %vm2415_vm11, %v6295_v5, 0.0  ;;  %v3216_v10 = vmul.f32 %v6337_v26, %v6337_v26 }
 0x34e   :  { %v2414_v28 = vsel %vm2350_vm9, %v2349_v16, %v7460_v1  ;;  %v3103_v1 = vsel %vm2415_vm11, %v6337_v26, 0.0 }
 0x34f   :  { %v2479_v32 = vsel %vm2415_vm11, %v2414_v28, %v1907_v47  ;;  %v3217_v28 = vmul.f32 %v6414_v58, %v6414_v58 }
 0x350   :  { %v6607_v22 = vpop.f32.mrf.mxu3  ;;  %v1975_v24 = vpop.permute.xlu1 %1974 }
 0x351   :  { %v2113_v30 = vpop.permute.xlu0 %2112  ;;  %3048 = vst.msk [vmem:[%s7022_s2 + $0x190] sm:$0xff] %vm2415_vm11, %v6607_v22  ;;  %v3302_v26 = vsel %vm2415_vm11, %v3217_v28, 0.0 }
 0x352   :  { %v2670_v3 = vsel %vm2610_vm13, %v2605_v50, %v2113_v30 }
 0x353   :  { %v2735_v6 = vsel %vm2675_vm14, %v2670_v3, %v2183_v0  ;;  %v3093_v3 = vsel %vm2415_vm11, %v6052_v43, 0.0  ;;  %v2117_v34 = vpop.permute.xlu2 %2116 }
 0x354   :  { %3621 = vmatmul.msk.bf16.gmra.mxu3 %vm2760_vm15, %v2735_v6  ;;  %v3212_v6 = vmul.f32 %v6081_v18, %v6081_v18 }
 0x356   :  { %v6618_v12 = vpop.f32.mrf.mxu2 }
 0x357   :  { %3036 = vst.msk [vmem:[%s7022_s2 + $0x130] sm:$0xff] %vm2415_vm11, %v6618_v12 }
 0x358   :  { %v6628_v31 = vpop.f32.mrf.mxu3  ;;  %v2185_v19 = vpop.permute.xlu1 %2184 }
 0x359   :  { %v1905_v39 = vpop.permute.xlu0 %1904  ;;  %3049 = vst.msk [vmem:[%s7022_s2 + $0x198] sm:$0xff] %vm2415_vm11, %v6628_v31 }
 0x35a   :  { %v2477_v62 = vsel %vm2415_vm11, %v2412_v37, %v1905_v39 }
 0x35b   :  { %v2542_v7 = vsel %vm2480_vm10, %v2477_v62, %v1975_v24  ;;  %v3292_v62 = vsel %vm2415_vm11, %v3212_v6, 0.0  ;;  %v3220_v6 = vmul.f32 %v6573_v49, %v6573_v49 }
 0x35c   :  { %v2607_v29 = vsel %vm2545_vm12, %v2542_v7, %v2045_v14  ;;  %v3097_v14 = vsel %vm2415_vm11, %v6128_v36, 0.0  ;;  %v3214_v7 = vmul.f32 %v6169_v60, %v6169_v60 }
 0x35e   :  { %v6641_v48 = vpop.f32.mrf.mxu2  ;;  %v3296_v46 = vsel %vm2415_vm11, %v3214_v7, 0.0 }
 0x35f   :  { %3037 = vst.msk [vmem:[%s7022_s2 + $0x138] sm:$0xff] %vm2415_vm11, %v6641_v48 }
 0x360   :  { %v2047_v0 = vpop.permute.xlu1 %2046 }
 0x361   :  { %v2873_v44 = vpop.f32.mrf.mxu0  ;;  %v2115_v13 = vpop.permute.xlu0 %2114 }
 0x362   :  { %3012 = vst.msk [vmem:[%s7022_s2 + $0x70] sm:$0xff] %vm2415_vm11, %v2873_v44  ;;  %v2672_v45 = vsel %vm2610_vm13, %v2607_v29, %v2115_v13  ;;  %v3209_v63 = vmul.f32 %v2873_v44, %v2873_v44  ;;  %v3089_v35 = vsel %vm2415_vm11, %v2873_v44, 0.0 }
 0x363   :  { %v2737_v55 = vsel %vm2675_vm14, %v2672_v45, %v2185_v19  ;;  %v3090_v38 = vadd.f32 %v3089_v35, %v6568_v53 }
 0x364   :  { %3622 = vmatmul.msk.bf16.gmra.mxu3 %vm2760_vm15, %v2737_v55  ;;  %v3286_v17 = vsel %vm2415_vm11, %v3209_v63, 0.0  ;;  %v3099_v55 = vsel %vm2415_vm11, %v6169_v60, 0.0 }
 0x365   :  { %v3287_v54 = vadd.f32 %v3286_v17, %v6571_v11  ;;  %v3213_v11 = vmul.f32 %v6128_v36, %v6128_v36  ;;  %v3215_v36 = vmul.f32 %v6295_v5, %v6295_v5  ;;  %v3105_v5 = vsel %vm2415_vm11, %v6414_v58, 0.0 }
 0x366   :  { %v3219_v58 = vmul.f32 %v6553_v27, %v6553_v27 }
 0x367   :  { %v3294_v45 = vsel %vm2415_vm11, %v3213_v11, 0.0  ;;  %v3298_v60 = vsel %vm2415_vm11, %v3215_v36, 0.0 }
 0x368   :  { %v6663_v15 = vpop.f32.mrf.mxu1 }
 0x369   :  { %3024 = vst.msk [vmem:[%s7022_s2 + $0xd0] sm:$0xff] %vm2415_vm11, %v6663_v15  ;;  %v2875_v8 = vpop.f32.mrf.mxu0  ;;  %v1977_v51 = vpop.permute.xlu0 %1976 }
 0x36a   :  { %3013 = vst.msk [vmem:[%s7022_s2 + $0x78] sm:$0xff] %vm2415_vm11, %v2875_v8  ;;  %v3091_v53 = vsel %vm2415_vm11, %v2875_v8, 0.0  ;;  %v3210_v9 = vmul.f32 %v2875_v8, %v2875_v8  ;;  %v2544_v30 = vsel %vm2480_vm10, %v2479_v32, %v1977_v51  ;;  %v3300_v51 = vsel %vm2415_vm11, %v3216_v10, 0.0 }
 0x36b   :  { %v3092_v50 = vadd.f32 %v3091_v53, %v3090_v38  ;;  %v2609_v39 = vsel %vm2545_vm12, %v2544_v30, %v2047_v0  ;;  %v3304_v0 = vsel %vm2415_vm11, %v3218_v42, 0.0 }
 0x36c   :  { %v3288_v24 = vsel %vm2415_vm11, %v3210_v9, 0.0  ;;  %v2674_v18 = vsel %vm2610_vm13, %v2609_v39, %v2117_v34  ;;  %v3308_v34 = vsel %vm2415_vm11, %v3220_v6, 0.0 }
 0x36d   :  { %v3094_v33 = vadd.f32 %v3093_v3, %v3092_v50  ;;  %v3289_v41 = vadd.f32 %v3288_v24, %v3287_v54  ;;  %v3107_v54 = vsel %vm2415_vm11, %v6440_v61, 0.0  ;;  %v3109_v3 = vsel %vm2415_vm11, %v6553_v27, 0.0 }
 0x36e   :  { %v3111_v61 = vsel %vm2415_vm11, %v6573_v49, 0.0  ;;  %v3113_v27 = vsel %vm2415_vm11, %v6663_v15, 0.0 }
 0x36f   :  { %v3096_v37 = vadd.f32 %v3095_v20, %v3094_v33  ;;  %v3291_v43 = vadd.f32 %v3290_v23, %v3289_v41  ;;  %v3306_v41 = vsel %vm2415_vm11, %v3219_v58, 0.0  ;;  %v3221_v23 = vmul.f32 %v6663_v15, %v6663_v15 }
 0x370   :  { %v2905_v19 = vpop.f32.mrf.mxu1 }
 0x371   :  { %v3098_v44 = vadd.f32 %v3097_v14, %v3096_v37  ;;  %v3293_v29 = vadd.f32 %v3292_v62, %v3291_v43  ;;  %3025 = vst.msk [vmem:[%s7022_s2 + $0xd8] sm:$0xff] %vm2415_vm11, %v2905_v19  ;;  %v2187_v13 = vpop.permute.xlu0 %2186  ;;  %v3222_v37 = vmul.f32 %v2905_v19, %v2905_v19  ;;  %v3310_v14 = vsel %vm2415_vm11, %v3221_v23, 0.0 }
 0x372   :  { %v2739_v63 = vsel %vm2675_vm14, %v2674_v18, %v2187_v13  ;;  %v3115_v15 = vsel %vm2415_vm11, %v2905_v19, 0.0  ;;  %v3229_v23 = vmul.f32 %v6391_v56, %v6391_v56 }
 0x373   :  { %v3100_v47 = vadd.f32 %v3099_v55, %v3098_v44  ;;  %v3295_v35 = vadd.f32 %v3294_v45, %v3293_v29  ;;  %v3312_v29 = vsel %vm2415_vm11, %v3222_v37, 0.0 }
 0x374   :  { %3623 = vmatmul.msk.bf16.gmra.mxu3 %vm2760_vm15, %v2739_v63 }
 0x375   :  { %v3102_v16 = vadd.f32 %v3101_v25, %v3100_v47  ;;  %v3297_v17 = vadd.f32 %v3296_v46, %v3295_v35 }
 0x377   :  { %v3104_v38 = vadd.f32 %v3103_v1, %v3102_v16  ;;  %v3299_v8 = vadd.f32 %v3298_v60, %v3297_v17 }
 0x378   :  { %v6726_v32 = vpop.f32.mrf.mxu2 }
 0x379   :  { %v3301_v53 = vadd.f32 %v3300_v51, %v3299_v8  ;;  %v3106_v9 = vadd.f32 %v3105_v5, %v3104_v38  ;;  %3038 = vst.msk [vmem:[%s7022_s2 + $0x140] sm:$0xff] %vm2415_vm11, %v6726_v32 }
 0x37b   :  { %v3108_v50 = vadd.f32 %v3107_v54, %v3106_v9  ;;  %v3303_v30 = vadd.f32 %v3302_v26, %v3301_v53  ;;  %v3227_v26 = vmul.f32 %v6233_v2, %v6233_v2 }
 0x37d   :  { %v3110_v24 = vadd.f32 %v3109_v3, %v3108_v50  ;;  %v3305_v33 = vadd.f32 %v3304_v0, %v3303_v30  ;;  %v3125_v0 = vsel %vm2415_vm11, %v6233_v2, 0.0  ;;  %v3228_v3 = vmul.f32 %v6283_v21, %v6283_v21 }
 0x37e   :  { %v3129_v2 = vsel %vm2415_vm11, %v6391_v56, 0.0 }
 0x37f   :  { %v3112_v20 = vadd.f32 %v3111_v61, %v3110_v24  ;;  %v3307_v11 = vadd.f32 %v3306_v41, %v3305_v33  ;;  %v6748_v39 = vpop.f32.mrf.mxu3  ;;  %v3322_v41 = vsel %vm2415_vm11, %v3227_v26, 0.0  ;;  %v3127_v61 = vsel %vm2415_vm11, %v6283_v21, 0.0 }
 0x380   :  { %3050 = vst.msk [vmem:[%s7022_s2 + $0x1a0] sm:$0xff] %vm2415_vm11, %v6748_v39  ;;  %v6758_v49 = vpop.f32.mrf.mxu2  ;;  %v3131_v21 = vsel %vm2415_vm11, %v6404_v59, 0.0 }
 0x381   :  { %v3114_v43 = vadd.f32 %v3113_v27, %v3112_v20  ;;  %v3309_v62 = vadd.f32 %v3308_v34, %v3307_v11  ;;  %3039 = vst.msk [vmem:[%s7022_s2 + $0x148] sm:$0xff] %vm2415_vm11, %v6758_v49  ;;  %v3324_v34 = vsel %vm2415_vm11, %v3228_v3, 0.0  ;;  %v3230_v27 = vmul.f32 %v6404_v59, %v6404_v59 }
 0x383   :  { %v3116_v7 = vadd.f32 %v3115_v15, %v3114_v43  ;;  %v3311_v44 = vadd.f32 %v3310_v14, %v3309_v62  ;;  %v3326_v14 = vsel %vm2415_vm11, %v3229_v23, 0.0  ;;  %v3231_v15 = vmul.f32 %v6487_v57, %v6487_v57 }
 0x385   :  { %v3313_v18 = vadd.f32 %v3312_v29, %v3311_v44  ;;  %v3328_v44 = vsel %vm2415_vm11, %v3230_v27, 0.0  ;;  %v3133_v29 = vsel %vm2415_vm11, %v6487_v57, 0.0  ;;  %v3137_v57 = vsel %vm2415_vm11, %v6618_v12, 0.0 }
 0x387   :  { %v6768_v13 = vpop.f32.mrf.mxu3 }
 0x388   :  { %3051 = vst.msk [vmem:[%s7022_s2 + $0x1a8] sm:$0xff] %vm2415_vm11, %v6768_v13  ;;  %v2908_v45 = vpop.f32.mrf.mxu1 }
 0x389   :  { %3026 = vst.msk [vmem:[%s7022_s2 + $0xe0] sm:$0xff] %vm2415_vm11, %v2908_v45  ;;  %v3223_v47 = vmul.f32 %v2908_v45, %v2908_v45  ;;  %v3117_v25 = vsel %vm2415_vm11, %v2908_v45, 0.0 }
 0x38a   :  { %v3118_v1 = vadd.f32 %v3117_v25, %v3116_v7 }
 0x38b   :  { %v3314_v16 = vsel %vm2415_vm11, %v3223_v47, 0.0  ;;  %v3135_v47 = vsel %vm2415_vm11, %v6513_v4, 0.0 }
 0x38c   :  { %v3315_v8 = vadd.f32 %v3314_v16, %v3313_v18  ;;  %v3232_v18 = vmul.f32 %v6513_v4, %v6513_v4 }
 0x38e   :  { %v3332_v16 = vsel %vm2415_vm11, %v3232_v18, 0.0 }
 0x390   :  { %v2910_v19 = vpop.f32.mrf.mxu1 }
 0x391   :  { %3027 = vst.msk [vmem:[%s7022_s2 + $0xe8] sm:$0xff] %vm2415_vm11, %v2910_v19  ;;  %v3224_v10 = vmul.f32 %v2910_v19, %v2910_v19  ;;  %v3119_v17 = vsel %vm2415_vm11, %v2910_v19, 0.0  ;;  %v3330_v19 = vsel %vm2415_vm11, %v3231_v15, 0.0 }
 0x392   :  { %v3120_v51 = vadd.f32 %v3119_v17, %v3118_v1  ;;  %v3234_v17 = vmul.f32 %v6641_v48, %v6641_v48 }
 0x393   :  { %v3316_v28 = vsel %vm2415_vm11, %v3224_v10, 0.0 }
 0x394   :  { %v3317_v42 = vadd.f32 %v3316_v28, %v3315_v8  ;;  %v3139_v8 = vsel %vm2415_vm11, %v6641_v48, 0.0 }
 0x398   :  { %v6783_v55 = vpop.f32.mrf.mxu2 }
 0x399   :  { %3040 = vst.msk [vmem:[%s7022_s2 + $0x150] sm:$0xff] %vm2415_vm11, %v6783_v55  ;;  %v3237_v3 = vmul.f32 %v6783_v55, %v6783_v55 }
 0x39f   :  { %v6790_v36 = vpop.f32.mrf.mxu3 }
 0x3a0   :  { %3052 = vst.msk [vmem:[%s7022_s2 + $0x1b0] sm:$0xff] %vm2415_vm11, %v6790_v36  ;;  %v6797_v63 = vpop.f32.mrf.mxu2 }
 0x3a1   :  { %3041 = vst.msk [vmem:[%s7022_s2 + $0x158] sm:$0xff] %vm2415_vm11, %v6797_v63  ;;  %v3147_v23 = vsel %vm2415_vm11, %v6797_v63, 0.0 }
 0x3a7   :  { %v6804_v35 = vpop.f32.mrf.mxu3 }
 0x3a8   :  { %3053 = vst.msk [vmem:[%s7022_s2 + $0x1b8] sm:$0xff] %vm2415_vm11, %v6804_v35  ;;  %v2913_v46 = vpop.f32.mrf.mxu1 }
 0x3a9   :  { %3028 = vst.msk [vmem:[%s7022_s2 + $0xf0] sm:$0xff] %vm2415_vm11, %v2913_v46  ;;  %v3225_v60 = vmul.f32 %v2913_v46, %v2913_v46  ;;  %v3121_v38 = vsel %vm2415_vm11, %v2913_v46, 0.0  ;;  %v3233_v46 = vmul.f32 %v6618_v12, %v6618_v12  ;;  %v3235_v12 = vmul.f32 %v6726_v32, %v6726_v32 }
 0x3aa   :  { %v3122_v53 = vadd.f32 %v3121_v38, %v3120_v51 }
 0x3ab   :  { %v3318_v5 = vsel %vm2415_vm11, %v3225_v60, 0.0  ;;  %v3334_v38 = vsel %vm2415_vm11, %v3233_v46, 0.0 }
 0x3ac   :  { %v3319_v50 = vadd.f32 %v3318_v5, %v3317_v42  ;;  %v3336_v42 = vsel %vm2415_vm11, %v3234_v17, 0.0 }
 0x3b0   :  { %v2915_v9 = vpop.f32.mrf.mxu1 }
 0x3b1   :  { %3029 = vst.msk [vmem:[%s7022_s2 + $0xf8] sm:$0xff] %vm2415_vm11, %v2915_v9  ;;  %v3123_v54 = vsel %vm2415_vm11, %v2915_v9, 0.0  ;;  %v3226_v58 = vmul.f32 %v2915_v9, %v2915_v9  ;;  %v3236_v9 = vmul.f32 %v6758_v49, %v6758_v49 }
 0x3b2   :  { %v3124_v30 = vadd.f32 %v3123_v54, %v3122_v53  ;;  %v3141_v53 = vsel %vm2415_vm11, %v6726_v32, 0.0  ;;  %v3338_v54 = vsel %vm2415_vm11, %v3235_v12, 0.0 }
 0x3b3   :  { %v3320_v6 = vsel %vm2415_vm11, %v3226_v58, 0.0  ;;  %v3143_v58 = vsel %vm2415_vm11, %v6758_v49, 0.0 }
 0x3b4   :  { %v3126_v24 = vadd.f32 %v3125_v0, %v3124_v30  ;;  %v3321_v33 = vadd.f32 %v3320_v6, %v3319_v50  ;;  %v3340_v0 = vsel %vm2415_vm11, %v3236_v9, 0.0 }
 0x3b6   :  { %v3128_v20 = vadd.f32 %v3127_v61, %v3126_v24  ;;  %v3323_v11 = vadd.f32 %v3322_v41, %v3321_v33  ;;  %v3145_v24 = vsel %vm2415_vm11, %v6783_v55, 0.0  ;;  %v3342_v33 = vsel %vm2415_vm11, %v3237_v3, 0.0 }
 0x3b7   :  { %v3238_v41 = vmul.f32 %v6797_v63, %v6797_v63 }
 0x3b8   :  { %v3130_v37 = vadd.f32 %v3129_v2, %v3128_v20  ;;  %v3325_v43 = vadd.f32 %v3324_v34, %v3323_v11  ;;  %v2948_v62 = vpop.f32.mrf.mxu2 }
 0x3b9   :  { %3042 = vst.msk [vmem:[%s7022_s2 + $0x160] sm:$0xff] %vm2415_vm11, %v2948_v62  ;;  %v3344_v11 = vsel %vm2415_vm11, %v3238_v41, 0.0  ;;  %v3239_v34 = vmul.f32 %v2948_v62, %v2948_v62 }
 0x3ba   :  { %v3132_v56 = vadd.f32 %v3131_v21, %v3130_v37  ;;  %v3327_v7 = vadd.f32 %v3326_v14, %v3325_v43  ;;  %v3149_v37 = vsel %vm2415_vm11, %v2948_v62, 0.0 }
 0x3bb   :  { %v3346_v43 = vsel %vm2415_vm11, %v3239_v34, 0.0 }
 0x3bc   :  { %v3134_v45 = vadd.f32 %v3133_v29, %v3132_v56  ;;  %v3329_v59 = vadd.f32 %v3328_v44, %v3327_v7 }
 0x3be   :  { %v3136_v25 = vadd.f32 %v3135_v47, %v3134_v45  ;;  %v3331_v10 = vadd.f32 %v3330_v19, %v3329_v59  ;;  %v3243_v19 = vmul.f32 %v6504_v52, %v6504_v52 }
 0x3bf   :  { %v6867_v60 = vpop.f32.mrf.mxu3 }
 0x3c0   :  { %v3333_v1 = vadd.f32 %v3332_v16, %v3331_v10  ;;  %v3138_v28 = vadd.f32 %v3137_v57, %v3136_v25  ;;  %3054 = vst.msk [vmem:[%s7022_s2 + $0x1c0] sm:$0xff] %vm2415_vm11, %v6867_v60  ;;  %v2950_v4 = vpop.f32.mrf.mxu2  ;;  %v3157_v16 = vsel %vm2415_vm11, %v6504_v52, 0.0  ;;  %v3244_v57 = vmul.f32 %v6542_v40, %v6542_v40 }
 0x3c1   :  { %3043 = vst.msk [vmem:[%s7022_s2 + $0x168] sm:$0xff] %vm2415_vm11, %v2950_v4  ;;  %v3240_v14 = vmul.f32 %v2950_v4, %v2950_v4  ;;  %v3151_v63 = vsel %vm2415_vm11, %v2950_v4, 0.0  ;;  %v3354_v4 = vsel %vm2415_vm11, %v3243_v19, 0.0  ;;  %v3161_v52 = vsel %vm2415_vm11, %v6607_v22, 0.0 }
 0x3c2   :  { %v3140_v51 = vadd.f32 %v3139_v8, %v3138_v28  ;;  %v3335_v5 = vadd.f32 %v3334_v38, %v3333_v1  ;;  %v3159_v38 = vsel %vm2415_vm11, %v6542_v40, 0.0  ;;  %v3245_v8 = vmul.f32 %v6607_v22, %v6607_v22 }
 0x3c3   :  { %v3348_v44 = vsel %vm2415_vm11, %v3240_v14, 0.0 }
 0x3c4   :  { %v3142_v26 = vadd.f32 %v3141_v53, %v3140_v51  ;;  %v3337_v48 = vadd.f32 %v3336_v42, %v3335_v5  ;;  %v3356_v5 = vsel %vm2415_vm11, %v3244_v57, 0.0  ;;  %v3246_v42 = vmul.f32 %v6628_v31, %v6628_v31 }
 0x3c5   :  { %v3358_v40 = vsel %vm2415_vm11, %v3245_v8, 0.0 }
 0x3c6   :  { %v3144_v50 = vadd.f32 %v3143_v58, %v3142_v26  ;;  %v3339_v30 = vadd.f32 %v3338_v54, %v3337_v48  ;;  %v3163_v48 = vsel %vm2415_vm11, %v6628_v31, 0.0  ;;  %v3247_v54 = vmul.f32 %v6748_v39, %v6748_v39 }
 0x3c7   :  { %v6894_v6 = vpop.f32.mrf.mxu3  ;;  %v3167_v31 = vsel %vm2415_vm11, %v6768_v13, 0.0 }
 0x3c8   :  { %v3341_v32 = vadd.f32 %v3340_v0, %v3339_v30  ;;  %3055 = vst.msk [vmem:[%s7022_s2 + $0x1c8] sm:$0xff] %vm2415_vm11, %v6894_v6  ;;  %v3146_v49 = vadd.f32 %v3145_v24, %v3144_v50  ;;  %v3360_v50 = vsel %vm2415_vm11, %v3246_v42, 0.0  ;;  %v3165_v30 = vsel %vm2415_vm11, %v6748_v39, 0.0 }
 0x3c9   :  { %v3248_v0 = vmul.f32 %v6768_v13, %v6768_v13  ;;  %v3362_v24 = vsel %vm2415_vm11, %v3247_v54, 0.0  ;;  %v3169_v39 = vsel %vm2415_vm11, %v6790_v36, 0.0  ;;  %v3252_v14 = vmul.f32 %v6894_v6, %v6894_v6 }
 0x3ca   :  { %v3343_v61 = vadd.f32 %v3342_v33, %v3341_v32  ;;  %v3148_v20 = vadd.f32 %v3147_v23, %v3146_v49  ;;  %v3249_v49 = vmul.f32 %v6790_v36, %v6790_v36  ;;  %v3250_v23 = vmul.f32 %v6804_v35, %v6804_v35 }
 0x3cc   :  { %v3345_v2 = vadd.f32 %v3344_v11, %v3343_v61  ;;  %v3150_v55 = vadd.f32 %v3149_v37, %v3148_v20  ;;  %v3364_v61 = vsel %vm2415_vm11, %v3248_v0, 0.0  ;;  %v3366_v13 = vsel %vm2415_vm11, %v3249_v49, 0.0 }
 0x3ce   :  { %v3347_v15 = vadd.f32 %v3346_v43, %v3345_v2  ;;  %v3152_v7 = vadd.f32 %v3151_v63, %v3150_v55  ;;  %v3171_v2 = vsel %vm2415_vm11, %v6804_v35, 0.0  ;;  %v3368_v55 = vsel %vm2415_vm11, %v3250_v23, 0.0 }
 0x3cf   :  { %v3173_v43 = vsel %vm2415_vm11, %v6867_v60, 0.0  ;;  %v3175_v35 = vsel %vm2415_vm11, %v6894_v6, 0.0 }
 0x3d0   :  { %v2953_v27 = vpop.f32.mrf.mxu2  ;;  %v3349_v18 = vadd.f32 %v3348_v44, %v3347_v15 }
 0x3d1   :  { %3044 = vst.msk [vmem:[%s7022_s2 + $0x170] sm:$0xff] %vm2415_vm11, %v2953_v27  ;;  %v3241_v21 = vmul.f32 %v2953_v27, %v2953_v27  ;;  %v3153_v56 = vsel %vm2415_vm11, %v2953_v27, 0.0  ;;  %v3251_v27 = vmul.f32 %v6867_v60, %v6867_v60 }
 0x3d2   :  { %v3154_v45 = vadd.f32 %v3153_v56, %v3152_v7 }
 0x3d3   :  { %v3350_v62 = vsel %vm2415_vm11, %v3241_v21, 0.0  ;;  %v3370_v63 = vsel %vm2415_vm11, %v3251_v27, 0.0 }
 0x3d4   :  { %v3351_v25 = vadd.f32 %v3350_v62, %v3349_v18  ;;  %v3372_v62 = vsel %vm2415_vm11, %v3252_v14, 0.0 }
 0x3d7   :  { %v6919_v29 = vpop.f32.mrf.mxu3 }
 0x3d8   :  { %3056 = vst.msk [vmem:[%s7022_s2 + $0x1d0] sm:$0xff] %vm2415_vm11, %v6919_v29  ;;  %v2955_v59 = vpop.f32.mrf.mxu2  ;;  %v3253_v56 = vmul.f32 %v6919_v29, %v6919_v29  ;;  %v3177_v60 = vsel %vm2415_vm11, %v6919_v29, 0.0 }
 0x3d9   :  { %3045 = vst.msk [vmem:[%s7022_s2 + $0x178] sm:$0xff] %vm2415_vm11, %v2955_v59  ;;  %v3155_v47 = vsel %vm2415_vm11, %v2955_v59, 0.0  ;;  %v3242_v46 = vmul.f32 %v2955_v59, %v2955_v59 }
 0x3da   :  { %v3156_v10 = vadd.f32 %v3155_v47, %v3154_v45  ;;  %v3374_v6 = vsel %vm2415_vm11, %v3253_v56, 0.0 }
 0x3db   :  { %v3352_v17 = vsel %vm2415_vm11, %v3242_v46, 0.0 }
 0x3dc   :  { %v3158_v1 = vadd.f32 %v3157_v16, %v3156_v10  ;;  %v3353_v28 = vadd.f32 %v3352_v17, %v3351_v25 }
 0x3de   :  { %v3160_v12 = vadd.f32 %v3159_v38, %v3158_v1  ;;  %v3355_v51 = vadd.f32 %v3354_v4, %v3353_v28 }
 0x3df   :  { %v2985_v53 = vpop.f32.mrf.mxu3 }
 0x3e0   :  { %v3162_v9 = vadd.f32 %v3161_v52, %v3160_v12  ;;  %v3357_v26 = vadd.f32 %v3356_v5, %v3355_v51  ;;  %3057 = vst.msk [vmem:[%s7022_s2 + $0x1d8] sm:$0xff] %vm2415_vm11, %v2985_v53  ;;  %v3254_v18 = vmul.f32 %v2985_v53, %v2985_v53  ;;  %v3179_v47 = vsel %vm2415_vm11, %v2985_v53, 0.0 }
 0x3e2   :  { %v3164_v22 = vadd.f32 %v3163_v48, %v3162_v9  ;;  %v3359_v58 = vadd.f32 %v3358_v40, %v3357_v26  ;;  %v3376_v16 = vsel %vm2415_vm11, %v3254_v18, 0.0 }
 0x3e4   :  { %v3166_v3 = vadd.f32 %v3165_v30, %v3164_v22  ;;  %v3361_v32 = vadd.f32 %v3360_v50, %v3359_v58 }
 0x3e6   :  { %v3168_v33 = vadd.f32 %v3167_v31, %v3166_v3  ;;  %v3363_v41 = vadd.f32 %v3362_v24, %v3361_v32 }
 0x3e7   :  { %v2988_v20 = vpop.f32.mrf.mxu3 }
 0x3e8   :  { %v3365_v11 = vadd.f32 %v3364_v61, %v3363_v41  ;;  %v3170_v34 = vadd.f32 %v3169_v39, %v3168_v33  ;;  %3058 = vst.msk [vmem:[%s7022_s2 + $0x1e0] sm:$0xff] %vm2415_vm11, %v2988_v20  ;;  %v3255_v10 = vmul.f32 %v2988_v20, %v2988_v20  ;;  %v3181_v29 = vsel %vm2415_vm11, %v2988_v20, 0.0 }
 0x3ea   :  { %v3172_v36 = vadd.f32 %v3171_v2, %v3170_v34  ;;  %v3367_v37 = vadd.f32 %v3366_v13, %v3365_v11  ;;  %v3378_v1 = vsel %vm2415_vm11, %v3255_v10, 0.0 }
 0x3ec   :  { %v3174_v21 = vadd.f32 %v3173_v43, %v3172_v36  ;;  %v3369_v15 = vadd.f32 %v3368_v55, %v3367_v37 }
 0x3ee   :  { %v3176_v7 = vadd.f32 %v3175_v35, %v3174_v21  ;;  %v3371_v44 = vadd.f32 %v3370_v63, %v3369_v15 }
 0x3ef   :  { %v2990_v45 = vpop.f32.mrf.mxu3 }
 0x3f0   :  { %v3178_v59 = vadd.f32 %v3177_v60, %v3176_v7  ;;  %v3373_v19 = vadd.f32 %v3372_v62, %v3371_v44  ;;  %3059 = vst.msk [vmem:[%s7022_s2 + $0x1e8] sm:$0xff] %vm2415_vm11, %v2990_v45  ;;  %v3256_v28 = vmul.f32 %v2990_v45, %v2990_v45  ;;  %v3183_v8 = vsel %vm2415_vm11, %v2990_v45, 0.0 }
 0x3f2   :  { %v3180_v46 = vadd.f32 %v3179_v47, %v3178_v59  ;;  %v3375_v25 = vadd.f32 %v3374_v6, %v3373_v19  ;;  %v3380_v51 = vsel %vm2415_vm11, %v3256_v28, 0.0 }
 0x3f4   :  { %v3377_v57 = vadd.f32 %v3376_v16, %v3375_v25  ;;  %v3182_v17 = vadd.f32 %v3181_v29, %v3180_v46 }
 0x3f6   :  { %v3379_v4 = vadd.f32 %v3378_v1, %v3377_v57  ;;  %v3184_v12 = vadd.f32 %v3183_v8, %v3182_v17 }
 0x3f7   :  { %v2993_v38 = vpop.f32.mrf.mxu3 }
 0x3f8   :  { %3060 = vst.msk [vmem:[%s7022_s2 + $0x1f0] sm:$0xff] %vm2415_vm11, %v2993_v38  ;;  %v3257_v5 = vmul.f32 %v2993_v38, %v2993_v38  ;;  %v3381_v52 = vadd.f32 %v3380_v51, %v3379_v4  ;;  %v3185_v42 = vsel %vm2415_vm11, %v2993_v38, 0.0 }
 0x3f9   :  { %v3186_v53 = vadd.f32 %v3185_v42, %v3184_v12 }
 0x3fa   :  { %v3382_v9 = vsel %vm2415_vm11, %v3257_v5, 0.0 }
 0x3fb   :  { %v3383_v26 = vadd.f32 %v3382_v9, %v3381_v52 }
 0x3ff   :  { %v2995_v40 = vpop.f32.mrf.mxu3 }
 0x400   :  { %3061 = vst.msk [vmem:[%s7022_s2 + $0x1f8] sm:$0xff] %vm2415_vm11, %v2995_v40  ;;  %v3187_v48 = vsel %vm2415_vm11, %v2995_v40, 0.0  ;;  %v3258_v54 = vmul.f32 %v2995_v40, %v2995_v40 }
 0x401   :  { %v3188_v22 = vadd.f32 %v3187_v48, %v3186_v53 }
 0x402   :  { %v3384_v58 = vsel %vm2415_vm11, %v3258_v54, 0.0 }
 0x403   :  { %v3189_v50 = vrot.slane %v3188_v22, 4  ;;  %v3385_v30 = vadd.f32 %v3384_v58, %v3383_v26 }
 0x405   :  { %v3190_v0 = vadd.f32 %v3189_v50, %v3188_v22  ;;  %v3386_v3 = vrot.slane %v3385_v30, 4 }
 0x407   :  { %v3191_v32 = vrot.slane %v3190_v0, 2  ;;  %v3387_v24 = vadd.f32 %v3386_v3, %v3385_v30 }
 0x409   :  { %v3192_v31 = vadd.f32 %v3191_v32, %v3190_v0  ;;  %v3388_v49 = vrot.slane %v3387_v24, 2 }
 0x40b   :  { %v3193_v33 = vrot.slane %v3192_v31, 1  ;;  %v3389_v41 = vadd.f32 %v3388_v49, %v3387_v24 }
 0x40d   :  { %v3390_v61 = vrot.slane %v3389_v41, 1  ;;  %v3194_v39 = vadd.f32 %v3193_v33, %v3192_v31 }
 0x40f   :  { %v3391_v23 = vadd.f32 %v3390_v61, %v3389_v41 }
 0x411   :  { %v3393_v20 = vsel %vm3392_vm0, %v3194_v39, %v3391_v23 }
 0x412   :  { %3395 = vst.msk [vmem:[%s7023_s3] sm:$0x3] %vm3394_vm1, %v3393_v20 }

</bundles_post_ra>
